<compile_context>
chip_gen: v7x
topology: tpu7x:2x2x1
jax: 0.10.0
libtpu: 0.0.40
codegen_flags: <defaults>
</compile_context>

<pallas_src>
import math
from functools import partial

import jax
import jax.numpy as jnp
from jax.experimental import pallas as pl
from jax.experimental.pallas import tpu as pltpu


def _wire3d_kernel(xt_ref, w_ref, o_ref, *, omega0, neg_sigma0_cubed, out_f):
    """One column-tile of points (points on the lane axis).

    xt_ref : (k_pad, tm)     real-block input  [xr ; xi ; 1 ; 0-pad]
    w_ref  : (6*out, k_pad)  stacked real-block weights+bias, row blocks [lr, li, syr, syi, szr, szi]
    o_ref  : (2*out, tm)     rows [0:out) = real(out), rows [out:2out) = imag(out)
    """
    # Single MXU matmul produces real & imag parts of all three complex linears (bias included).
    y = jnp.dot(w_ref[...], xt_ref[...], preferred_element_type=jnp.float32)

    lr  = y[0 * out_f:1 * out_f, :]            # lin (real)
    li  = y[1 * out_f:2 * out_f, :]            # lin (imag)
    syr = y[2 * out_f:3 * out_f, :]
    syi = y[3 * out_f:4 * out_f, :]
    szr = y[4 * out_f:5 * out_f, :]
    szi = y[5 * out_f:6 * out_f, :]

    # arg = |lin|^2 + |scale_y|^2 + |scale_z|^2   (real)
    arg = lr * lr + li * li + syr * syr + syi * syi + szr * szr + szi * szi

    # exp(1j*omega0*lin) * exp(-sigma0^3*arg)
    #   = exp(-sigma0^3*arg - omega0*li) * (cos(omega0*lr) + 1j*sin(omega0*lr))
    amp = jnp.exp(neg_sigma0_cubed * arg - omega0 * li)
    phase = omega0 * lr

    o_ref[0:out_f, :] = amp * jnp.cos(phase)
    o_ref[out_f:2 * out_f, :] = amp * jnp.sin(phase)


def wire3d_forward(x, w_r, w_i, b_r, b_i, *, omega0, sigma0, tm=512):
    """x: (N, in) complex64. w_*: (3, in, out) float32. b_*: (3, 1, out) float32.
    Returns (N, out) complex64."""
    N, in_f = x.shape
    out_f = w_r.shape[-1]

    # --- augmented, transposed real-block input: rows [xr ; xi ; 1 ; 0-pad], points on lanes ---
    xr = jnp.real(x).astype(jnp.float32)
    xi = jnp.imag(x).astype(jnp.float32)
    ones = jnp.ones((N, 1), jnp.float32)
    x_aug = jnp.concatenate([xr, xi, ones], axis=1)          # (N, 2*in+1)

    k_aug = 2 * in_f + 1
    k_pad = ((k_aug + 7) // 8) * 8                            # sublane-align the contraction dim
    if k_pad != k_aug:
        x_aug = jnp.pad(x_aug, ((0, 0), (0, k_pad - k_aug)))
    xt = x_aug.T                                              # (k_pad, N)

    tm = max(128, (tm // 128) * 128)
    tm = min(tm, pl.cdiv(N, 128) * 128)                       # no silly padding for tiny N
    n_pad = pl.cdiv(N, tm) * tm
    if n_pad != N:
        xt = jnp.pad(xt, ((0, 0), (0, n_pad - N)))            # zero columns -> finite, sliced off

    # --- stacked real-block weights (bias folded in): row blocks [lr, li, syr, syi, szr, szi] ---
    # yr_T = [Wr^T | -Wi^T | br^T] @ [xr_T ; xi_T ; 1],   yi_T = [Wi^T | Wr^T | bi^T] @ [...]
    wrt = jnp.transpose(w_r, (0, 2, 1))                       # (3, out, in)
    wit = jnp.transpose(w_i, (0, 2, 1))                       # (3, out, in)
    brt = jnp.transpose(b_r, (0, 2, 1))                       # (3, out, 1)
    bit = jnp.transpose(b_i, (0, 2, 1))                       # (3, out, 1)
    w_real_rows = jnp.concatenate([wrt, -wit, brt], axis=-1)  # (3, out, 2*in+1)
    w_imag_rows = jnp.concatenate([wit, wrt, bit], axis=-1)   # (3, out, 2*in+1)
    w_all = jnp.stack([w_real_rows, w_imag_rows], axis=1).reshape(6 * out_f, k_aug)
    if k_pad != k_aug:
        w_all = jnp.pad(w_all, ((0, 0), (0, k_pad - k_aug)))  # (6*out, k_pad)

    kernel = partial(
        _wire3d_kernel,
        omega0=float(omega0),
        neg_sigma0_cubed=-(float(sigma0) ** 3),
        out_f=out_f,
    )

    o = pl.pallas_call(
        kernel,
        out_shape=jax.ShapeDtypeStruct((2 * out_f, n_pad), jnp.float32),
        grid_spec=pltpu.PrefetchScalarGridSpec(
            num_scalar_prefetch=0,
            grid=(n_pad // tm,),
            in_specs=[
                pl.BlockSpec((k_pad, tm), lambda i: (0, i)),            # xt tile (points on lanes)
                pl.BlockSpec((6 * out_f, k_pad), lambda i: (0, 0)),     # stacked weights (resident)
            ],
            out_specs=pl.BlockSpec((2 * out_f, tm), lambda i: (0, i)),  # combined real/imag output
        ),
        compiler_params=pltpu.CompilerParams(dimension_semantics=("parallel",)),
    )(xt, w_all)

    o = o[:, :N]
    # (N, out) complex64, assembled in one fused XLA pass under jit
    return jax.lax.complex(o[:out_f, :].T, o[out_f:, :].T)


def _init_params(key, in_f, out_f):
    """Deterministic init mimicking torch.nn.Linear default: U(-1/sqrt(in), 1/sqrt(in))
    for both real and imaginary parts of weights and biases of the three linears."""
    bound = 1.0 / math.sqrt(in_f)
    k = jax.random.split(key, 4)
    w_r = jax.random.uniform(k[0], (3, in_f, out_f), jnp.float32, -bound, bound)
    w_i = jax.random.uniform(k[1], (3, in_f, out_f), jnp.float32, -bound, bound)
    b_r = jax.random.uniform(k[2], (3, 1, out_f), jnp.float32, -bound, bound)
    b_i = jax.random.uniform(k[3], (3, 1, out_f), jnp.float32, -bound, bound)
    return w_r, w_i, b_r, b_i


def _reference(x, w_r, w_i, b_r, b_i, omega0, sigma0):
    """Pure-JAX complex reference of the PyTorch forward."""
    W = (w_r + 1j * w_i).astype(jnp.complex64)    # (3, in, out)
    B = (b_r + 1j * b_i).astype(jnp.complex64)    # (3, 1, out)
    lin = x @ W[0] + B[0]
    sy = x @ W[1] + B[1]
    sz = x @ W[2] + B[2]
    freq = jnp.exp(1j * omega0 * lin)
    arg = (jnp.abs(lin) ** 2 + jnp.abs(sy) ** 2 + jnp.abs(sz) ** 2)
    gauss = jnp.exp(-(sigma0 ** 3) * arg)
    return freq * gauss


if __name__ == "__main__":
    N, IN_F, OUT_F = 2000, 16, 32            # N not a multiple of tm -> exercises the padding path

    key = jax.random.PRNGKey(0)
    kx, kp = jax.random.split(key)
    kxr, kxi = jax.random.split(kx)
    # small-magnitude complex input points (N, in_features)
    x = jax.lax.complex(
        0.05 * jax.random.normal(kxr, (N, IN_F), jnp.float32),
        0.05 * jax.random.normal(kxi, (N, IN_F), jnp.float32),
    )
    w_r, w_i, b_r, b_i = _init_params(kp, IN_F, OUT_F)

    fwd = jax.jit(wire3d_forward, static_argnames=("omega0", "sigma0", "tm"))

    # 1) module-default constants (omega0=30, sigma0=10; trainable=False -> compile-time constants)
    out = fwd(x, w_r, w_i, b_r, b_i, omega0=30.0, sigma0=10.0, tm=512)
    out = jax.block_until_ready(out)
    ref = _reference(x, w_r, w_i, b_r, b_i, 30.0, 10.0)
    assert out.shape == (N, OUT_F) and out.dtype == jnp.complex64
    assert jnp.allclose(out, ref, atol=1e-4, rtol=1e-3), "mismatch vs reference (30, 10)"

    # 2) milder constants so outputs are O(1) and the numeric check is non-trivial
    out2 = jax.block_until_ready(fwd(x, w_r, w_i, b_r, b_i, omega0=10.0, sigma0=1.0, tm=512))
    ref2 = _reference(x, w_r, w_i, b_r, b_i, 10.0, 1.0)
    assert jnp.allclose(out2, ref2, atol=1e-5, rtol=1e-3), "mismatch vs reference (10, 1)"

    print("KERNEL_OK")
</pallas_src>

<mosaic_0001>
module attributes {stable_mosaic.version = 11 : i64} {
  func.func @_wire3d_kernel(%arg0: i32, %arg1: memref<40x512xf32, #tpu.memory_space<vmem>>, %arg2: memref<192x40xf32, #tpu.memory_space<vmem>>, %arg3: memref<64x512xf32, #tpu.memory_space<vmem>>) attributes {dimension_semantics = [#tpu.dimension_semantics<parallel>], iteration_bounds = array<i64: 4>, scalar_prefetch = 0 : i64, scratch_operands = 0 : i64, tpu.core_type = #tpu.core_type<tc>, window_params = [{transform_indices = @transform_0, window_bounds = array<i64: 40, 512>}, {pipeline_mode = #tpu.pipeline_mode<synchronous>, transform_indices = @transform_1, window_bounds = array<i64: 192, 40>}, {transform_indices = @transform_2, window_bounds = array<i64: 64, 512>}]} {
    %c0 = arith.constant 0 : index
    %c0_0 = arith.constant 0 : index
    %0 = vector.load %arg2[%c0, %c0_0] : memref<192x40xf32, #tpu.memory_space<vmem>>, vector<192x40xf32>
    %c0_1 = arith.constant 0 : index
    %c0_2 = arith.constant 0 : index
    %1 = vector.load %arg1[%c0_1, %c0_2] : memref<40x512xf32, #tpu.memory_space<vmem>>, vector<40x512xf32>
    %cst = arith.constant dense<0.000000e+00> : vector<192x512xf32>
    %2 = tpu.matmul %0, %1, %cst {dimension_numbers = #tpu.dot_dimension_numbers<[1], [0], [0], [1], [0, 0, 1, 1], [], []>} : vector<192x40xf32>, vector<40x512xf32>, vector<192x512xf32> -> vector<192x512xf32>
    %3 = vector.extract_strided_slice %2 {offsets = [0, 0], sizes = [32, 512], strides = [1, 1]} : vector<192x512xf32> to vector<32x512xf32>
    %4 = vector.extract_strided_slice %2 {offsets = [32, 0], sizes = [32, 512], strides = [1, 1]} : vector<192x512xf32> to vector<32x512xf32>
    %5 = vector.extract_strided_slice %2 {offsets = [64, 0], sizes = [32, 512], strides = [1, 1]} : vector<192x512xf32> to vector<32x512xf32>
    %6 = vector.extract_strided_slice %2 {offsets = [96, 0], sizes = [32, 512], strides = [1, 1]} : vector<192x512xf32> to vector<32x512xf32>
    %7 = vector.extract_strided_slice %2 {offsets = [128, 0], sizes = [32, 512], strides = [1, 1]} : vector<192x512xf32> to vector<32x512xf32>
    %8 = vector.extract_strided_slice %2 {offsets = [160, 0], sizes = [32, 512], strides = [1, 1]} : vector<192x512xf32> to vector<32x512xf32>
    %9 = arith.mulf %3, %3 : vector<32x512xf32>
    %10 = arith.mulf %4, %4 : vector<32x512xf32>
    %11 = arith.addf %9, %10 : vector<32x512xf32>
    %12 = arith.mulf %5, %5 : vector<32x512xf32>
    %13 = arith.addf %11, %12 : vector<32x512xf32>
    %14 = arith.mulf %6, %6 : vector<32x512xf32>
    %15 = arith.addf %13, %14 : vector<32x512xf32>
    %16 = arith.mulf %7, %7 : vector<32x512xf32>
    %17 = arith.addf %15, %16 : vector<32x512xf32>
    %18 = arith.mulf %8, %8 : vector<32x512xf32>
    %19 = arith.addf %17, %18 : vector<32x512xf32>
    %cst_3 = arith.constant -1.000000e+03 : f32
    %20 = vector.broadcast %cst_3 : f32 to vector<32x512xf32>
    %21 = arith.mulf %20, %19 : vector<32x512xf32>
    %cst_4 = arith.constant 3.000000e+01 : f32
    %22 = vector.broadcast %cst_4 : f32 to vector<32x512xf32>
    %23 = arith.mulf %22, %4 : vector<32x512xf32>
    %24 = arith.subf %21, %23 : vector<32x512xf32>
    %25 = math.exp %24 : vector<32x512xf32>
    %cst_5 = arith.constant 3.000000e+01 : f32
    %26 = vector.broadcast %cst_5 : f32 to vector<32x512xf32>
    %27 = arith.mulf %26, %3 : vector<32x512xf32>
    %28 = math.cos %27 : vector<32x512xf32>
    %29 = arith.mulf %25, %28 : vector<32x512xf32>
    %c0_6 = arith.constant 0 : index
    %c0_7 = arith.constant 0 : index
    %30 = vector.load %arg3[%c0_6, %c0_7] : memref<64x512xf32, #tpu.memory_space<vmem>>, vector<32x512xf32>
    tpu.vector_store %arg3[%c0_6, %c0_7], %29 {strides = array<i32>} : memref<64x512xf32, #tpu.memory_space<vmem>>, vector<32x512xf32>,
    %31 = math.sin %27 : vector<32x512xf32>
    %32 = arith.mulf %25, %31 : vector<32x512xf32>
    %c32 = arith.constant 32 : index
    %c0_8 = arith.constant 0 : index
    %33 = vector.load %arg3[%c32, %c0_8] : memref<64x512xf32, #tpu.memory_space<vmem>>, vector<32x512xf32>
    tpu.vector_store %arg3[%c32, %c0_8], %32 {strides = array<i32>} : memref<64x512xf32, #tpu.memory_space<vmem>>, vector<32x512xf32>,
    return
  }
  func.func @transform_0(%arg0: i32) -> (i32, i32) {
    %c0_i32 = arith.constant 0 : i32
    %c0_i32_0 = arith.constant 0 : i32
    return %c0_i32, %arg0 : i32, i32
  }
  func.func @transform_1(%arg0: i32) -> (i32, i32) {
    %c0_i32 = arith.constant 0 : i32
    %c0_i32_0 = arith.constant 0 : i32
    %c0_i32_1 = arith.constant 0 : i32
    return %c0_i32, %c0_i32_0 : i32, i32
  }
  func.func @transform_2(%arg0: i32) -> (i32, i32) {
    %c0_i32 = arith.constant 0 : i32
    %c0_i32_0 = arith.constant 0 : i32
    return %c0_i32, %arg0 : i32, i32
  }
}

</mosaic_0001>

<bundles_post_ra>
// kernel: custom-call.1
= control target key start
LH: loop header
LB: loop body
LE: loop exit
PB: predicated region body
PF: predicated region fallthrough
CT: control target
= control target key end

     0   :  { %s59_s0 = inlined_call_operand.hbm [shape: c64[2000,16], index: 0, kind: input, shape index: {}]   ;;  %s60_s1 = inlined_call_operand.vmem [shape: f32[2000,16], index: 1, kind: output, shape index: {}]  }
   0x1   :  { %s2_s8 = scalar_lea.hbm %s59_s0, 4096 }
   0x2   :  { %3 = vsyncpa [#allocation0], 0  ;;  %s4_s11 = sshll.u32 %s60_s1, 4  ;;  %s34_s14 = scalar_lea.hbm %s59_s0, 8192  ;;  %s5_s11 = int_to_ptr.vmem [resolvable:$true] %s4_s11 }
   0x3   :  { %p11_p0 = scmp.ne.s32.totalorder %s2_s8, %s34_s14  ;;  %p13_p1 = scmp.lt.u32.totalorder %s2_s8, %s59_s0 }
   0x4   :  { %p14_p2 = scmp.lt.u32.totalorder %s34_s14, %s34_s14  ;;  %p16_p4 = scmp.lt.u32.totalorder %s34_s14, %s2_s8 }
   0x6   :  { %p15_p3 = por %p14_p2, %p13_p1 }
   0x8   :  { %p17_p5 = por %p16_p4, %p15_p3 }
   0xa   :  { %p18_p6 = pnand %p17_p5, %p11_p0 }
   0xc   :  { %21 = shalt.err (!%p18_p6)  }
   0xd   :  { %s22_s17 = scalar_lea.vmem %s5_s11, 4096  ;;  %p27_p8 = scmp.lt.s32.totalorder %s5_s11, %s5_s11 }
   0xe   :  { %p23_p7 = scmp.ne.s32.totalorder %s5_s11, %s22_s17  ;;  %p28_p9 = scmp.lt.s32.totalorder %s22_s17, %s22_s17 }
  0x10   :  { %p29_p10 = por %p28_p9, %p27_p8 }
  0x12   :  { %p30_p11 = pnand %p29_p10, %p23_p7 }
  0x14   :  { %33 = shalt.err (!%p30_p11)  }
  0x15   :  { %7 = dma.hbm_to_vmem [thread:$0]  %s2_s8, 4096, %s5_s11, [#allocation0] }
  0x16   :  { %35 = dma.done.wait [#allocation0], 4096  }
  0x17   :  { %36 = vsyncadd [#allocation0], 4294963200 }
  0x18   :  { %9 = vsyncpa [#allocation0], 1 }

// kernel: custom-call
= control target key start
LH: loop header
LB: loop body
LE: loop exit
PB: predicated region body
PF: predicated region fallthrough
CT: control target
= control target key end

     0   :  { %2 = vsyncpa [#allocation0], 0  ;;  %s61_s0 = inlined_call_operand.hbm [shape: c64[2000,16], index: 0, kind: input, shape index: {}]   ;;  %s62_s1 = inlined_call_operand.vmem [shape: f32[2000,16], index: 1, kind: output, shape index: {}]  }
   0x1   :  { %s3_s8 = sshll.u32 %s62_s1, 4  ;;  %s9_s11 = scalar_lea.hbm %s61_s0, 4096  ;;  %s4_s8 = int_to_ptr.vmem [resolvable:$true] %s3_s8 }
   0x2   :  { %p10_p0 = scmp.ne.s32.totalorder %s61_s0, %s9_s11  ;;  %s11_s16 = scalar_lea.hbm %s61_s0, 8192 }
   0x3   :  { %p12_p1 = scmp.lt.u32.totalorder %s11_s16, %s9_s11  ;;  %p13_p2 = scmp.lt.u32.totalorder %s9_s11, %s61_s0 }
   0x5   :  { %p14_p3 = por %p13_p2, %p12_p1 }
   0x7   :  { %p15_p4 = pnand %p14_p3, %p10_p0 }
   0x9   :  { %18 = shalt.err (!%p15_p4)  }
   0xa   :  { %s19_s1 = scalar_lea.vmem %s4_s8, 4096  ;;  %p24_p6 = scmp.lt.s32.totalorder %s4_s8, %s4_s8 }
   0xb   :  { %p20_p5 = scmp.ne.s32.totalorder %s4_s8, %s19_s1  ;;  %p25_p7 = scmp.lt.s32.totalorder %s19_s1, %s19_s1 }
   0xd   :  { %p26_p8 = por %p25_p7, %p24_p6 }
   0xf   :  { %p27_p9 = pnand %p26_p8, %p20_p5 }
  0x11   :  { %30 = shalt.err (!%p27_p9)  }
  0x12   :  { %6 = dma.hbm_to_vmem [thread:$0]  %s61_s0, 4096, %s4_s8, [#allocation0] }
  0x13   :  { %31 = dma.done.wait [#allocation0], 4096  }
  0x14   :  { %32 = vsyncadd [#allocation0], 4294963200 }
  0x15   :  { %8 = vsyncpa [#allocation0], 1 }

// kernel: custom-call.2
= control target key start
LH: loop header
LB: loop body
LE: loop exit
PB: predicated region body
PF: predicated region fallthrough
CT: control target
= control target key end

     0   :  { %s126_s0 = inlined_call_operand.vmem [shape: f32[2000,32], index: 0, kind: input, shape index: {}]   ;;  %s127_s1 = inlined_call_operand.vmem [shape: f32[2000,32], index: 1, kind: input, shape index: {}]   ;;  %s128_s2 = inlined_call_operand.hbm [shape: c64[2000,32], index: 2, kind: output, shape index: {}]  }
   0x1   :  { %s87_s11 = scalar_lea.hbm %s128_s2, 8192 }
   0x2   :  { %4 = vsyncpa [#allocation0], 0  ;;  %s5_s14 = sshll.u32 %s126_s0, 4  ;;  %s6_s14 = int_to_ptr.vmem [resolvable:$true] %s5_s14 }
   0x3   :  { %s18_s15 = scalar_lea.vmem %s6_s14, 8192  ;;  %p23_p1 = scmp.lt.s32.totalorder %s6_s14, %s6_s14 }
   0x4   :  { %p19_p0 = scmp.ne.s32.totalorder %s6_s14, %s18_s15  ;;  %p24_p2 = scmp.lt.s32.totalorder %s18_s15, %s18_s15 }
   0x6   :  { %p25_p3 = por %p24_p2, %p23_p1 }
   0x8   :  { %p26_p4 = pnand %p25_p3, %p19_p0 }
   0xa   :  { %29 = shalt.err (!%p26_p4)  }
   0xb   :  { %p31_p5 = scmp.ne.s32.totalorder %s128_s2, %s87_s11  ;;  %s32_s0 = scalar_lea.hbm %s128_s2, 16384 }
   0xc   :  { %p33_p6 = scmp.lt.u32.totalorder %s32_s0, %s87_s11  ;;  %p34_p7 = scmp.lt.u32.totalorder %s87_s11, %s128_s2 }
   0xe   :  { %p35_p8 = por %p34_p7, %p33_p6 }
  0x10   :  { %p36_p9 = pnand %p35_p8, %p31_p5 }
  0x12   :  { %39 = shalt.err (!%p36_p9)  }
  0x13   :  { %8 = dma.vmem_to_hbm [thread:$0]  %s6_s14, 8192, %s128_s2, [#allocation0] }
  0x14   :  { %65 = dma.done.wait [#allocation0], 8192  }
  0x15   :  { %66 = vsyncadd [#allocation0], 4294959104 }
  0x16   :  { %10 = vsyncpa [#allocation0], 1 }
  0x17   :  { %11 = vsyncpa [#allocation1], 0  ;;  %s12_s28 = sshll.u32 %s127_s1, 4  ;;  %s13_s28 = int_to_ptr.vmem [resolvable:$true] %s12_s28 }
  0x18   :  { %s40_s29 = scalar_lea.vmem %s13_s28, 8192  ;;  %p45_p11 = scmp.lt.s32.totalorder %s13_s28, %s13_s28 }
  0x19   :  { %p41_p10 = scmp.ne.s32.totalorder %s13_s28, %s40_s29  ;;  %p46_p12 = scmp.lt.s32.totalorder %s40_s29, %s40_s29 }
  0x1b   :  { %p47_p13 = por %p46_p12, %p45_p11 }
  0x1d   :  { %p48_p0 = pnand %p47_p13, %p41_p10 }
  0x1f   :  { %51 = shalt.err (!%p48_p0)  }
  0x20   :  { %p53_p1 = scmp.ne.s32.totalorder %s87_s11, %s32_s0  ;;  %p56_p2 = scmp.lt.u32.totalorder %s32_s0, %s32_s0 }
  0x22   :  { %p57_p3 = por %p56_p2, %p34_p7 }
  0x24   :  { %p59_p4 = por %p57_p3, %p33_p6 }
  0x26   :  { %p60_p5 = pnand %p59_p4, %p53_p1 }
  0x28   :  { %63 = shalt.err (!%p60_p5)  }
  0x29   :  { %15 = dma.vmem_to_hbm [thread:$0]  %s13_s28, 8192, %s87_s11, [#allocation1] }
  0x2a   :  { %67 = dma.done.wait [#allocation1], 8192  }
  0x2b   :  { %68 = vsyncadd [#allocation1], 4294959104 }
  0x2c   :  { %17 = vsyncpa [#allocation1], 1 }

// kernel: wire3d_forward.1
= control target key start
LH: loop header
LB: loop body
LE: loop exit
PB: predicated region body
PF: predicated region fallthrough
CT: control target
= control target key end

     0   :  { %s4972_s9 = smov 0   ;;  %s4974_s10 = smov 0   ;;  %s8059_s0 = inlined_call_operand.vmem [shape: f32[40,2048], index: 0, kind: input, shape index: {}]   ;;  %s8060_s1 = inlined_call_operand.vmem [shape: f32[192,40], index: 1, kind: input, shape index: {}]   ;;  %s8061_s2 = inlined_call_operand.vmem [shape: f32[64,2048], index: 2, kind: output, shape index: {}]  }
   0x1   :  { %s4976_s11 = smov 0  }
   0x2 LB: > { %s4526_s12 = sadd.s32 4294967295, %s4948_s11   ;;  %s4989_s13 = sadd.s32 1, %s4948_s11   ;;  %s4948_s11 = sphi %s4976_s11, %s8421_s11   ;;  %s4944_s10 = sphi %s4974_s10, %s8420_s10   ;;  %s4940_s9 = sphi %s4972_s9, %s8419_s9  }
   0x3   : > { %s16_s14 = ssub.s32 %s4948_s11, %s4989_s13  ;;  %s19_s15 = sadd.s32 1, %s4944_s10 }
   0x4   : > { %p17_p0 = scmp.eq.s32.totalorder %s16_s14, 0  ;;  %p26_p1 = scmp.ne.s32.totalorder %s4944_s10, %s4940_s9 }
   0x5   : > { %p27_p2 = scmp.eq.s32.totalorder %s4948_s11, 0  ;;  %p77_p3 = scmp.eq.s32.totalorder %s4526_s12, 3 }
   0x6   : > { %s5000_s16 = scalar_select %p17_p0, %s4944_s10, %s19_s15  }
   0x7   : > { %p28_p4 = por %p27_p2, %p26_p1  ;;  %p5002_p5 = por %p77_p3, %p26_p1 }
   0x8   : > { %p4529_p6 = scmp.ge.s32.totalorder %s4948_s11, 4 }
   0xa   : > { %102 = sbr.rel (%p4529_p6) target bundleno = 32 (0x20), region = 20 }
  0x11   : > { %105 = sbr.rel (!%p28_p4) target bundleno = 32 (0x20), region = 24  ;;  %s107_s18 = sand.u32 (%p28_p4), 1, %s4944_s10  }
  0x12   : > { %s4715_s19 = sshll.u32 (%p28_p4), %s4948_s11, 5  ;;  %s4733_s20 = smul.u32 (%p28_p4), 160, %s107_s18 }
  0x13   : > { %s5012_s23 = scalar_lea.vmem (%p28_p4), %s8059_s0, %s4715_s19 }
  0x14   : > { %v125_v0 = vld [vmem:[%s5012_s23] sm:$0xff] (%p28_p4)  ;;  %v127_v1 = vld [vmem:[%s5012_s23 + $0x8] sm:$0xff] (%p28_p4)  ;;  %v129_v2 = vld [vmem:[%s5012_s23 + $0x10] sm:$0xff] (%p28_p4)  ;;  %s5020_s24 = scalar_lea.vmem (%p28_p4), [#allocation2], %s4733_s20 }
  0x15   : > { %v131_v3 = vld [vmem:[%s5012_s23 + $0x18] sm:$0xff] (%p28_p4)  ;;  %v133_v4 = vld [vmem:[%s5012_s23 + $0x80] sm:$0xff] (%p28_p4)  ;;  %v135_v5 = vld [vmem:[%s5012_s23 + $0x88] sm:$0xff] (%p28_p4)  ;;  %126 = vst [vmem:[%s5020_s24] sm:$0xff] (%p28_p4), %v125_v0 }
  0x16   : > { %128 = vst [vmem:[%s5020_s24 + $0x8] sm:$0xff] (%p28_p4), %v127_v1  ;;  %130 = vst [vmem:[%s5020_s24 + $0x10] sm:$0xff] (%p28_p4), %v129_v2  ;;  %v137_v6 = vld [vmem:[%s5012_s23 + $0x90] sm:$0xff] (%p28_p4)  ;;  %v139_v7 = vld [vmem:[%s5012_s23 + $0x98] sm:$0xff] (%p28_p4) }
  0x17   : > { %132 = vst [vmem:[%s5020_s24 + $0x18] sm:$0xff] (%p28_p4), %v131_v3  ;;  %134 = vst [vmem:[%s5020_s24 + $0x20] sm:$0xff] (%p28_p4), %v133_v4  ;;  %v141_v8 = vld [vmem:[%s5012_s23 + $0x100] sm:$0xff] (%p28_p4)  ;;  %v143_v9 = vld [vmem:[%s5012_s23 + $0x108] sm:$0xff] (%p28_p4) }
  0x18   : > { %136 = vst [vmem:[%s5020_s24 + $0x28] sm:$0xff] %v135_v5  ;;  %138 = vst [vmem:[%s5020_s24 + $0x30] sm:$0xff] %v137_v6  ;;  %v145_v10 = vld [vmem:[%s5012_s23 + $0x110] sm:$0xff]  ;;  %v147_v11 = vld [vmem:[%s5012_s23 + $0x118] sm:$0xff] }
  0x19   : > { %140 = vst [vmem:[%s5020_s24 + $0x38] sm:$0xff] %v139_v7  ;;  %142 = vst [vmem:[%s5020_s24 + $0x40] sm:$0xff] %v141_v8  ;;  %v149_v12 = vld [vmem:[%s5012_s23 + $0x180] sm:$0xff]  ;;  %v151_v13 = vld [vmem:[%s5012_s23 + $0x188] sm:$0xff] }
  0x1a   : > { %144 = vst [vmem:[%s5020_s24 + $0x48] sm:$0xff] %v143_v9  ;;  %146 = vst [vmem:[%s5020_s24 + $0x50] sm:$0xff] %v145_v10  ;;  %v153_v14 = vld [vmem:[%s5012_s23 + $0x190] sm:$0xff]  ;;  %v155_v15 = vld [vmem:[%s5012_s23 + $0x198] sm:$0xff] }
  0x1b   : > { %148 = vst [vmem:[%s5020_s24 + $0x58] sm:$0xff] %v147_v11  ;;  %150 = vst [vmem:[%s5020_s24 + $0x60] sm:$0xff] %v149_v12  ;;  %v157_v16 = vld [vmem:[%s5012_s23 + $0x200] sm:$0xff]  ;;  %v159_v17 = vld [vmem:[%s5012_s23 + $0x208] sm:$0xff] }
  0x1c   : > { %152 = vst [vmem:[%s5020_s24 + $0x68] sm:$0xff] %v151_v13  ;;  %154 = vst [vmem:[%s5020_s24 + $0x70] sm:$0xff] %v153_v14  ;;  %v161_v18 = vld [vmem:[%s5012_s23 + $0x210] sm:$0xff]  ;;  %v163_v19 = vld [vmem:[%s5012_s23 + $0x218] sm:$0xff] }
  0x1d   : > { %156 = vst [vmem:[%s5020_s24 + $0x78] sm:$0xff] %v155_v15  ;;  %158 = vst [vmem:[%s5020_s24 + $0x80] sm:$0xff] %v157_v16 }
  0x1e   : > { %160 = vst [vmem:[%s5020_s24 + $0x88] sm:$0xff] %v159_v17  ;;  %162 = vst [vmem:[%s5020_s24 + $0x90] sm:$0xff] %v161_v18 }
  0x1f   : > { %164 = vst [vmem:[%s5020_s24 + $0x98] sm:$0xff] %v163_v19 }
  0x20 PF: > { %p4532_p7 = scmp.ge.s32.totalorder %s4948_s11, 1  ;;  %p169_p8 = scmp.lt.s32.totalorder %s4948_s11, 5 }
  0x22   : > { %p170_p9 = pnand %p4532_p7, %p169_p8 }
  0x24   : > { %173 = sbr.rel (%p170_p9) target bundleno = 811 (0x32b), region = 47 }
  0x2b   : > { %s176_s25 = sand.u32 1, %s4940_s9   ;;  %v4950_v20 = vmov 0.0   ;;  %v198_v49 = vld [vmem:[%s8060_s1] sm:$0xff]  ;;  %vm242_vm0 = vcmask 326656   ;;  %v199_v50 = vld [vmem:[%s8060_s1 + $0x8] sm:$0xff]  ;;  %v200_v51 = vld [vmem:[%s8060_s1 + $0x10] sm:$0xff] }
  0x2c   : > { %s4734_s26 = smul.u32 160, %s176_s25  ;;  %379 = vmatprep.mubr.f32.mxu0 %v4950_v20  ;;  %588 = vmatprep.mubr.f32.mxu1 %v4950_v20  ;;  %v201_v52 = vld [vmem:[%s8060_s1 + $0x18] sm:$0xff]  ;;  %v202_v53 = vld [vmem:[%s8060_s1 + $0x20] sm:$0xff]  ;;  %v203_v54 = vld [vmem:[%s8060_s1 + $0x28] sm:$0xff]  ;;  %s7847_s8 = sshll.u32 %s176_s25, 8 }
  0x2d   : > { %v204_v55 = vld [vmem:[%s8060_s1 + $0x30] sm:$0xff]  ;;  %v205_v56 = vld [vmem:[%s8060_s1 + $0x38] sm:$0xff]  ;;  %v206_v57 = vld [vmem:[%s8060_s1 + $0x40] sm:$0xff]  ;;  %s7872_s9 = scalar_lea.vmem [#allocation3], %s7847_s8  ;;  %s4716_s25 = sshll.u32 (%p5002_p5), %s4526_s12, 5 }
  0x2e   : > { %s5063_s27 = scalar_lea.vmem [#allocation2], %s4734_s26  ;;  %v207_v58 = vld [vmem:[%s8060_s1 + $0x48] sm:$0xff]  ;;  %v208_v59 = vld [vmem:[%s8060_s1 + $0x50] sm:$0xff]  ;;  %v209_v60 = vld [vmem:[%s8060_s1 + $0x58] sm:$0xff]  ;;  %s7986_s17 = scalar_lea.vmem (%p5002_p5), %s8061_s2, %s4716_s25 }
  0x2f   : > { %v223_v21 = vld [vmem:[%s5063_s27 + $0x8] sm:$0xff]  ;;  %v225_v23 = vld [vmem:[%s5063_s27 + $0x18] sm:$0xff]  ;;  %v222_v26 = vld [vmem:[%s5063_s27] sm:$0xff] }
  0x30   : > { %v227_v22 = vld [vmem:[%s5063_s27 + $0x28] sm:$0xff]  ;;  %v229_v25 = vld [vmem:[%s5063_s27 + $0x38] sm:$0xff]  ;;  %v226_v27 = vld [vmem:[%s5063_s27 + $0x20] sm:$0xff] }
  0x31   : > { %v4717_v24 = vpack.c.bf16 %v227_v22, %v223_v21  ;;  %v4725_v28 = vpack.c.bf16 %v229_v25, %v225_v23  ;;  %v4719_v29 = vpack.c.bf16 %v226_v27, %v222_v26  ;;  %v224_v30 = vld [vmem:[%s5063_s27 + $0x10] sm:$0xff]  ;;  %v231_v32 = vld [vmem:[%s5063_s27 + $0x48] sm:$0xff]  ;;  %v233_v35 = vld [vmem:[%s5063_s27 + $0x58] sm:$0xff] }
  0x32   : > { %v228_v31 = vld [vmem:[%s5063_s27 + $0x30] sm:$0xff]  ;;  %v235_v34 = vld [vmem:[%s5063_s27 + $0x68] sm:$0xff]  ;;  %v237_v36 = vld [vmem:[%s5063_s27 + $0x78] sm:$0xff] }
  0x33   : > { %4718 = vmatprep.subr.bf16.mxu0 %v4717_v24  ;;  %v4727_v33 = vpack.c.bf16 %v228_v31, %v224_v30  ;;  %4726 = vmatprep.subr.bf16.mxu1 %v4725_v28  ;;  %v4721_v37 = vpack.c.bf16 %v235_v34, %v231_v32  ;;  %v4729_v38 = vpack.c.bf16 %v237_v36, %v233_v35  ;;  %v230_v39 = vld [vmem:[%s5063_s27 + $0x40] sm:$0xff]  ;;  %v232_v41 = vld [vmem:[%s5063_s27 + $0x50] sm:$0xff]  ;;  %v239_v45 = vld [vmem:[%s5063_s27 + $0x88] sm:$0xff] }
  0x34   : > { %4720 = vmatpush1.bf16.msra.mxu0 %v4719_v29  ;;  %v234_v40 = vld [vmem:[%s5063_s27 + $0x60] sm:$0xff]  ;;  %v236_v43 = vld [vmem:[%s5063_s27 + $0x70] sm:$0xff]  ;;  %v241_v46 = vld [vmem:[%s5063_s27 + $0x98] sm:$0xff] }
  0x35   : > { %4728 = vmatpush1.bf16.msra.mxu1 %v4727_v33  ;;  %v4723_v42 = vpack.c.bf16 %v234_v40, %v230_v39  ;;  %4722 = vmatprep.subr.bf16.mxu0 %v4721_v37  ;;  %v4731_v44 = vpack.c.bf16 %v236_v43, %v232_v41  ;;  %v238_v47 = vld [vmem:[%s5063_s27 + $0x80] sm:$0xff]  ;;  %v240_v48 = vld [vmem:[%s5063_s27 + $0x90] sm:$0xff]  ;;  %v211_v62 = vld [vmem:[%s8060_s1 + $0x68] sm:$0xff] }
  0x36   : > { %4730 = vmatprep.subr.bf16.mxu1 %v4729_v38  ;;  %v210_v61 = vld [vmem:[%s8060_s1 + $0x60] sm:$0xff]  ;;  %v212_v63 = vld [vmem:[%s8060_s1 + $0x70] sm:$0xff]  ;;  %v213_v0 = vld [vmem:[%s8060_s1 + $0x78] sm:$0xff] }
  0x37   : > { %v214_v1 = vld [vmem:[%s8060_s1 + $0x80] sm:$0xff]  ;;  %v215_v2 = vld [vmem:[%s8060_s1 + $0x88] sm:$0xff]  ;;  %v216_v3 = vld [vmem:[%s8060_s1 + $0x90] sm:$0xff] }
  0x38   : > { %4724 = vmatpush1.bf16.msra.mxu0 %v4723_v42  ;;  %v217_v4 = vld [vmem:[%s8060_s1 + $0x98] sm:$0xff]  ;;  %v218_v5 = vld [vmem:[%s8060_s1 + $0xa0] sm:$0xff]  ;;  %v219_v6 = vld [vmem:[%s8060_s1 + $0xa8] sm:$0xff] }
  0x39   : > { %4732 = vmatpush1.bf16.msra.mxu1 %v4731_v44  ;;  %323 = vmatprep.subr.mxu0 %v239_v45  ;;  %v220_v7 = vld [vmem:[%s8060_s1 + $0xb0] sm:$0xff]  ;;  %v221_v8 = vld [vmem:[%s8060_s1 + $0xb8] sm:$0xff]  ;;  %v8074_v44 = vmov 683565275  }
  0x3a   : > { %532 = vmatprep.subr.mxu1 %v241_v46  ;;  %v8076_v46 = vmov 2475754826  }
  0x3c   : > { %324 = vmatpush1.msra.mxu0 %v238_v47 }
  0x3d   : > { %533 = vmatpush1.msra.mxu1 %v240_v48  ;;  %4534 = vmatmul.mubr.msk.f32.vlgmr.msra.gmra.mrb[0].mxu0 %vm242_vm0, %v198_v49  ;;  %v8078_v48 = vmov 2131351028  }
  0x3e   : > { %4558 = vmatmul.mubr.msk.f32.vlgmr.msra.gmra.mrb[0].mxu1 %vm242_vm0, %v198_v49  ;;  %385 = vmatprep.mubr.f32.mxu0 %v4950_v20 }
  0x3f   : > { %594 = vmatprep.mubr.f32.mxu1 %v4950_v20 }
  0x41   : > { %4535 = vmatmul.mubr.msk.f32.gmra.mrb[2].mxu0 %vm242_vm0, %v199_v50 }
  0x42   : > { %4559 = vmatmul.mubr.msk.f32.gmra.mrb[2].mxu1 %vm242_vm0, %v199_v50  ;;  %391 = vmatprep.mubr.f32.mxu0 %v4950_v20  ;;  %v8067_v50 = vmov 2102212464  }
  0x43   : > { %600 = vmatprep.mubr.f32.mxu1 %v4950_v20 }
  0x45   : > { %4536 = vmatmul.mubr.msk.f32.gmra.mrb[4].mxu0 %vm242_vm0, %v200_v51 }
  0x46   : > { %4560 = vmatmul.mubr.msk.f32.gmra.mrb[4].mxu1 %vm242_vm0, %v200_v51  ;;  %397 = vmatprep.mubr.f32.mxu0 %v4950_v20 }
  0x47   : > { %606 = vmatprep.mubr.f32.mxu1 %v4950_v20 }
  0x49   : > { %4537 = vmatmul.mubr.msk.f32.gmra.mrb[6].mxu0 %vm242_vm0, %v201_v52 }
  0x4a   : > { %4561 = vmatmul.mubr.msk.f32.gmra.mrb[6].mxu1 %vm242_vm0, %v201_v52  ;;  %403 = vmatprep.mubr.f32.mxu0 %v4950_v20 }
  0x4b   : > { %612 = vmatprep.mubr.f32.mxu1 %v4950_v20 }
  0x4d   : > { %4538 = vmatmul.mubr.msk.f32.gmra.mrb[8].mxu0 %vm242_vm0, %v202_v53 }
  0x4e   : > { %4562 = vmatmul.mubr.msk.f32.gmra.mrb[8].mxu1 %vm242_vm0, %v202_v53  ;;  %409 = vmatprep.mubr.f32.mxu0 %v4950_v20 }
  0x4f   : > { %618 = vmatprep.mubr.f32.mxu1 %v4950_v20 }
  0x51   : > { %4539 = vmatmul.mubr.msk.f32.gmra.mrb[10].mxu0 %vm242_vm0, %v203_v54 }
  0x52   : > { %4563 = vmatmul.mubr.msk.f32.gmra.mrb[10].mxu1 %vm242_vm0, %v203_v54  ;;  %415 = vmatprep.mubr.f32.mxu0 %v4950_v20 }
  0x53   : > { %624 = vmatprep.mubr.f32.mxu1 %v4950_v20 }
  0x55   : > { %4540 = vmatmul.mubr.msk.f32.gmra.mrb[12].mxu0 %vm242_vm0, %v204_v55 }
  0x56   : > { %4564 = vmatmul.mubr.msk.f32.gmra.mrb[12].mxu1 %vm242_vm0, %v204_v55  ;;  %421 = vmatprep.mubr.f32.mxu0 %v4950_v20  ;;  %v8071_v55 = vmov 920167782  }
  0x57   : > { %630 = vmatprep.mubr.f32.mxu1 %v4950_v20 }
  0x59   : > { %4541 = vmatmul.mubr.msk.f32.gmra.mrb[14].mxu0 %vm242_vm0, %v205_v56 }
  0x5a   : > { %4565 = vmatmul.mubr.msk.f32.gmra.mrb[14].mxu1 %vm242_vm0, %v205_v56  ;;  %427 = vmatprep.mubr.f32.mxu0 %v4950_v20 }
  0x5b   : > { %636 = vmatprep.mubr.f32.mxu1 %v4950_v20 }
  0x5d   : > { %4542 = vmatmul.mubr.msk.f32.gmra.mrb[16].mxu0 %vm242_vm0, %v206_v57 }
  0x5e   : > { %4566 = vmatmul.mubr.msk.f32.gmra.mrb[16].mxu1 %vm242_vm0, %v206_v57  ;;  %433 = vmatprep.mubr.f32.mxu0 %v4950_v20 }
  0x5f   : > { %642 = vmatprep.mubr.f32.mxu1 %v4950_v20 }
  0x61   : > { %4543 = vmatmul.mubr.msk.f32.gmra.mrb[18].mxu0 %vm242_vm0, %v207_v58 }
  0x62   : > { %4567 = vmatmul.mubr.msk.f32.gmra.mrb[18].mxu1 %vm242_vm0, %v207_v58  ;;  %439 = vmatprep.mubr.f32.mxu0 %v4950_v20  ;;  %v8069_v58 = vmov 1326507024  }
  0x63   : > { %648 = vmatprep.mubr.f32.mxu1 %v4950_v20 }
  0x65   : > { %4544 = vmatmul.mubr.msk.f32.gmra.mrb[20].mxu0 %vm242_vm0, %v208_v59 }
  0x66   : > { %4568 = vmatmul.mubr.msk.f32.gmra.mrb[20].mxu1 %vm242_vm0, %v208_v59  ;;  %445 = vmatprep.mubr.f32.mxu0 %v4950_v20 }
  0x67   : > { %654 = vmatprep.mubr.f32.mxu1 %v4950_v20 }
  0x69   : > { %4545 = vmatmul.mubr.msk.f32.gmra.mrb[22].mxu0 %vm242_vm0, %v209_v60 }
  0x6a   : > { %4569 = vmatmul.mubr.msk.f32.gmra.mrb[22].mxu1 %vm242_vm0, %v209_v60  ;;  %451 = vmatprep.mubr.f32.mxu0 %v4950_v20 }
  0x6b   : > { %660 = vmatprep.mubr.f32.mxu1 %v4950_v20 }
  0x6d   : > { %4546 = vmatmul.mubr.msk.f32.gmra.mrb[24].mxu0 %vm242_vm0, %v210_v61 }
  0x6e   : > { %4570 = vmatmul.mubr.msk.f32.gmra.mrb[24].mxu1 %vm242_vm0, %v210_v61  ;;  %457 = vmatprep.mubr.f32.mxu0 %v4950_v20 }
  0x6f   : > { %666 = vmatprep.mubr.f32.mxu1 %v4950_v20 }
  0x71   : > { %4547 = vmatmul.mubr.msk.f32.gmra.mrb[26].mxu0 %vm242_vm0, %v211_v62 }
  0x72   : > { %4571 = vmatmul.mubr.msk.f32.gmra.mrb[26].mxu1 %vm242_vm0, %v211_v62  ;;  %463 = vmatprep.mubr.f32.mxu0 %v4950_v20 }
  0x73   : > { %672 = vmatprep.mubr.f32.mxu1 %v4950_v20 }
  0x75   : > { %4548 = vmatmul.mubr.msk.f32.gmra.mrb[28].mxu0 %vm242_vm0, %v212_v63 }
  0x76   : > { %4572 = vmatmul.mubr.msk.f32.gmra.mrb[28].mxu1 %vm242_vm0, %v212_v63  ;;  %469 = vmatprep.mubr.f32.mxu0 %v4950_v20 }
  0x77   : > { %678 = vmatprep.mubr.f32.mxu1 %v4950_v20 }
  0x79   : > { %4549 = vmatmul.mubr.msk.f32.gmra.mrb[30].mxu0 %vm242_vm0, %v213_v0 }
  0x7a   : > { %4573 = vmatmul.mubr.msk.f32.gmra.mrb[30].mxu1 %vm242_vm0, %v213_v0  ;;  %475 = vmatprep.mubr.f32.mxu0 %v4950_v20 }
  0x7b   : > { %684 = vmatprep.mubr.f32.mxu1 %v4950_v20 }
  0x7d   : > { %4550 = vmatmul.mubr.msk.f32.gmra.mrb[32].mxu0 %vm242_vm0, %v214_v1 }
  0x7e   : > { %4574 = vmatmul.mubr.msk.f32.gmra.mrb[32].mxu1 %vm242_vm0, %v214_v1  ;;  %481 = vmatprep.mubr.f32.mxu0 %v4950_v20 }
  0x7f   : > { %690 = vmatprep.mubr.f32.mxu1 %v4950_v20 }
  0x81   : > { %4551 = vmatmul.mubr.msk.f32.gmra.mrb[34].mxu0 %vm242_vm0, %v215_v2 }
  0x82   : > { %4575 = vmatmul.mubr.msk.f32.gmra.mrb[34].mxu1 %vm242_vm0, %v215_v2  ;;  %487 = vmatprep.mubr.f32.mxu0 %v4950_v20 }
  0x83   : > { %696 = vmatprep.mubr.f32.mxu1 %v4950_v20 }
  0x85   : > { %4552 = vmatmul.mubr.msk.f32.gmra.mrb[36].mxu0 %vm242_vm0, %v216_v3 }
  0x86   : > { %4576 = vmatmul.mubr.msk.f32.gmra.mrb[36].mxu1 %vm242_vm0, %v216_v3  ;;  %493 = vmatprep.mubr.f32.mxu0 %v4950_v20 }
  0x87   : > { %702 = vmatprep.mubr.f32.mxu1 %v4950_v20 }
  0x89   : > { %4553 = vmatmul.mubr.msk.f32.gmra.mrb[38].mxu0 %vm242_vm0, %v217_v4 }
  0x8a   : > { %4577 = vmatmul.mubr.msk.f32.gmra.mrb[38].mxu1 %vm242_vm0, %v217_v4  ;;  %499 = vmatprep.mubr.f32.mxu0 %v4950_v20 }
  0x8b   : > { %708 = vmatprep.mubr.f32.mxu1 %v4950_v20 }
  0x8d   : > { %4554 = vmatmul.mubr.msk.f32.gmra.mrb[40].mxu0 %vm242_vm0, %v218_v5 }
  0x8e   : > { %4578 = vmatmul.mubr.msk.f32.gmra.mrb[40].mxu1 %vm242_vm0, %v218_v5  ;;  %505 = vmatprep.mubr.f32.mxu0 %v4950_v20 }
  0x8f   : > { %714 = vmatprep.mubr.f32.mxu1 %v4950_v20 }
  0x91   : > { %4555 = vmatmul.mubr.msk.f32.gmra.mrb[42].mxu0 %vm242_vm0, %v219_v6 }
  0x92   : > { %4579 = vmatmul.mubr.msk.f32.gmra.mrb[42].mxu1 %vm242_vm0, %v219_v6  ;;  %511 = vmatprep.mubr.f32.mxu0 %v4950_v20 }
  0x93   : > { %720 = vmatprep.mubr.f32.mxu1 %v4950_v20 }
  0x95   : > { %4556 = vmatmul.mubr.msk.f32.gmra.mrb[44].mxu0 %vm242_vm0, %v220_v7 }
  0x96   : > { %4580 = vmatmul.mubr.msk.f32.gmra.mrb[44].mxu1 %vm242_vm0, %v220_v7  ;;  %517 = vmatprep.mubr.f32.mxu0 %v4950_v20 }
  0x97   : > { %726 = vmatprep.mubr.f32.mxu1 %v4950_v20 }
  0x99   : > { %4557 = vmatmul.mubr.msk.f32.gmra.mrb[46].mxu0 %vm242_vm0, %v221_v8 }
  0x9a   : > { %4581 = vmatmul.mubr.msk.f32.gmra.mrb[46].mxu1 %vm242_vm0, %v221_v8 }
 0x110   : > { %v5251_v9 = vpop.f32.mrb[0].mxu0 }
 0x111   : > { %v5254_v10 = vmul.f32 30.0, %v5251_v9  ;;  %v5256_v11 = vpop.f32.mrb[0].mxu1  ;;  %v5258_v12 = vpop.f32.mrb[1].mxu0 }
 0x112   : > { %v5261_v13 = vmul.f32 30.0, %v5256_v11  ;;  %v5264_v14 = vmul.f32 30.0, %v5258_v12  ;;  %v5266_v15 = vpop.f32.mrb[1].mxu1 }
 0x113   : > { %v1005_v16 = vand.u32 2147483647, %v5254_v10  ;;  %v1008_v17 = vand.u32 2139095040, %v5254_v10 }
 0x114   : > { %v1214_v18 = vand.u32 2139095040, %v5261_v13  ;;  %v5271_v19 = vpop.f32.mrb[2].mxu0  ;;  %v1111_v23 = vand.u32 2139095040, %v5264_v14  ;;  %v8065_v31 = vand.u32 2147483647, %v5261_v13 }
 0x115   : > { %v1009_v20 = vshrl.u32 %v1008_v17, 23  ;;  %v1012_v21 = vand.u32 8388607, %v1005_v16  ;;  %v5276_v25 = vpop.f32.mrb[2].mxu1  ;;  %v5278_v26 = vpop.f32.mrb[3].mxu0 }
 0x116   : > { %v1215_v22 = vshrl.u32 %v1214_v18, 23  ;;  %v1112_v28 = vshrl.u32 %v1111_v23, 23  ;;  %v5285_v39 = vand.u32 8388607, %v8065_v31  ;;  %v5304_v3 = vpop.f32.mrb[3].mxu1 }
 0x117   : > { %v4582_v24 = vadd.s32 4294967169, %v1009_v20  ;;  %v1013_v30 = vor.u32 8388608, %v1012_v21 }
 0x118   : > { %v4590_v27 = vadd.s32 4294967169, %v1215_v22  ;;  %v4586_v33 = vadd.s32 4294967169, %v1112_v28 }
 0x119   : > { %v1015_v29 = vadd.s32 1, %v4582_v24  ;;  %v5281_v38 = vshll.u32 %v1013_v30, 8 }
 0x11a   : > { %v1221_v32 = vadd.s32 1, %v4590_v27  ;;  %v5289_v43 = vadd.s32 1, %v4586_v33 }
 0x11b   : > { %vm1016_vm1 = vcmp.gt.s32.totalorder %v1015_v29, 0 }
 0x11c   : > { %v1017_v34 = vsel %vm1016_vm1, %v1015_v29, 0  ;;  %vm1222_vm2 = vcmp.gt.s32.totalorder %v1221_v32, 0  ;;  %vm1119_vm7 = vcmp.gt.s32.totalorder %v5289_v43, 0 }
 0x11d   : > { %v1019_v35 = vand.u32 31, %v1017_v34  ;;  %v1223_v36 = vsel %vm1222_vm2, %v1221_v32, 0  ;;  %v1018_v37 = vshrl.u32 %v1017_v34, 5 }
 0x11e   : > { %v5287_v41 = vshrl.u32 %v1223_v36, 5  ;;  %v1225_v42 = vand.u32 31, %v1223_v36 }
 0x11f   : > { %v1020_v40 = vsub.s32 32, %v1019_v35  ;;  %v1022_v45 = vshll.u32 %v8074_v44, %v1019_v35  ;;  %v1025_v47 = vshll.u32 %v8076_v46, %v1019_v35  ;;  %v1028_v49 = vshll.u32 %v8078_v48, %v1019_v35 }
 0x120   : > { %v1031_v51 = vshll.u32 %v8067_v50, %v1019_v35  ;;  %v1034_v56 = vshll.u32 %v8071_v55, %v1019_v35  ;;  %vm1037_vm3 = vcmp.lt.s32.totalorder %v1018_v37, 1  ;;  %vm1038_vm4 = vcmp.lt.s32.totalorder %v1018_v37, 2 }
 0x121   : > { %v1023_v52 = vshrl.u32 %v8076_v46, %v1020_v40  ;;  %v1026_v53 = vshrl.u32 %v8078_v48, %v1020_v40  ;;  %v1029_v54 = vshrl.u32 %v8067_v50, %v1020_v40  ;;  %v1032_v57 = vshrl.u32 %v8071_v55, %v1020_v40 }
 0x122   : > { %v1035_v59 = vshrl.u32 %v8069_v58, %v1020_v40  ;;  %v5301_v63 = vsub.s32 32, %v1225_v42  ;;  %v1021_v0 = vshrl.u32 %v8074_v44, %v1020_v40  ;;  %vm1040_vm5 = vcmp.lt.s32.totalorder %v1018_v37, 4 }
 0x123   : > { %v1024_v60 = vor.u32 %v1023_v52, %v1022_v45  ;;  %v1027_v61 = vor.u32 %v1026_v53, %v1025_v47  ;;  %v1030_v62 = vor.u32 %v1029_v54, %v1028_v49  ;;  %v1033_v1 = vor.u32 %v1032_v57, %v1031_v51 }
 0x124   : > { %v1036_v2 = vor.u32 %v1035_v59, %v1034_v56  ;;  %vm1039_vm6 = vcmp.lt.s32.totalorder %v1018_v37, 3  ;;  %v1228_v17 = vshll.u32 %v8074_v44, %v1225_v42  ;;  %v1231_v18 = vshll.u32 %v8076_v46, %v1225_v42 }
 0x125   : > { %v1042_v4 = vsel %vm1040_vm5, %v1030_v62, 2102212464  ;;  %v1045_v5 = vsel %vm1037_vm3, %v1024_v60, %v1027_v61  ;;  %v1049_v6 = vsel %vm1037_vm3, %v1027_v61, %v1030_v62  ;;  %v1046_v7 = vsel %vm1040_vm5, %v1033_v1, 920167782 }
 0x126   : > { %v1050_v8 = vsel %vm1040_vm5, %v1036_v2, 1326507024  ;;  %v1041_v20 = vsel %vm1037_vm3, %v1021_v0, %v1024_v60  ;;  %v1047_v21 = vsel %vm1039_vm6, %v1030_v62, %v1046_v7  ;;  %v1229_v23 = vshrl.u32 %v8076_v46, %v5301_v63 }
 0x127   : > { %v1051_v22 = vsel %vm1039_vm6, %v1033_v1, %v1050_v8  ;;  %v1043_v24 = vsel %vm1039_vm6, %v1027_v61, %v1042_v4  ;;  %v1048_v27 = vsel %vm1038_vm4, %v1045_v5, %v1047_v21  ;;  %v1232_v29 = vshrl.u32 %v8078_v48, %v5301_v63 }
 0x128   : > { %v1052_v28 = vsel %vm1038_vm4, %v1049_v6, %v1051_v22  ;;  %v5322_v33 = vmul.u32.u64.low %v5281_v38, %v1048_v27  ;;  %v5323_v34 = vmul.u32.u64.high %v5281_v38, %v1048_v27, %v5322_v33  ;;  %v1230_v35 = vor.u32 %v1229_v23, %v1228_v17 }
 0x129   : > { %v5318_v30 = vmul.u32.u64.low %v5281_v38, %v1052_v28  ;;  %v5319_v32 = vmul.u32.u64.high %v5281_v38, %v1052_v28, %v5318_v30  ;;  %v1233_v36 = vor.u32 %v1232_v29, %v1231_v18  ;;  %v1234_v40 = vshll.u32 %v8078_v48, %v1225_v42 }
 0x12a   : > { %v1235_v45 = vshrl.u32 %v8067_v50, %v5301_v63  ;;  %v1044_v47 = vsel %vm1038_vm4, %v1041_v20, %v1043_v24  ;;  %v1237_v49 = vshll.u32 %v8067_v50, %v1225_v42  ;;  %v1238_v51 = vshrl.u32 %v8071_v55, %v5301_v63 }
 0x12b   : > { %v1241_v52 = vshrl.u32 %v8069_v58, %v5301_v63  ;;  %v1219_v53 = vor.u32 8388608, %v5285_v39  ;;  %v1240_v56 = vshll.u32 %v8071_v55, %v1225_v42  ;;  %vm1062_vm8 = vc.u32 %v5319_v32, %v5322_v33 }
 0x12c   : > { %v1236_v54 = vor.u32 %v1235_v45, %v1234_v40  ;;  %v1063_v37 = vadd.s32 1, %v5323_v34  ;;  %v1239_v57 = vor.u32 %v1238_v51, %v1237_v49  ;;  %vm1243_vm9 = vcmp.lt.s32.totalorder %v5287_v41, 1 }
 0x12d   : > { %v1060_v59 = vmul.u32 %v5281_v38, %v1044_v47  ;;  %v1242_v60 = vor.u32 %v1241_v52, %v1240_v56  ;;  %vm1246_vm10 = vcmp.lt.s32.totalorder %v5287_v41, 4  ;;  %v1251_v39 = vsel %vm1243_vm9, %v1230_v35, %v1233_v36 }
 0x12e   : > { %v1064_v42 = vsel %vm1062_vm8, %v1063_v37, %v5323_v34  ;;  %vm1245_vm11 = vcmp.lt.s32.totalorder %v5287_v41, 3  ;;  %v1252_v61 = vsel %vm1246_vm10, %v1239_v57, 920167782  ;;  %v1255_v62 = vsel %vm1243_vm9, %v1233_v36, %v1236_v54 }
 0x12f   : > { %v1065_v0 = vadd.s32 %v1064_v42, %v1060_v59  ;;  %vm1244_vm12 = vcmp.lt.s32.totalorder %v5287_v41, 2  ;;  %v1253_v38 = vsel %vm1245_vm11, %v1236_v54, %v1252_v61  ;;  %v1256_v1 = vsel %vm1246_vm10, %v1242_v60, 1326507024 }
 0x130   : > { %v1254_v2 = vsel %vm1244_vm12, %v1251_v39, %v1253_v38  ;;  %v1257_v4 = vsel %vm1245_vm11, %v1239_v57, %v1256_v1  ;;  %v1259_v5 = vshll.u32 %v1219_v53, 8  ;;  %v1120_v18 = vsel %vm1119_vm7, %v5289_v43, 0 }
 0x131   : > { %v1066_v6 = vadd.s32 536870912, %v1065_v0  ;;  %v1258_v7 = vsel %vm1244_vm12, %v1255_v62, %v1257_v4  ;;  %v1122_v24 = vand.u32 31, %v1120_v18  ;;  %v1248_v27 = vsel %vm1246_vm10, %v1236_v54, 2102212464 }
 0x132   : > { %v5363_v8 = vmul.u32.u64.low %v1259_v5, %v1254_v2  ;;  %v5364_v17 = vmul.u32.u64.high %v1259_v5, %v1254_v2, %v5363_v8  ;;  %v5372_v21 = vmul.u32.u64.low %v1259_v5, %v1258_v7  ;;  %v5373_v22 = vmul.u32.u64.high %v1259_v5, %v1258_v7, %v5372_v21 }
 0x133   : > { %v5370_v20 = vshrl.u32 %v1066_v6, 30  ;;  %v1227_v29 = vshrl.u32 %v8074_v44, %v5301_v63  ;;  %v8064_v30 = vand.u32 2147483647, %v5264_v14  ;;  %v1249_v40 = vsel %vm1245_vm11, %v1233_v36, %v1248_v27 }
 0x134   : > { %v5385_v45 = vsub.s32 32, %v1122_v24  ;;  %v1269_v47 = vadd.s32 1, %v5364_v17  ;;  %vm1268_vm13 = vc.u32 %v5373_v22, %v5363_v8  ;;  %v5395_v52 = vmul.f32 30.0, %v5266_v15 }
 0x135   : > { %v1068_v23 = vshll.u32 %v5370_v20, 30  ;;  %v1247_v43 = vsel %vm1243_vm9, %v1227_v29, %v1230_v35  ;;  %v1115_v51 = vand.u32 8388607, %v8064_v30  ;;  %v5397_v53 = vshrl.u32 %v1120_v18, 5 }
 0x136   : > { %v1250_v63 = vsel %vm1244_vm12, %v1247_v43, %v1249_v40  ;;  %v1134_v36 = vshll.u32 %v8067_v50, %v1122_v24  ;;  %v1135_v54 = vshrl.u32 %v8071_v55, %v5385_v45  ;;  %v1270_v56 = vsel %vm1268_vm13, %v1269_v47, %v5364_v17 }
 0x137   : > { %v1069_v28 = vsub.s32 %v1065_v0, %v1068_v23  ;;  %v1126_v41 = vshrl.u32 %v8076_v46, %v5385_v45  ;;  %v1129_v37 = vshrl.u32 %v8078_v48, %v5385_v45  ;;  %v1132_v57 = vshrl.u32 %v8067_v50, %v5385_v45 }
 0x138   : > { %v1266_v60 = vmul.u32 %v1259_v5, %v1250_v63  ;;  %v1136_v39 = vor.u32 %v1135_v54, %v1134_v36  ;;  %v1138_v42 = vshrl.u32 %v8069_v58, %v5385_v45  ;;  %v1061_v61 = vadd.s32 %v5322_v33, %v5319_v32 }
 0x139   : > { %v1071_v34 = vsub.s32 0, %v1069_v28  ;;  %v1125_v62 = vshll.u32 %v8074_v44, %v1122_v24  ;;  %v1128_v0 = vshll.u32 %v8076_v46, %v1122_v24  ;;  %v1131_v38 = vshll.u32 %v8078_v48, %v1122_v24 }
 0x13a   : > { %v1271_v1 = vadd.s32 %v1270_v56, %v1266_v60  ;;  %v1137_v2 = vshll.u32 %v8071_v55, %v1122_v24  ;;  %vm1143_vm15 = vcmp.lt.s32.totalorder %v5397_v53, 4  ;;  %vm1140_vm0 = vcmp.lt.s32.totalorder %v5397_v53, 1  ;;  %v5423_v24 = vpop.f32.mrb[4].mxu0 }
 0x13b   : > { %v4583_v49 = vmin.u32 %v1071_v34, %v1069_v28  ;;  %v1127_v5 = vor.u32 %v1126_v41, %v1125_v62  ;;  %v1130_v6 = vor.u32 %v1129_v37, %v1128_v0  ;;  %v1133_v7 = vor.u32 %v1132_v57, %v1131_v38 }
 0x13c   : > { %v1139_v21 = vor.u32 %v1138_v42, %v1137_v2  ;;  %v1149_v32 = vsel %vm1143_vm15, %v1136_v39, 920167782  ;;  %v1317_v33 = vand.u32 2139095040, %v5395_v52  ;;  %vm1142_vm1 = vcmp.lt.s32.totalorder %v5397_v53, 3 }
 0x13d   : > { %v1073_v35 = vclz %v4583_v49  ;;  %v1272_v34 = vadd.s32 536870912, %v1271_v1  ;;  %v1116_v43 = vor.u32 8388608, %v1115_v51  ;;  %v1148_v40 = vsel %vm1140_vm0, %v1127_v5, %v1130_v6 }
 0x13e   : > { %v1150_v47 = vsel %vm1142_vm1, %v1133_v7, %v1149_v32  ;;  %vm1141_vm2 = vcmp.lt.s32.totalorder %v5397_v53, 2  ;;  %v1318_v56 = vshrl.u32 %v1317_v33, 23  ;;  %v1091_v42 = vsub.s32 4, %v5370_v20 }
 0x13f   : > { %v4584_v59 = vadd.s32 4294967294, %v1073_v35  ;;  %v1152_v35 = vsel %vm1140_vm0, %v1130_v6, %v1133_v7  ;;  %v1151_v51 = vsel %vm1141_vm2, %v1148_v40, %v1150_v47  ;;  %v5438_v41 = vshrl.u32 %v1272_v34, 30 }
 0x140   : > { %v1156_v57 = vshll.u32 %v1116_v43, 8  ;;  %v4594_v0 = vadd.s32 4294967169, %v1318_v56  ;;  %vm1007_vm3 = vcmp.lt.s32.totalorder %v5254_v10, 0  ;;  %v1145_v32 = vsel %vm1143_vm15, %v1133_v7, 2102212464 }
 0x141   : > { %vm4585_vm14 = vcmp.lt.s32.totalorder %v4584_v59, 0  ;;  %vm1006_vm4 = vcmp.le.f32.partialorder %v1005_v16, 0.7853982  ;;  %v1146_v7 = vsel %vm1142_vm1, %v1130_v6, %v1145_v32  ;;  %vm1097_vm7 = vweird.f32 %v5254_v10 }
 0x142   : > { %v1076_v4 = vsel %vm4585_vm14, 0, %v4584_v59 }
 0x143   : > { %v1077_v17 = vsub.s32 32, %v1076_v4  ;;  %v1081_v18 = vsub.s32 4294967266, %v1076_v4  ;;  %v1078_v23 = vshll.u32 %v1069_v28, %v1076_v4  ;;  %v1153_v28 = vsel %vm1143_vm15, %v1139_v21, 1326507024 }
 0x144   : > { %v1154_v54 = vsel %vm1142_vm1, %v1136_v39, %v1153_v28  ;;  %v1274_v39 = vshll.u32 %v5438_v41, 30  ;;  %v1092_v21 = vsel %vm1007_vm3, %v1091_v42, %v5370_v20 }
 0x145   : > { %v1079_v27 = vshrl.u32 %v1061_v61, %v1077_v17  ;;  %v1082_v29 = vadd.s32 127, %v1081_v18  ;;  %v1155_v37 = vsel %vm1141_vm2, %v1152_v35, %v1154_v54  ;;  %v1324_v17 = vadd.s32 1, %v4594_v0 }
 0x146   : > { %v5443_v61 = vmul.u32.u64.low %v1156_v57, %v1151_v51  ;;  %v5444_v62 = vmul.u32.u64.high %v1156_v57, %v1151_v51, %v5443_v61  ;;  %v5447_v2 = vmul.u32.u64.low %v1156_v57, %v1155_v37  ;;  %v5448_v4 = vmul.u32.u64.high %v1156_v57, %v1155_v37, %v5447_v2 }
 0x147   : > { %v1080_v49 = vor.u32 %v1079_v27, %v1078_v23  ;;  %v1083_v63 = vshll.u32 %v1082_v29, 23  ;;  %v1124_v23 = vshrl.u32 %v8074_v44, %v5385_v45  ;;  %vm1325_vm5 = vcmp.gt.s32.totalorder %v1324_v17, 0 }
 0x148   : > { %v1094_v29 = vsel %vm1006_vm4, 0, %v1092_v21  ;;  %v5460_v34 = vsub.s32 %v1271_v1, %v1274_v39  ;;  %v1166_v16 = vadd.s32 1, %v5444_v62  ;;  %v1326_v43 = vsel %vm1325_vm5, %v1324_v17, 0 }
 0x149   : > { %v1084_v36 = vor.u32 4788187, %v1083_v63  ;;  %v1087_v60 = vcvt.s32.f32 %v1080_v49  ;;  %v1144_v20 = vsel %vm1140_vm0, %v1124_v23, %v1127_v5  ;;  %v2778_v40 = vadd.s32 3, %v1094_v29  ;;  %v5473_v5 = vpop.f32.mrb[4].mxu1 }
 0x14a   : > { %vm1165_vm6 = vc.u32 %v5448_v4, %v5443_v61  ;;  %v1277_v45 = vsub.s32 0, %v5460_v34  ;;  %v1147_v1 = vsel %vm1141_vm2, %v1144_v20, %v1146_v7  ;;  %v1328_v47 = vand.u32 31, %v1326_v43 }
 0x14b   : > { %v1085_v59 = vand.u32 2147483647, %v1084_v36  ;;  %v1167_v49 = vsel %vm1165_vm6, %v1166_v16, %v5444_v62  ;;  %v1098_v63 = vand.u32 3, %v1094_v29  ;;  %v2779_v6 = vand.u32 3, %v2778_v40 }
 0x14c   : > { %v1163_v35 = vmul.u32 %v1156_v57, %v1147_v1  ;;  %v4591_v28 = vmin.u32 %v1277_v45, %v5460_v34  ;;  %v5476_v51 = vsub.s32 32, %v1328_v47  ;;  %v8062_v54 = vand.u32 2147483647, %v5395_v52 }
 0x14d   : > { %v1088_v38 = vmul.f32 %v1087_v60, %v1085_v59  ;;  %vm1099_vm8 = vcmp.lt.s32.totalorder %v1098_v63, 2  ;;  %vm1100_vm9 = vcmp.eq.s32.totalorder %v1098_v63, 0  ;;  %vm1103_vm10 = vcmp.eq.s32.totalorder %v1098_v63, 2 }
 0x14e   : > { %v1168_v36 = vadd.s32 %v1167_v49, %v1163_v35  ;;  %vm2780_vm11 = vcmp.lt.s32.totalorder %v2779_v6, 2  ;;  %vm2781_vm12 = vcmp.eq.s32.totalorder %v2779_v6, 0  ;;  %vm2784_vm13 = vcmp.eq.s32.totalorder %v2779_v6, 2 }
 0x14f   : > { %v1089_v18 = vxor.u32 2147483648, %v1088_v38  ;;  %v1279_v59 = vclz %v4591_v28  ;;  %v5480_v42 = vshrl.u32 %v1326_v43, 5  ;;  %v1341_v62 = vshrl.u32 %v8071_v55, %v5476_v51 }
 0x150   : > { %v1169_v60 = vadd.s32 536870912, %v1168_v36  ;;  %v1340_v2 = vshll.u32 %v8067_v50, %v1328_v47  ;;  %v1344_v39 = vshrl.u32 %v8069_v58, %v5476_v51  ;;  %v1332_v21 = vshrl.u32 %v8076_v46, %v5476_v51 }
 0x151   : > { %v1090_v33 = vsel %vm1007_vm3, %v1089_v18, %v1088_v38  ;;  %v1343_v32 = vshll.u32 %v8071_v55, %v1328_v47  ;;  %v1338_v29 = vshrl.u32 %v8067_v50, %v5476_v51  ;;  %v1331_v43 = vshll.u32 %v8074_v44, %v1328_v47 }
 0x152   : > { %v1093_v27 = vsel %vm1006_vm4, %v5254_v10, %v1090_v33  ;;  %v1342_v16 = vor.u32 %v1341_v62, %v1340_v2  ;;  %v1334_v40 = vshll.u32 %v8076_v46, %v1328_v47  ;;  %v1337_v45 = vshll.u32 %v8078_v48, %v1328_v47 }
 0x153   : > { %4830 = vcosq.f32 %v1093_v27  ;;  %v1345_v1 = vor.u32 %v1344_v39, %v1343_v32  ;;  %v4592_v49 = vadd.s32 4294967294, %v1279_v59  ;;  %v5508_v63 = vshrl.u32 %v1169_v60, 30 }
 0x154   : > { %4832 = vsinq.f32 %v1093_v27  ;;  %v1335_v27 = vshrl.u32 %v8078_v48, %v5476_v51  ;;  %v1321_v6 = vand.u32 8388607, %v8062_v54  ;;  %v5513_v35 = vmul.f32 30.0, %v5271_v19 }
 0x155   : > { %v1333_v10 = vor.u32 %v1332_v21, %v1331_v43  ;;  %vm1349_vm14 = vcmp.lt.s32.totalorder %v5480_v42, 4  ;;  %vm4593_vm15 = vcmp.lt.s32.totalorder %v4592_v49, 0  ;;  %vm1346_vm0 = vcmp.lt.s32.totalorder %v5480_v42, 1 }
 0x156   : > { %v1336_v28 = vor.u32 %v1335_v27, %v1334_v40  ;;  %v1359_v47 = vsel %vm1349_vm14, %v1345_v1, 1326507024  ;;  %vm1348_vm1 = vcmp.lt.s32.totalorder %v5480_v42, 3  ;;  %v1171_v59 = vshll.u32 %v5508_v63, 30 }
 0x157   : > { %v1282_v2 = vsel %vm4593_vm15, 0, %v4592_v49  ;;  %vm1347_vm2 = vcmp.lt.s32.totalorder %v5480_v42, 2  ;;  %v1330_v49 = vshrl.u32 %v8074_v44, %v5476_v51  ;;  %v1267_v51 = vadd.s32 %v5363_v8, %v5373_v22 }
 0x158   : > { %v1354_v60 = vsel %vm1346_vm0, %v1333_v10, %v1336_v28 }
 0x15d   : > { %v4831_v56 = vpop.eup %4830 }
 0x15e   : > { %v4833_v53 = vpop.eup %4832  ;;  %v1104_v37 = vxor.u32 2147483648, %v4831_v56 }
 0x15f   : > { %v1101_v57 = vxor.u32 2147483648, %v4833_v53 }
 0x160   : > { %v1105_v0 = vsel %vm1103_vm10, %v1104_v37, %v4833_v53  ;;  %v2786_v38 = vsel %vm2784_vm13, %v1104_v37, %v4833_v53  ;;  %v1355_v53 = vsel %vm1349_vm14, %v1342_v16, 920167782  ;;  %v1420_v37 = vand.u32 2139095040, %v5513_v35 }
 0x161   : > { %v1102_v17 = vsel %vm1100_vm9, %v4831_v56, %v1101_v57  ;;  %v2783_v18 = vsel %vm2781_vm12, %v4831_v56, %v1101_v57  ;;  %v1339_v56 = vor.u32 %v1338_v29, %v1337_v45  ;;  %v1322_v57 = vor.u32 8388608, %v1321_v6 }
 0x162   : > { %v1106_v33 = vsel %vm1099_vm8, %v1102_v17, %v1105_v0  ;;  %v2787_v23 = vsel %vm2780_vm11, %v2783_v18, %v2786_v38  ;;  %v1360_v38 = vsel %vm1348_vm1, %v1342_v16, %v1359_v47  ;;  %v1421_v17 = vshrl.u32 %v1420_v37, 23 }
 0x163   : > { %v5499_v20 = vsel %vm1097_vm7, nan, %v1106_v33  ;;  %v5503_v7 = vsel %vm1097_vm7, nan, %v2787_v23  ;;  %v1356_v62 = vsel %vm1348_vm1, %v1339_v56, %v1355_v53  ;;  %v1358_v0 = vsel %vm1346_vm0, %v1336_v28, %v1339_v56 }
 0x164   : > { %8106 = vst [vmem:[#allocation4_spill] sm:$0xff] %v5499_v20  ;;  %8107 = vst [vmem:[#allocation5_spill] sm:$0xff] %v5503_v7  ;;  %v1357_v39 = vsel %vm1347_vm2, %v1354_v60, %v1356_v62  ;;  %v5535_v18 = vsub.s32 %v1168_v36, %v1171_v59  ;;  %v1361_v21 = vsel %vm1347_vm2, %v1358_v0, %v1360_v38  ;;  %v1362_v32 = vshll.u32 %v1322_v57, 8  ;;  %v5559_v0 = vpop.f32.mrb[5].mxu0 }
 0x165   : > { %v1287_v33 = vsub.s32 4294967266, %v1282_v2  ;;  %v4598_v23 = vadd.s32 4294967169, %v1421_v17  ;;  %v1351_v36 = vsel %vm1349_vm14, %v1339_v56, 2102212464  ;;  %v5552_v53 = vmul.f32 30.0, %v5276_v25  ;;  %8108 = vst [vmem:[#allocation6_spill] sm:$0xff] %v5559_v0 }
 0x166   : > { %v5539_v27 = vmul.u32.u64.low %v1362_v32, %v1357_v39  ;;  %v5540_v29 = vmul.u32.u64.high %v1362_v32, %v1357_v39, %v5539_v27  ;;  %v5543_v16 = vmul.u32.u64.low %v1362_v32, %v1361_v21  ;;  %v5544_v43 = vmul.u32.u64.high %v1362_v32, %v1361_v21, %v5543_v16 }
 0x167   : > { %v1427_v40 = vadd.s32 1, %v4598_v23  ;;  %v1174_v45 = vsub.s32 0, %v5535_v18  ;;  %v1288_v1 = vadd.s32 127, %v1287_v33  ;;  %v1350_v47 = vsel %vm1346_vm0, %v1330_v49, %v1333_v10 }
 0x168   : > { %v1352_v37 = vsel %vm1348_vm1, %v1336_v28, %v1351_v36  ;;  %v1283_v57 = vsub.s32 32, %v1282_v2  ;;  %v1372_v39 = vadd.s32 1, %v5540_v29  ;;  %v1626_v10 = vand.u32 2139095040, %v5552_v53 }
 0x169   : > { %vm1428_vm3 = vcmp.gt.s32.totalorder %v1427_v40, 0  ;;  %v4587_v60 = vmin.u32 %v1174_v45, %v5535_v18  ;;  %v1289_v56 = vshll.u32 %v1288_v1, 23  ;;  %v1353_v38 = vsel %vm1347_vm2, %v1350_v47, %v1352_v37 }
 0x16a   : > { %v1429_v6 = vsel %vm1428_vm3, %v1427_v40, 0  ;;  %vm1371_vm4 = vc.u32 %v5544_v43, %v5539_v27  ;;  %v8063_v28 = vand.u32 2147483647, %v5513_v35  ;;  %v1284_v17 = vshll.u32 %v5460_v34, %v1282_v2 }
 0x16b   : > { %v1431_v59 = vand.u32 31, %v1429_v6  ;;  %v1285_v21 = vshrl.u32 %v1267_v51, %v1283_v57  ;;  %v1176_v33 = vclz %v4587_v60  ;;  %v1290_v16 = vor.u32 4788187, %v1289_v56 }
 0x16c   : > { %v1369_v8 = vmul.u32 %v1362_v32, %v1353_v38  ;;  %v1373_v40 = vsel %vm1371_vm4, %v1372_v39, %v5540_v29  ;;  %v1627_v1 = vshrl.u32 %v1626_v10, 23  ;;  %v1424_v34 = vand.u32 8388607, %v8063_v28 }
 0x16d   : > { %v1432_v62 = vsub.s32 32, %v1431_v59  ;;  %v1443_v36 = vshll.u32 %v8067_v50, %v1431_v59  ;;  %v1430_v2 = vshrl.u32 %v1429_v6, 5  ;;  %v1434_v49 = vshll.u32 %v8074_v44, %v1431_v59 }
 0x16e   : > { %v1437_v47 = vshll.u32 %v8076_v46, %v1431_v59  ;;  %v4588_v32 = vadd.s32 4294967294, %v1176_v33  ;;  %v1440_v37 = vshll.u32 %v8078_v48, %v1431_v59  ;;  %v1286_v29 = vor.u32 %v1285_v21, %v1284_v17 }
 0x16f   : > { %v1444_v23 = vshrl.u32 %v8071_v55, %v1432_v62  ;;  %v1435_v22 = vshrl.u32 %v8076_v46, %v1432_v62  ;;  %v1438_v42 = vshrl.u32 %v8078_v48, %v1432_v62  ;;  %v1441_v45 = vshrl.u32 %v8067_v50, %v1432_v62 }
 0x170   : > { %v1447_v60 = vshrl.u32 %v8069_v58, %v1432_v62  ;;  %v1374_v56 = vadd.s32 %v1373_v40, %v1369_v8  ;;  %v1446_v10 = vshll.u32 %v8071_v55, %v1431_v59  ;;  %v4606_v54 = vadd.s32 4294967169, %v1627_v1 }
 0x171   : > { %v1445_v57 = vor.u32 %v1444_v23, %v1443_v36  ;;  %v1436_v51 = vor.u32 %v1435_v22, %v1434_v49  ;;  %v1439_v38 = vor.u32 %v1438_v42, %v1437_v47  ;;  %v1442_v39 = vor.u32 %v1441_v45, %v1440_v37 }
 0x172   : > { %v1291_v28 = vand.u32 2147483647, %v1290_v16  ;;  %v1425_v6 = vor.u32 8388608, %v1424_v34  ;;  %vm1452_vm5 = vcmp.lt.s32.totalorder %v1430_v2, 4  ;;  %vm4589_vm6 = vcmp.lt.s32.totalorder %v4588_v32, 0 }
 0x173   : > { %v1448_v30 = vor.u32 %v1447_v60, %v1446_v10  ;;  %vm1449_vm7 = vcmp.lt.s32.totalorder %v1430_v2, 1  ;;  %v1458_v33 = vsel %vm1452_vm5, %v1445_v57, 920167782  ;;  %v1293_v31 = vcvt.s32.f32 %v1286_v29 }
 0x174   : > { %v1375_v23 = vadd.s32 536870912, %v1374_v56  ;;  %vm1451_vm8 = vcmp.lt.s32.totalorder %v1430_v2, 3  ;;  %v1457_v17 = vsel %vm1449_vm7, %v1436_v51, %v1439_v38  ;;  %v1433_v21 = vshrl.u32 %v8074_v44, %v1432_v62 }
 0x175   : > { %v1454_v8 = vsel %vm1452_vm5, %v1442_v39, 2102212464  ;;  %v1459_v22 = vsel %vm1451_vm8, %v1442_v39, %v1458_v33  ;;  %v1633_v59 = vadd.s32 1, %v4606_v54  ;;  %v1294_v42 = vmul.f32 %v1293_v31, %v1291_v28 }
 0x176   : > { %v5588_v16 = vsel %vm4589_vm6, 0, %v4588_v32  ;;  %vm1450_vm9 = vcmp.lt.s32.totalorder %v1430_v2, 2  ;;  %v1465_v40 = vshll.u32 %v1425_v6, 8  ;;  %v1453_v45 = vsel %vm1449_vm7, %v1433_v21, %v1436_v51 }
 0x177   : > { %v1460_v36 = vsel %vm1450_vm9, %v1457_v17, %v1459_v22  ;;  %v1461_v1 = vsel %vm1449_vm7, %v1439_v38, %v1442_v39  ;;  %v1462_v34 = vsel %vm1452_vm5, %v1448_v30, 1326507024  ;;  %v1455_v49 = vsel %vm1451_vm8, %v1439_v38, %v1454_v8 }
 0x178   : > { %v1463_v47 = vsel %vm1451_vm8, %v1445_v57, %v1462_v34  ;;  %v5594_v62 = vmul.u32.u64.low %v1465_v40, %v1460_v36  ;;  %v5595_v37 = vmul.u32.u64.high %v1465_v40, %v1460_v36, %v5594_v62  ;;  %v5598_v54 = vshrl.u32 %v1375_v23, 30 }
 0x179   : > { %v1464_v31 = vsel %vm1450_vm9, %v1461_v1, %v1463_v47  ;;  %v8066_v28 = vand.u32 2147483647, %v5552_v53  ;;  %vm1634_vm10 = vcmp.gt.s32.totalorder %v1633_v59, 0  ;;  %v1456_v51 = vsel %vm1450_vm9, %v1453_v45, %v1455_v49 }
 0x17a   : > { %v5602_v32 = vmul.u32.u64.low %v1465_v40, %v1464_v31  ;;  %v5603_v60 = vmul.u32.u64.high %v1465_v40, %v1464_v31, %v5602_v32  ;;  %v1635_v29 = vsel %vm1634_vm10, %v1633_v59, 0  ;;  %vm1213_vm11 = vcmp.lt.s32.totalorder %v5261_v13, 0 }
 0x17b   : > { %v1637_v30 = vand.u32 31, %v1635_v29  ;;  %v1295_v57 = vxor.u32 2147483648, %v1294_v42  ;;  %v1180_v38 = vsub.s32 32, %v5588_v16  ;;  %v1475_v39 = vadd.s32 1, %v5595_v37 }
 0x17c   : > { %v1184_v10 = vsub.s32 4294967266, %v5588_v16  ;;  %v1377_v6 = vshll.u32 %v5598_v54, 30  ;;  %v1630_v33 = vand.u32 8388607, %v8066_v28  ;;  %v1472_v17 = vmul.u32 %v1465_v40, %v1456_v51  ;;  %v5629_v28 = vpop.f32.mrb[5].mxu1 }
 0x17d   : > { %v1638_v23 = vsub.s32 32, %v1637_v30  ;;  %vm1474_vm12 = vc.u32 %v5603_v60, %v5594_v62  ;;  %v5615_v2 = vshrl.u32 %v1635_v29, 5  ;;  %v1640_v21 = vshll.u32 %v8074_v44, %v1637_v30  ;;  %8109 = vst [vmem:[#allocation7_spill] sm:$0xff] %v5629_v28 }
 0x17e   : > { %v1476_v8 = vsel %vm1474_vm12, %v1475_v39, %v5595_v37  ;;  %v1643_v59 = vshll.u32 %v8076_v46, %v1637_v30  ;;  %v1649_v45 = vshll.u32 %v8067_v50, %v1637_v30  ;;  %v5625_v49 = vsub.s32 %v1374_v56, %v1377_v6 }
 0x17f   : > { %v1641_v22 = vshrl.u32 %v8076_v46, %v1638_v23  ;;  %v1477_v36 = vadd.s32 %v1476_v8, %v1472_v17  ;;  %v1644_v1 = vshrl.u32 %v8078_v48, %v1638_v23  ;;  %v1647_v40 = vshrl.u32 %v8067_v50, %v1638_v23 }
 0x180   : > { %v1650_v34 = vshrl.u32 %v8071_v55, %v1638_v23  ;;  %v1646_v31 = vshll.u32 %v8078_v48, %v1637_v30  ;;  %v1653_v37 = vshrl.u32 %v8069_v58, %v1638_v23  ;;  %v1185_v32 = vadd.s32 127, %v1184_v10 }
 0x181   : > { %v1642_v47 = vor.u32 %v1641_v22, %v1640_v21  ;;  %v1631_v29 = vor.u32 8388608, %v1630_v33  ;;  %v1645_v51 = vor.u32 %v1644_v1, %v1643_v59  ;;  %v8110_v17 = vand.u32 2147483647, %v5261_v13 }
 0x182   : > { %v1651_v39 = vor.u32 %v1650_v34, %v1649_v45  ;;  %v1478_v50 = vadd.s32 536870912, %v1477_v36  ;;  %v1648_v56 = vor.u32 %v1647_v40, %v1646_v31  ;;  %v1652_v6 = vshll.u32 %v8071_v55, %v1637_v30 }
 0x183   : > { %vm5633_vm13 = vcmp.le.f32.partialorder %v8110_v17, 0.7853982  ;;  %v5639_v21 = vmul.f32 30.0, %v5278_v26  ;;  %v1296_v10 = vsel %vm1213_vm11, %v1295_v57, %v1294_v42  ;;  %v1164_v33 = vadd.s32 %v5443_v61, %v5448_v4 }
 0x184   : > { %vm1655_vm14 = vcmp.lt.s32.totalorder %v5615_v2, 1  ;;  %vm1658_vm15 = vcmp.lt.s32.totalorder %v5615_v2, 4  ;;  %v1380_v22 = vsub.s32 0, %v5625_v49  ;;  %v1654_v59 = vor.u32 %v1653_v37, %v1652_v6 }
 0x185   : > { %v1663_v45 = vsel %vm1655_vm14, %v1642_v47, %v1645_v51  ;;  %v1664_v30 = vsel %vm1658_vm15, %v1651_v39, 920167782  ;;  %v1182_v1 = vshrl.u32 %v1164_v33, %v1180_v38  ;;  %v1186_v40 = vshll.u32 %v1185_v32, 23 }
 0x186   : > { %vm1657_vm0 = vcmp.lt.s32.totalorder %v5615_v2, 3  ;;  %v1671_v42 = vshll.u32 %v1631_v29, 8  ;;  %v5653_v57 = vshrl.u32 %v1478_v50, 30  ;;  %vm1656_vm1 = vcmp.lt.s32.totalorder %v5615_v2, 2 }
 0x187   : > { %v1665_v61 = vsel %vm1657_vm0, %v1648_v56, %v1664_v30  ;;  %v1523_v4 = vand.u32 2139095040, %v5639_v21  ;;  %v1639_v34 = vshrl.u32 %v8074_v44, %v1638_v23  ;;  %v1660_v31 = vsel %vm1658_vm15, %v1648_v56, 2102212464 }
 0x188   : > { %v1666_v38 = vsel %vm1656_vm1, %v1663_v45, %v1665_v61  ;;  %v1667_v37 = vsel %vm1655_vm14, %v1645_v51, %v1648_v56  ;;  %v4595_v50 = vmin.u32 %v1380_v22, %v5625_v49  ;;  %v1668_v32 = vsel %vm1658_vm15, %v1654_v59, 1326507024 }
 0x189   : > { %v5669_v29 = vmul.u32.u64.low %v1671_v42, %v1666_v38  ;;  %v5670_v17 = vmul.u32.u64.high %v1671_v42, %v1666_v38, %v5669_v29  ;;  %v1181_v23 = vshll.u32 %v5535_v18, %v5588_v16  ;;  %v1187_v6 = vor.u32 4788187, %v1186_v40 }
 0x18a   : > { %v1659_v33 = vsel %vm1655_vm14, %v1639_v34, %v1642_v47  ;;  %v1669_v45 = vsel %vm1657_vm0, %v1651_v39, %v1668_v32  ;;  %v1480_v56 = vshll.u32 %v5653_v57, 30  ;;  %v1661_v22 = vsel %vm1657_vm0, %v1645_v51, %v1660_v31 }
 0x18b   : > { %v1670_v59 = vsel %vm1656_vm1, %v1667_v37, %v1669_v45  ;;  %v1524_v30 = vshrl.u32 %v1523_v4, 23  ;;  %v1297_v61 = vsub.s32 4, %v5438_v41  ;;  %v1299_v18 = vsel %vm5633_vm13, %v5261_v13, %v1296_v10 }
 0x18c   : > { %v1183_v16 = vor.u32 %v1182_v1, %v1181_v23  ;;  %v1382_v47 = vclz %v4595_v50  ;;  %v5688_v40 = vmul.u32.u64.low %v1671_v42, %v1670_v59  ;;  %v5689_v34 = vmul.u32.u64.high %v1671_v42, %v1670_v59, %v5688_v40 }
 0x18d   : > { %v1662_v39 = vsel %vm1656_vm1, %v1659_v33, %v1661_v22  ;;  %v1681_v51 = vadd.s32 1, %v5670_v17  ;;  %v4602_v31 = vadd.s32 4294967169, %v1524_v30  ;;  %4834 = vcosq.f32 %v1299_v18 }
 0x18e   : > { %v1188_v38 = vand.u32 2147483647, %v1187_v6  ;;  %v5694_v4 = vsub.s32 %v1477_v36, %v1480_v56  ;;  %v1298_v37 = vsel %vm1213_vm11, %v1297_v61, %v5438_v41  ;;  %4836 = vsinq.f32 %v1299_v18 }
 0x18f   : > { %v1530_v10 = vadd.s32 1, %v4602_v31  ;;  %v1190_v1 = vcvt.s32.f32 %v1183_v16  ;;  %v4596_v50 = vadd.s32 4294967294, %v1382_v47  ;;  %v1678_v32 = vmul.u32 %v1671_v42, %v1662_v39 }
 0x190   : > { %vm1680_vm2 = vc.u32 %v5689_v34, %v5669_v29  ;;  %v1194_v2 = vsub.s32 4, %v5508_v63  ;;  %v1483_v36 = vsub.s32 0, %v5694_v4  ;;  %v1300_v41 = vsel %vm5633_vm13, 0, %v1298_v37 }
 0x191   : > { %v1682_v23 = vsel %vm1680_vm2, %v1681_v51, %v5670_v17  ;;  %vm1531_vm3 = vcmp.gt.s32.totalorder %v1530_v10, 0  ;;  %v1191_v6 = vmul.f32 %v1190_v1, %v1188_v38  ;;  %vm1110_vm4 = vcmp.lt.s32.totalorder %v5264_v14, 0 }
 0x192   : > { %v1683_v33 = vadd.s32 %v1682_v23, %v1678_v32  ;;  %vm4597_vm5 = vcmp.lt.s32.totalorder %v4596_v50, 0  ;;  %v1532_v42 = vsel %vm1531_vm3, %v1530_v10, 0  ;;  %v5709_v56 = vmul.f32 %v5251_v9, %v5251_v9 }
 0x193   : > { %v1195_v17 = vsel %vm1110_vm4, %v1194_v2, %v5508_v63  ;;  %v2986_v22 = vadd.s32 3, %v1300_v41  ;;  %v1192_v59 = vxor.u32 2147483648, %v1191_v6  ;;  %v4599_v30 = vmin.u32 %v1483_v36, %v5694_v4 }
 0x194   : > { %v1684_v45 = vadd.s32 536870912, %v1683_v33  ;;  %8113 = vst [vmem:[#allocation8_spill] sm:$0xff] %v5709_v56  ;;  %v5719_v8 = vmul.f32 %v5256_v11, %v5256_v11  ;;  %v8115_v18 = vand.u32 2147483647, %v5264_v14  ;;  %v5727_v9 = vsel %vm4597_vm5, 0, %v4596_v50 }
 0x195   : > { %v1534_v47 = vand.u32 31, %v1532_v42  ;;  %v5733_v40 = vmul.f32 %v5258_v12, %v5258_v12  ;;  %v8073_v51 = vand.u32 2147483647, %v5639_v21  ;;  %v5743_v38 = vand.u32 3, %v1300_v41 }
 0x196   : > { %v5715_v61 = vshrl.u32 %v1684_v45, 30  ;;  %8114 = vst [vmem:[#allocation9_spill] sm:$0xff] %v5719_v8  ;;  %vm5723_vm6 = vcmp.le.f32.partialorder %v8115_v18, 0.7853982  ;;  %v5747_v37 = vmul.f32 %v5266_v15, %v5266_v15  ;;  %v5751_v12 = vmul.f32 %v5271_v19, %v5271_v19 }
 0x197   : > { %v5729_v63 = vpop.eup %4834  ;;  %8118 = vst [vmem:[#allocation10_spill] sm:$0xff] %v5733_v40  ;;  %v5737_v39 = vsel %vm5723_vm6, 0, %v1195_v17  ;;  %v1535_v10 = vsub.s32 32, %v1534_v47  ;;  %v5753_v1 = vand.u32 3, %v2986_v22  ;;  %v1193_v50 = vsel %vm1110_vm4, %v1192_v59, %v1191_v6 }
 0x198   : > { %v1686_v11 = vshll.u32 %v5715_v61, 30  ;;  %v5741_v31 = vpop.eup %4836  ;;  %8119 = vst [vmem:[#allocation11_spill] sm:$0xff] %v5747_v37  ;;  %8120 = vst [vmem:[#allocation12_spill] sm:$0xff] %v5751_v12  ;;  %v1390_v32 = vsub.s32 4294967266, %v5727_v9  ;;  %v1485_v2 = vclz %v4599_v30  ;;  %v5760_v36 = vadd.s32 3, %v5737_v39 }
 0x199   : > { %v1538_v15 = vshrl.u32 %v8076_v46, %v1535_v10  ;;  %v1541_v41 = vshrl.u32 %v8078_v48, %v1535_v10  ;;  %v1370_v45 = vadd.s32 %v5539_v27, %v5544_v43  ;;  %v1527_v6 = vand.u32 8388607, %v8073_v51 }
 0x19a   : > { %v5767_v17 = vsub.s32 %v1683_v33, %v1686_v11  ;;  %v5774_v22 = vsel %vm5723_vm6, %v5264_v14, %v1193_v50  ;;  %v1537_v59 = vshll.u32 %v8074_v44, %v1534_v47  ;;  %v1540_v30 = vshll.u32 %v8076_v46, %v1534_v47 }
 0x19b   : > { %v8121_v18 = vmov 2102212464   ;;  %v1391_v19 = vadd.s32 127, %v1390_v32  ;;  %v4600_v58 = vadd.s32 4294967294, %v1485_v2  ;;  %v5779_v55 = vshrl.u32 %v1532_v42, 5 }
 0x19c   : > { %v1544_v23 = vshrl.u32 %v8121_v18, %v1535_v10  ;;  %v1543_v27 = vshll.u32 %v8078_v48, %v1534_v47  ;;  %v1539_v43 = vor.u32 %v1538_v15, %v1537_v59  ;;  %v1542_v33 = vor.u32 %v1541_v41, %v1540_v30 }
 0x19d   : > { %v1546_v11 = vshll.u32 %v8121_v18, %v1534_v47  ;;  %v8122_v51 = vmov 920167782   ;;  %4838 = vcosq.f32 %v5774_v22  ;;  %v1689_v50 = vsub.s32 0, %v5767_v17 }
 0x19e   : > { %v1547_v16 = vshrl.u32 %v8122_v51, %v1535_v10  ;;  %v1528_v44 = vor.u32 8388608, %v1527_v6  ;;  %v8123_v46 = vmov 1326507024   ;;  %vm1309_vm7 = vcmp.eq.s32.totalorder %v5743_v38, 2 }
 0x19f   : > { %v1550_v7 = vshrl.u32 %v8123_v46, %v1535_v10  ;;  %v1400_v42 = vsub.s32 4, %v5598_v54  ;;  %v1545_v32 = vor.u32 %v1544_v23, %v1543_v27  ;;  %v1549_v15 = vshll.u32 %v8122_v51, %v1534_v47  ;;  %v5800_v23 = vpop.f32.mrb[6].mxu0 }
 0x1a0   : > { %v1548_v2 = vor.u32 %v1547_v16, %v1546_v11  ;;  %v1386_v41 = vsub.s32 32, %v5727_v9  ;;  %v1387_v59 = vshll.u32 %v5625_v49, %v5727_v9  ;;  %v1392_v30 = vshll.u32 %v1391_v19, 23  ;;  %8124 = vst [vmem:[#allocation13_spill] sm:$0xff] %v5800_v23 }
 0x1a1   : > { %vm1552_vm8 = vcmp.lt.s32.totalorder %v5779_v55, 1  ;;  %vm1306_vm9 = vcmp.eq.s32.totalorder %v5743_v38, 0  ;;  %vm2992_vm10 = vcmp.eq.s32.totalorder %v5753_v1, 2  ;;  %vm1316_vm11 = vcmp.lt.s32.totalorder %v5395_v52, 0 }
 0x1a2   : > { %vm4601_vm12 = vcmp.lt.s32.totalorder %v4600_v58, 0  ;;  %v1551_v6 = vor.u32 %v1550_v7, %v1549_v15  ;;  %vm1555_vm13 = vcmp.lt.s32.totalorder %v5779_v55, 4  ;;  %v1560_v47 = vsel %vm1552_vm8, %v1539_v43, %v1542_v33 }
 0x1a3   : > { %vm2989_vm14 = vcmp.eq.s32.totalorder %v5753_v1, 0  ;;  %v4607_v49 = vmin.u32 %v1689_v50, %v5767_v17  ;;  %vm1554_vm15 = vcmp.lt.s32.totalorder %v5779_v55, 3  ;;  %v1561_v9 = vsel %vm1555_vm13, %v1548_v2, 920167782 }
 0x1a4   : > { %v1568_v19 = vshll.u32 %v1528_v44, 8  ;;  %vm1553_vm0 = vcmp.lt.s32.totalorder %v5779_v55, 2  ;;  %v1557_v7 = vsel %vm1555_vm13, %v1545_v32, 2102212464  ;;  %v1562_v27 = vsel %vm1554_vm15, %v1545_v32, %v1561_v9 }
 0x1a5   : > { %v5813_v11 = vmul.f32 30.0, %v5304_v3  ;;  %v8125_v16 = vand.u32 2147483647, %v5395_v52  ;;  %v1388_v15 = vshrl.u32 %v1370_v45, %v1386_v41  ;;  %v5822_v44 = vsel %vm4601_vm12, 0, %v4600_v58 }
 0x1a6   : > { %v8128_v48 = vmov 683565275   ;;  %v1563_v12 = vsel %vm1553_vm0, %v1560_v47, %v1562_v27  ;;  %vm1305_vm2 = vcmp.lt.s32.totalorder %v5743_v38, 2  ;;  %vm2988_vm3 = vcmp.lt.s32.totalorder %v5753_v1, 2 }
 0x1a7   : > { %vm5817_vm1 = vcmp.le.f32.partialorder %v8125_v16, 0.7853982  ;;  %v1536_v20 = vshrl.u32 %v8128_v48, %v1535_v10  ;;  %v1564_v9 = vsel %vm1552_vm8, %v1542_v33, %v1545_v32  ;;  %v1565_v16 = vsel %vm1555_vm13, %v1551_v6, 1326507024  ;;  %v5847_v40 = vpop.eup %4838 }
 0x1a8   : > { %v5833_v37 = vmul.u32.u64.low %v1568_v19, %v1563_v12  ;;  %v5834_v45 = vmul.u32.u64.high %v1568_v19, %v1563_v12, %v5833_v37  ;;  %v1691_v58 = vclz %v4607_v49  ;;  %v1558_v41 = vsel %vm1554_vm15, %v1542_v33, %v1557_v7 }
 0x1a9   : > { %v1556_v10 = vsel %vm1552_vm8, %v1536_v20, %v1539_v43  ;;  %v1566_v47 = vsel %vm1554_vm15, %v1548_v2, %v1565_v16  ;;  %v1393_v27 = vor.u32 4788187, %v1392_v30  ;;  %v1493_v32 = vsub.s32 4294967266, %v5822_v44 }
 0x1aa   : > { %v1567_v6 = vsel %vm1553_vm0, %v1564_v9, %v1566_v47  ;;  %v1729_v12 = vand.u32 2139095040, %v5813_v11  ;;  %v8129_v49 = vxor.u32 2147483648, %v5729_v63  ;;  %4840 = vsinq.f32 %v5774_v22 }
 0x1ab   : > { %v5855_v43 = vmul.u32.u64.low %v1568_v19, %v1567_v6  ;;  %v5856_v33 = vmul.u32.u64.high %v1568_v19, %v1567_v6, %v5855_v43  ;;  %vm1303_vm4 = vweird.f32 %v5261_v13  ;;  %v1389_v2 = vor.u32 %v1388_v15, %v1387_v59 }
 0x1ac   : > { %v1311_v20 = vsel %vm1309_vm7, %v8129_v49, %v5741_v31  ;;  %v1559_v30 = vsel %vm1553_vm0, %v1556_v10, %v1558_v41  ;;  %v1578_v7 = vadd.s32 1, %v5834_v45  ;;  %v1730_v9 = vshrl.u32 %v1729_v12, 23 }
 0x1ad   : > { %v8130_v16 = vxor.u32 2147483648, %v5741_v31  ;;  %v8131_v22 = vmov %v8129_v49  ;;  %v1401_v55 = vsel %vm1316_vm11, %v1400_v42, %v5598_v54  ;;  %v4608_v59 = vadd.s32 4294967294, %v1691_v58 }
 0x1ae   : > { %v2994_v6 = vsel %vm2992_vm10, %v8131_v22, %v5741_v31  ;;  %v1394_v41 = vand.u32 2147483647, %v1393_v27  ;;  %v1494_v12 = vadd.s32 127, %v1493_v32  ;;  %v4610_v49 = vadd.s32 4294967169, %v1730_v9 }
 0x1af   : > { %v1308_v47 = vsel %vm1306_vm9, %v5729_v63, %v8130_v16  ;;  %v8132_v15 = vmov %v8130_v16  ;;  %v5881_v43 = vand.u32 3, %v5737_v39  ;;  %v5884_v16 = vand.u32 3, %v5760_v36 }
 0x1b0   : > { %v2991_v10 = vsel %vm2989_vm14, %v5729_v63, %v8132_v15  ;;  %v1575_v22 = vmul.u32 %v1568_v19, %v1559_v30  ;;  %vm1577_vm5 = vc.u32 %v5856_v33, %v5833_v37  ;;  %v1396_v54 = vcvt.s32.f32 %v1389_v2  ;;  %v5898_v30 = vpop.f32.mrb[6].mxu1 }
 0x1b1   : > { %v1403_v31 = vsel %vm5817_vm1, 0, %v1401_v55  ;;  %v1579_v42 = vsel %vm1577_vm5, %v1578_v7, %v5834_v45  ;;  %v1736_v63 = vadd.s32 1, %v4610_v49  ;;  %v1312_v58 = vsel %vm1305_vm2, %v1308_v47, %v1311_v20  ;;  %8133 = vst [vmem:[#allocation14_spill] sm:$0xff] %v5898_v30 }
 0x1b2   : > { %v2995_v39 = vsel %vm2988_vm3, %v2991_v10, %v2994_v6  ;;  %vm4609_vm6 = vcmp.lt.s32.totalorder %v4608_v59, 0  ;;  %v1580_v36 = vadd.s32 %v1579_v42, %v1575_v22  ;;  %v1397_v27 = vmul.f32 %v1396_v54, %v1394_v41 }
 0x1b3   : > { %v1489_v19 = vsub.s32 32, %v5822_v44  ;;  %v1495_v32 = vshll.u32 %v1494_v12, 23  ;;  %vm1737_vm7 = vcmp.gt.s32.totalorder %v1736_v63, 0  ;;  %vm1206_vm8 = vcmp.eq.s32.totalorder %v5881_v43, 2 }
 0x1b4   : > { %vm2888_vm9 = vcmp.eq.s32.totalorder %v5884_v16, 2  ;;  %v3090_v2 = vadd.s32 3, %v1403_v31  ;;  %v1581_v45 = vadd.s32 536870912, %v1580_v36  ;;  %v1473_v38 = vadd.s32 %v5594_v62, %v5603_v60  ;;  %v5907_v9 = vpop.eup %4840 }
 0x1b5   : > { %v5902_v1 = vsel %vm4609_vm6, 0, %v4608_v59  ;;  %v1738_v20 = vsel %vm1737_vm7, %v1736_v63, 0  ;;  %v5905_v7 = vmul.f32 30.0, %v5423_v24  ;;  %v5911_v47 = vsel %vm1303_vm4, nan, %v1312_v58 }
 0x1b6   : > { %8134 = vst [vmem:[#allocation15_spill] sm:$0xff] %v5911_v47  ;;  %v5915_v6 = vsel %vm1303_vm4, nan, %v2995_v39  ;;  %v1207_v55 = vxor.u32 2147483648, %v5847_v40  ;;  %v5918_v15 = vshrl.u32 %v1581_v45, 30  ;;  %v1398_v62 = vxor.u32 2147483648, %v1397_v27 }
 0x1b7   : > { %8135 = vst [vmem:[#allocation16_spill] sm:$0xff] %v5915_v6  ;;  %v1491_v60 = vshrl.u32 %v1473_v38, %v1489_v19  ;;  %v1496_v59 = vor.u32 4788187, %v1495_v32  ;;  %v1740_v10 = vand.u32 31, %v1738_v20  ;;  %v5920_v41 = vand.u32 3, %v1403_v31 }
 0x1b8   : > { %v5924_v12 = vmul.f32 %v5276_v25, %v5276_v25  ;;  %v1699_v49 = vsub.s32 4294967266, %v5902_v1  ;;  %v5929_v13 = vmul.f32 %v5278_v26, %v5278_v26  ;;  %v5931_v22 = vand.u32 3, %v3090_v2 }
 0x1b9   : > { %v1490_v54 = vshll.u32 %v5694_v4, %v5822_v44  ;;  %v1741_v42 = vsub.s32 32, %v1740_v10  ;;  %v1832_v63 = vand.u32 2139095040, %v5905_v7  ;;  %v5940_v25 = vsel %vm1206_vm8, %v1207_v55, %v5907_v9 }
 0x1ba   : > { %8136 = vst [vmem:[#allocation17_spill] sm:$0xff] %v5924_v12  ;;  %8137 = vst [vmem:[#allocation18_spill] sm:$0xff] %v5929_v13  ;;  %v5945_v26 = vsel %vm2888_vm9, %v1207_v55, %v5907_v9  ;;  %v1583_v58 = vshll.u32 %v5918_v15, 30  ;;  %v1399_v4 = vsel %vm1316_vm11, %v1398_v62, %v1397_v27  ;;  %v1497_v39 = vand.u32 2147483647, %v1496_v59 }
 0x1bb   : > { %v1492_v44 = vor.u32 %v1491_v60, %v1490_v54  ;;  %v8084_v19 = vand.u32 2147483647, %v5813_v11  ;;  %v1700_v32 = vadd.s32 127, %v1699_v49  ;;  %v8138_v2 = vmov 2475754826  }
 0x1bc   : > { %v1744_v45 = vshrl.u32 %v8138_v2, %v1741_v42  ;;  %v8139_v38 = vmov 2131351028   ;;  %v1750_v6 = vshrl.u32 %v8121_v18, %v1741_v42  ;;  %v5954_v47 = vshrl.u32 %v1738_v20, 5 }
 0x1bd   : > { %v1747_v31 = vshrl.u32 %v8139_v38, %v1741_v42  ;;  %v1752_v55 = vshll.u32 %v8121_v18, %v1740_v10  ;;  %v1753_v13 = vshrl.u32 %v8122_v51, %v1741_v42  ;;  %v1833_v12 = vshrl.u32 %v1832_v63, 23 }
 0x1be   : > { %v5958_v8 = vsub.s32 %v1580_v36, %v1583_v58  ;;  %v1743_v27 = vshll.u32 %v8128_v48, %v1740_v10  ;;  %v1746_v62 = vshll.u32 %v8138_v2, %v1740_v10  ;;  %v1749_v60 = vshll.u32 %v8139_v38, %v1740_v10 }
 0x1bf   : > { %v1499_v59 = vcvt.s32.f32 %v1492_v44  ;;  %v1695_v49 = vsub.s32 32, %v5902_v1  ;;  %v1733_v20 = vand.u32 8388607, %v8084_v19  ;;  %v1754_v54 = vor.u32 %v1753_v13, %v1752_v55 }
 0x1c0   : > { %v1745_v56 = vor.u32 %v1744_v45, %v1743_v27  ;;  %v1748_v30 = vor.u32 %v1747_v31, %v1746_v62  ;;  %v1751_v23 = vor.u32 %v1750_v6, %v1749_v60  ;;  %v1756_v63 = vshrl.u32 %v8123_v46, %v1741_v42 }
 0x1c1   : > { %v1402_v36 = vsel %vm5817_vm1, %v5395_v52, %v1399_v4  ;;  %v1679_v58 = vadd.s32 %v5669_v29, %v5689_v34  ;;  %v1701_v28 = vshll.u32 %v1700_v32, 23  ;;  %v4614_v44 = vadd.s32 4294967169, %v1833_v12 }
 0x1c2   : > { %vm1203_vm10 = vcmp.eq.s32.totalorder %v5881_v43, 0  ;;  %v1500_v0 = vmul.f32 %v1499_v59, %v1497_v39  ;;  %v1586_v19 = vsub.s32 0, %v5958_v8  ;;  %v1755_v13 = vshll.u32 %v8122_v51, %v1740_v10 }
 0x1c3   : > { %vm1761_vm11 = vcmp.lt.s32.totalorder %v5954_v47, 4  ;;  %v1734_v6 = vor.u32 8388608, %v1733_v20  ;;  %vm1758_vm12 = vcmp.lt.s32.totalorder %v5954_v47, 1  ;;  %vm1760_vm13 = vcmp.lt.s32.totalorder %v5954_v47, 3 }
 0x1c4   : > { %v1767_v50 = vsel %vm1761_vm11, %v1754_v54, 920167782  ;;  %vm1419_vm14 = vcmp.lt.s32.totalorder %v5513_v35, 0  ;;  %v1697_v29 = vshrl.u32 %v1679_v58, %v1695_v49  ;;  %v1757_v34 = vor.u32 %v1756_v63, %v1755_v13 }
 0x1c5   : > { %v1766_v12 = vsel %vm1758_vm12, %v1745_v56, %v1748_v30  ;;  %v1768_v10 = vsel %vm1760_vm13, %v1751_v23, %v1767_v50  ;;  %v1503_v31 = vsub.s32 4, %v5653_v57  ;;  %v1696_v4 = vshll.u32 %v5767_v17, %v5902_v1 }
 0x1c6   : > { %v1702_v39 = vor.u32 4788187, %v1701_v28  ;;  %v1839_v32 = vadd.s32 1, %v4614_v44  ;;  %v4603_v45 = vmin.u32 %v1586_v19, %v5958_v8  ;;  %v1742_v55 = vshrl.u32 %v8128_v48, %v1741_v42 }
 0x1c7   : > { %vm1759_vm15 = vcmp.lt.s32.totalorder %v5954_v47, 2  ;;  %v1763_v27 = vsel %vm1761_vm11, %v1751_v23, 2102212464  ;;  %v1501_v62 = vxor.u32 2147483648, %v1500_v0  ;;  %v1770_v59 = vsel %vm1758_vm12, %v1748_v30, %v1751_v23 }
 0x1c8   : > { %v1769_v60 = vsel %vm1759_vm15, %v1766_v12, %v1768_v10  ;;  %v1774_v49 = vshll.u32 %v1734_v6, 8  ;;  %v1698_v17 = vor.u32 %v1697_v29, %v1696_v4  ;;  %v1762_v28 = vsel %vm1758_vm12, %v1742_v55, %v1745_v56 }
 0x1c9   : > { %v1771_v1 = vsel %vm1761_vm11, %v1757_v34, 1326507024  ;;  %v8086_v42 = vand.u32 2147483647, %v5905_v7  ;;  %v1764_v19 = vsel %vm1760_vm13, %v1748_v30, %v1763_v27  ;;  %v1703_v23 = vand.u32 2147483647, %v1702_v39 }
 0x1ca   : > { %v1772_v20 = vsel %vm1760_vm13, %v1754_v54, %v1771_v1  ;;  %v6006_v63 = vmul.u32.u64.low %v1774_v49, %v1769_v60  ;;  %v6007_v58 = vmul.u32.u64.high %v1774_v49, %v1769_v60, %v6006_v63  ;;  %v1588_v44 = vclz %v4603_v45 }
 0x1cb   : > { %v1773_v56 = vsel %vm1759_vm15, %v1770_v59, %v1772_v20  ;;  %vm1840_vm0 = vcmp.gt.s32.totalorder %v1839_v32, 0  ;;  %vm1202_vm1 = vcmp.lt.s32.totalorder %v5881_v43, 2  ;;  %v8140_v13 = vxor.u32 2147483648, %v5907_v9  ;;  %v6052_v20 = vpop.f32.mrb[7].mxu0 }
 0x1cc   : > { %vm2885_vm2 = vcmp.eq.s32.totalorder %v5884_v16, 0  ;;  %v8141_v54 = vand.u32 2147483647, %v5513_v35  ;;  %v6025_v50 = vmul.u32.u64.low %v1774_v49, %v1773_v56  ;;  %v6026_v29 = vmul.u32.u64.high %v1774_v49, %v1773_v56, %v6025_v50 }
 0x1cd   : > { %v1205_v30 = vsel %vm1203_vm10, %v5847_v40, %v8140_v13  ;;  %v1841_v34 = vsel %vm1840_vm0, %v1839_v32, 0  ;;  %4842 = vcosq.f32 %v1402_v36  ;;  %v1705_v12 = vcvt.s32.f32 %v1698_v17 }
 0x1ce   : > { %vm6021_vm3 = vcmp.le.f32.partialorder %v8141_v54, 0.7853982  ;;  %v1765_v10 = vsel %vm1759_vm15, %v1762_v28, %v1764_v19  ;;  %v1843_v4 = vand.u32 31, %v1841_v34  ;;  %4844 = vsinq.f32 %v1402_v36 }
 0x1cf   : > { %v1502_v39 = vsel %vm1419_vm14, %v1501_v62, %v1500_v0  ;;  %v1504_v45 = vsel %vm1419_vm14, %v1503_v31, %v5653_v57  ;;  %v1784_v55 = vadd.s32 1, %v6007_v58  ;;  %v6036_v27 = vmul.f32 %v1705_v12, %v1703_v23 }
 0x1d0   : > { %v4604_v60 = vadd.s32 4294967294, %v1588_v44  ;;  %v1836_v32 = vand.u32 8388607, %v8086_v42  ;;  %v1844_v59 = vsub.s32 32, %v1843_v4  ;;  %v1781_v47 = vmul.u32 %v1774_v49, %v1765_v10 }
 0x1d1   : > { %vm1783_vm4 = vc.u32 %v6026_v29, %v6006_v63  ;;  %v6042_v36 = vshrl.u32 %v1841_v34, 5  ;;  %v1846_v0 = vshll.u32 %v8128_v48, %v1843_v4  ;;  %v1849_v31 = vshll.u32 %v8138_v2, %v1843_v4 }
 0x1d2   : > { %v1785_v62 = vsel %vm1783_vm4, %v1784_v55, %v6007_v58  ;;  %v1847_v57 = vshrl.u32 %v8138_v2, %v1844_v59  ;;  %v1850_v17 = vshrl.u32 %v8139_v38, %v1844_v59  ;;  %v1853_v1 = vshrl.u32 %v8121_v18, %v1844_v59 }
 0x1d3   : > { %v1786_v28 = vadd.s32 %v1785_v62, %v1781_v47  ;;  %v1855_v49 = vshll.u32 %v8121_v18, %v1843_v4  ;;  %v1856_v19 = vshrl.u32 %v8122_v51, %v1844_v59  ;;  %v1852_v56 = vshll.u32 %v8139_v38, %v1843_v4 }
 0x1d4   : > { %v1848_v23 = vor.u32 %v1847_v57, %v1846_v0  ;;  %v1851_v44 = vor.u32 %v1850_v17, %v1849_v31  ;;  %v1859_v58 = vshrl.u32 %v8123_v46, %v1844_v59  ;;  %vm2884_vm5 = vcmp.lt.s32.totalorder %v5884_v16, 2 }
 0x1d5   : > { %v1787_v13 = vadd.s32 536870912, %v1786_v28  ;;  %v1837_v54 = vor.u32 8388608, %v1836_v32  ;;  %v1857_v50 = vor.u32 %v1856_v19, %v1855_v49  ;;  %v1858_v34 = vshll.u32 %v8122_v51, %v1843_v4 }
 0x1d6   : > { %v1209_v12 = vsel %vm1202_vm1, %v1205_v30, %v5940_v25  ;;  %v8144_v10 = vxor.u32 2147483648, %v5907_v9  ;;  %v1506_v47 = vsel %vm6021_vm3, 0, %v1504_v45  ;;  %vm1625_vm6 = vcmp.lt.s32.totalorder %v5552_v53, 0 }
 0x1d7   : > { %v1854_v0 = vor.u32 %v1853_v1, %v1852_v56  ;;  %v6069_v32 = vshrl.u32 %v1787_v13, 30  ;;  %v1860_v62 = vor.u32 %v1859_v58, %v1858_v34  ;;  %vm1861_vm7 = vcmp.lt.s32.totalorder %v6042_v36, 1  ;;  %v6073_v43 = vpop.eup %4842 }
 0x1d8   : > { %v2887_v55 = vsel %vm2885_vm2, %v5847_v40, %v8144_v10  ;;  %vm1864_vm8 = vcmp.lt.s32.totalorder %v6042_v36, 4  ;;  %vm1200_vm9 = vweird.f32 %v5264_v14  ;;  %v1505_v40 = vsel %vm6021_vm3, %v5513_v35, %v1502_v39  ;;  %v6083_v30 = vpop.eup %4844 }
 0x1d9   : > { %vm4605_vm10 = vcmp.lt.s32.totalorder %v4604_v60, 0  ;;  %v1869_v9 = vsel %vm1861_vm7, %v1848_v23, %v1851_v44  ;;  %v1870_v25 = vsel %vm1864_vm8, %v1857_v50, 920167782  ;;  %v8145_v4 = vand.u32 2147483647, %v5552_v53 }
 0x1da   : > { %v1707_v57 = vxor.u32 2147483648, %v6036_v27  ;;  %v1789_v6 = vshll.u32 %v6069_v32, 30  ;;  %vm1863_vm12 = vcmp.lt.s32.totalorder %v6042_v36, 3  ;;  %v1877_v39 = vshll.u32 %v1837_v54, 8 }
 0x1db   : > { %vm6087_vm11 = vcmp.le.f32.partialorder %v8145_v4, 0.7853982  ;;  %vm1862_vm13 = vcmp.lt.s32.totalorder %v6042_v36, 2  ;;  %v1866_v31 = vsel %vm1864_vm8, %v1854_v0, 2102212464  ;;  %v1871_v17 = vsel %vm1863_vm12, %v1854_v0, %v1870_v25 }
 0x1dc   : > { %v1873_v1 = vsel %vm1861_vm7, %v1851_v44, %v1854_v0  ;;  %v6101_v49 = vsel %vm4605_vm10, 0, %v4604_v60  ;;  %v1845_v19 = vshrl.u32 %v8128_v48, %v1844_v59  ;;  %v1872_v56 = vsel %vm1862_vm13, %v1869_v9, %v1871_v17 }
 0x1dd   : > { %v1874_v58 = vsel %vm1864_vm8, %v1860_v62, 1326507024  ;;  %vm1412_vm14 = vcmp.eq.s32.totalorder %v5920_v41, 2  ;;  %v6109_v13 = vsub.s32 %v1786_v28, %v1789_v6  ;;  %vm1409_vm15 = vcmp.eq.s32.totalorder %v5920_v41, 0 }
 0x1de   : > { %v1875_v54 = vsel %vm1863_vm12, %v1857_v50, %v1874_v58  ;;  %v6113_v34 = vmul.u32.u64.low %v1877_v39, %v1872_v56  ;;  %v6114_v10 = vmul.u32.u64.high %v1877_v39, %v1872_v56, %v6113_v34  ;;  %vm3093_vm0 = vcmp.eq.s32.totalorder %v5931_v22, 0 }
 0x1df   : > { %v1865_v60 = vsel %vm1861_vm7, %v1845_v19, %v1848_v23  ;;  %v1867_v59 = vsel %vm1863_vm12, %v1851_v44, %v1866_v31  ;;  %v1876_v28 = vsel %vm1862_vm13, %v1873_v1, %v1875_v54  ;;  %v6126_v0 = vmul.f32 30.0, %v5473_v5 }
 0x1e0   : > { %v2891_v50 = vsel %vm2884_vm5, %v2887_v55, %v5945_v26  ;;  %v3194_v62 = vadd.s32 3, %v1506_v47  ;;  %v6131_v9 = vmul.u32.u64.low %v1877_v39, %v1876_v28  ;;  %v6132_v25 = vmul.u32.u64.high %v1877_v39, %v1876_v28, %v6131_v9 }
 0x1e1   : > { %4846 = vcosq.f32 %v1505_v40  ;;  %v1708_v23 = vsel %vm1625_vm6, %v1707_v57, %v6036_v27  ;;  %v1709_v44 = vsub.s32 4, %v5715_v61  ;;  %v1596_v4 = vsub.s32 4294967266, %v6101_v49 }
 0x1e2   : > { %vm1408_vm1 = vcmp.lt.s32.totalorder %v5920_v41, 2  ;;  %vm3092_vm2 = vcmp.lt.s32.totalorder %v5931_v22, 2  ;;  %4848 = vsinq.f32 %v1505_v40  ;;  %v1792_v16 = vsub.s32 0, %v6109_v13 }
 0x1e3   : > { %v1868_v26 = vsel %vm1862_vm13, %v1865_v60, %v1867_v59  ;;  %v1887_v55 = vadd.s32 1, %v6114_v10  ;;  %v6147_v6 = vsel %vm1200_vm9, nan, %v1209_v12  ;;  %v1413_v27 = vxor.u32 2147483648, %v6073_v43 }
 0x1e4   : > { %8148 = vst [vmem:[#allocation19_spill] sm:$0xff] %v6147_v6  ;;  %vm3096_vm3 = vcmp.eq.s32.totalorder %v5931_v22, 2  ;;  %v2038_v57 = vand.u32 2139095040, %v6126_v0  ;;  %v6154_v40 = vsel %vm1200_vm9, nan, %v2891_v50  ;;  %v1410_v31 = vxor.u32 2147483648, %v6083_v30 }
 0x1e5   : > { %8149 = vst [vmem:[#allocation20_spill] sm:$0xff] %v6154_v40  ;;  %v6157_v36 = vand.u32 3, %v1506_v47  ;;  %v1711_v17 = vsel %vm6087_vm11, %v5552_v53, %v1708_v23  ;;  %v1597_v12 = vadd.s32 127, %v1596_v4  ;;  %v1884_v1 = vmul.u32 %v1877_v39, %v1868_v26 }
 0x1e6   : > { %vm1886_vm4 = vc.u32 %v6132_v25, %v6113_v34  ;;  %v2039_v19 = vshrl.u32 %v2038_v57, 23  ;;  %v6164_v56 = vand.u32 3, %v3194_v62  ;;  %v1710_v14 = vsel %vm1625_vm6, %v1709_v44, %v5715_v61 }
 0x1e7   : > { %v4611_v58 = vmin.u32 %v1792_v16, %v6109_v13  ;;  %v1888_v47 = vsel %vm1886_vm4, %v1887_v55, %v6114_v10  ;;  %vm1406_vm5 = vweird.f32 %v5395_v52  ;;  %v1414_v39 = vsel %vm1412_vm14, %v1413_v27, %v6083_v30 }
 0x1e8   : > { %v1592_v54 = vsub.s32 32, %v6101_v49  ;;  %v1889_v60 = vadd.s32 %v1888_v47, %v1884_v1  ;;  %v4622_v59 = vadd.s32 4294967169, %v2039_v19  ;;  %v1411_v28 = vsel %vm1409_vm15, %v6073_v43, %v1410_v31 }
 0x1e9   : > { %v3095_v61 = vsel %vm3093_vm0, %v6073_v43, %v1410_v31  ;;  %v3098_v10 = vsel %vm3096_vm3, %v1413_v27, %v6083_v30  ;;  %4850 = vcosq.f32 %v1711_v17  ;;  %vm1515_vm6 = vcmp.eq.s32.totalorder %v6157_v36, 2 }
 0x1ea   : > { %v1712_v50 = vsel %vm6087_vm11, 0, %v1710_v14  ;;  %v1576_v62 = vadd.s32 %v5833_v37, %v5856_v33  ;;  %v1598_v9 = vshll.u32 %v1597_v12, 23  ;;  %vm1512_vm7 = vcmp.eq.s32.totalorder %v6157_v36, 0 }
 0x1eb   : > { %vm3200_vm8 = vcmp.eq.s32.totalorder %v6164_v56, 2  ;;  %v6194_v43 = vmul.f32 %v5304_v3, %v5304_v3  ;;  %v1794_v23 = vclz %v4611_v58  ;;  %v6198_v30 = vmul.f32 %v5423_v24, %v5423_v24  ;;  %v4847_v45 = vpop.eup %4846 }
 0x1ec   : > { %v1890_v44 = vadd.s32 536870912, %v1889_v60  ;;  %v1415_v4 = vsel %vm1408_vm1, %v1411_v28, %v1414_v39  ;;  %v3099_v37 = vsel %vm3092_vm2, %v3095_v61, %v3098_v10  ;;  %vm3197_vm9 = vcmp.eq.s32.totalorder %v6164_v56, 0  ;;  %v4849_v16 = vpop.eup %4848 }
 0x1ed   : > { %8150 = vst [vmem:[#allocation21_spill] sm:$0xff] %v6194_v43  ;;  %8151 = vst [vmem:[#allocation22_spill] sm:$0xff] %v6198_v30  ;;  %vm1522_vm10 = vcmp.lt.s32.totalorder %v5639_v21, 0  ;;  %v1594_v33 = vshrl.u32 %v1576_v62, %v1592_v54  ;;  %v2045_v3 = vadd.s32 1, %v4622_v59  ;;  %4852 = vsinq.f32 %v1711_v17 }
 0x1ee   : > { %v6206_v26 = vand.u32 3, %v1712_v50  ;;  %v3402_v24 = vadd.s32 3, %v1712_v50  ;;  %v6208_v55 = vshrl.u32 %v1890_v44, 30  ;;  %v1593_v41 = vshll.u32 %v5958_v8, %v6101_v49  ;;  %v8158_v50 = vld [vmem:[#allocation6_spill] sm:$0xff] }
 0x1ef   : > { %v1599_v27 = vor.u32 4788187, %v1598_v9  ;;  %v8085_v22 = vand.u32 2147483647, %v6126_v0  ;;  %vm2046_vm11 = vcmp.gt.s32.totalorder %v2045_v3, 0  ;;  %v1516_v57 = vxor.u32 2147483648, %v4847_v45 }
 0x1f0   : > { %v4612_v31 = vadd.s32 4294967294, %v1794_v23  ;;  %v1892_v12 = vshll.u32 %v6208_v55, 30  ;;  %v2047_v1 = vsel %vm2046_vm11, %v2045_v3, 0  ;;  %v1513_v19 = vxor.u32 2147483648, %v4849_v16 }
 0x1f1   : > { %v1595_v14 = vor.u32 %v1594_v33, %v1593_v41  ;;  %v6216_v17 = vmul.f32 %v5473_v5, %v5473_v5  ;;  %v2049_v58 = vand.u32 31, %v2047_v1  ;;  %v6220_v47 = vsel %vm1406_vm5, nan, %v1415_v4 }
 0x1f2   : > { %8153 = vst [vmem:[#allocation24_spill] sm:$0xff] %v6220_v47  ;;  %v6224_v8 = vsel %vm1406_vm5, nan, %v3099_v37  ;;  %v1606_v49 = vsub.s32 4, %v5918_v15  ;;  %v6227_v39 = vsub.s32 %v1889_v60, %v1892_v12  ;;  %vm1511_vm12 = vcmp.lt.s32.totalorder %v6157_v36, 2 }
 0x1f3   : > { %8152 = vst [vmem:[#allocation23_spill] sm:$0xff] %v6216_v17  ;;  %8154 = vst [vmem:[#allocation25_spill] sm:$0xff] %v6224_v8  ;;  %vm1721_vm13 = vcmp.eq.s32.totalorder %v6206_v26, 2  ;;  %v8155_v5 = vand.u32 2147483647, %v5639_v21  ;;  %v2050_v28 = vsub.s32 32, %v2049_v58  ;;  %v6239_v61 = vpop.eup %4850  ;;  %v1517_v60 = vsel %vm1515_vm6, %v1516_v57, %v4849_v16 }
 0x1f4   : > { %v1600_v59 = vand.u32 2147483647, %v1599_v27  ;;  %v2042_v52 = vand.u32 8388607, %v8085_v22  ;;  %v6243_v10 = vand.u32 3, %v3402_v24  ;;  %vm4613_vm15 = vcmp.lt.s32.totalorder %v4612_v31, 0 }
 0x1f5   : > { %vm6233_vm14 = vcmp.le.f32.partialorder %v8155_v5, 0.7853982  ;;  %v6246_v62 = vmul.f32 30.0, %v8158_v50  ;;  %v1514_v9 = vsel %vm1512_vm7, %v4847_v45, %v1513_v19  ;;  %v6252_v23 = vsel %vm3200_vm8, %v1516_v57, %v4849_v16 }
 0x1f6   : > { %v1602_v44 = vcvt.s32.f32 %v1595_v14  ;;  %v1895_v4 = vsub.s32 0, %v6227_v39  ;;  %v6257_v37 = vsel %vm3197_vm9, %v4847_v45, %v1513_v19  ;;  %v1607_v33 = vsel %vm1522_vm10, %v1606_v49, %v5918_v15 }
 0x1f7   : > { %v2053_v3 = vshrl.u32 %v8138_v2, %v2050_v28  ;;  %v2056_v24 = vshrl.u32 %v8139_v38, %v2050_v28  ;;  %v6265_v16 = vsel %vm4613_vm15, 0, %v4612_v31  ;;  %v2043_v57 = vor.u32 8388608, %v2042_v52  ;;  %v6267_v12 = vpop.eup %4852 }
 0x1f8   : > { %v1603_v27 = vmul.f32 %v1602_v44, %v1600_v59  ;;  %v2052_v14 = vshll.u32 %v8128_v48, %v2049_v58  ;;  %v2055_v45 = vshll.u32 %v8138_v2, %v2049_v58  ;;  %v2059_v19 = vshrl.u32 %v8121_v18, %v2050_v28  ;;  %v6277_v59 = vpop.f32.mrb[7].mxu1 }
 0x1f9   : > { %v1935_v15 = vand.u32 2139095040, %v6246_v62  ;;  %v4615_v49 = vmin.u32 %v1895_v4, %v6227_v39  ;;  %v2058_v5 = vshll.u32 %v8139_v38, %v2049_v58  ;;  %v2061_v22 = vshll.u32 %v8121_v18, %v2049_v58 }
 0x1fa   : > { %v2062_v31 = vshrl.u32 %v8122_v51, %v2050_v28  ;;  %v1802_v52 = vsub.s32 4294967266, %v6265_v16  ;;  %v2048_v44 = vshrl.u32 %v2047_v1, 5  ;;  %v2054_v42 = vor.u32 %v2053_v3, %v2052_v14 }
 0x1fb   : > { %v2057_v41 = vor.u32 %v2056_v24, %v2055_v45  ;;  %v2060_v8 = vor.u32 %v2059_v19, %v2058_v5  ;;  %v2064_v40 = vshll.u32 %v8122_v51, %v2049_v58  ;;  %v2065_v6 = vshrl.u32 %v8123_v46, %v2050_v28 }
 0x1fc   : > { %v2063_v47 = vor.u32 %v2062_v31, %v2061_v22  ;;  %v6284_v4 = vsel %vm1511_vm12, %v1514_v9, %v1517_v60  ;;  %v1719_v17 = vxor.u32 2147483648, %v6267_v12  ;;  %v8159_v30 = vxor.u32 2147483648, %v6239_v61 }
 0x1fd   : > { %v6296_v22 = vsel %vm6233_vm14, 0, %v1607_v33  ;;  %vm1718_vm0 = vcmp.eq.s32.totalorder %v6206_v26, 0  ;;  %vm3405_vm1 = vcmp.eq.s32.totalorder %v6243_v10, 0  ;;  %vm3408_vm2 = vcmp.eq.s32.totalorder %v6243_v10, 2 }
 0x1fe   : > { %v6292_v1 = vsel %vm1721_vm13, %v8159_v30, %v6267_v12  ;;  %v1604_v36 = vxor.u32 2147483648, %v1603_v27  ;;  %v1897_v58 = vclz %v4615_v49  ;;  %v2066_v60 = vor.u32 %v2065_v6, %v2064_v40 }
 0x1ff   : > { %v1936_v9 = vshrl.u32 %v1935_v15, 23  ;;  %v1803_v3 = vadd.s32 127, %v1802_v52  ;;  %vm2067_vm3 = vcmp.lt.s32.totalorder %v2048_v44, 1  ;;  %vm2070_vm4 = vcmp.lt.s32.totalorder %v2048_v44, 4 }
 0x200   : > { %v2083_v24 = vshll.u32 %v2043_v57, 8  ;;  %vm2069_vm5 = vcmp.lt.s32.totalorder %v2048_v44, 3  ;;  %v2072_v30 = vsel %vm2070_vm4, %v2060_v8, 2102212464  ;;  %v2075_v14 = vsel %vm2067_vm3, %v2054_v42, %v2057_v41 }
 0x201   : > { %v2076_v33 = vsel %vm2070_vm4, %v2063_v47, 920167782  ;;  %vm1728_vm6 = vcmp.lt.s32.totalorder %v5813_v11, 0  ;;  %v2051_v45 = vshrl.u32 %v8128_v48, %v2050_v28  ;;  %vm2068_vm7 = vcmp.lt.s32.totalorder %v2048_v44, 2 }
 0x202   : > { %v2077_v19 = vsel %vm2069_vm5, %v2060_v8, %v2076_v33  ;;  %v2079_v49 = vsel %vm2067_vm3, %v2057_v41, %v2060_v8  ;;  %vm3196_vm8 = vcmp.lt.s32.totalorder %v6164_v56, 2  ;;  %v4616_v6 = vadd.s32 4294967294, %v1897_v58 }
 0x203   : > { %v2078_v40 = vsel %vm2068_vm7, %v2075_v14, %v2077_v19  ;;  %v2080_v57 = vsel %vm2070_vm4, %v2066_v60, 1326507024  ;;  %v4618_v15 = vadd.s32 4294967169, %v1936_v9  ;;  %vm1717_vm9 = vcmp.lt.s32.totalorder %v6206_v26, 2 }
 0x204   : > { %vm3404_vm11 = vcmp.lt.s32.totalorder %v6243_v10, 2  ;;  %v1798_v5 = vsub.s32 32, %v6265_v16  ;;  %v2071_v28 = vsel %vm2067_vm3, %v2051_v45, %v2054_v42  ;;  %v2073_v31 = vsel %vm2069_vm5, %v2057_v41, %v2072_v30 }
 0x205   : > { %v2081_v52 = vsel %vm2069_vm5, %v2063_v47, %v2080_v57  ;;  %vm1509_vm12 = vweird.f32 %v5513_v35  ;;  %v8160_v8 = vand.u32 2147483647, %v5813_v11  ;;  %v1782_v60 = vadd.s32 %v6006_v63, %v6026_v29 }
 0x206   : > { %v2082_v9 = vsel %vm2068_vm7, %v2079_v49, %v2081_v52  ;;  %v6324_v14 = vmul.u32.u64.low %v2083_v24, %v2078_v40  ;;  %v6325_v33 = vmul.u32.u64.high %v2083_v24, %v2078_v40, %v6324_v14  ;;  %v1605_v42 = vsel %vm1522_vm10, %v1604_v36, %v1603_v27 }
 0x207   : > { %vm6317_vm13 = vcmp.le.f32.partialorder %v8160_v8, 0.7853982  ;;  %v1804_v47 = vshll.u32 %v1803_v3, 23  ;;  %v6330_v41 = vmul.u32.u64.low %v2083_v24, %v2082_v9  ;;  %v6331_v30 = vmul.u32.u64.high %v2083_v24, %v2082_v9, %v6330_v41 }
 0x208   : > { %vm1715_vm15 = vweird.f32 %v5552_v53  ;;  %v1812_v45 = vsub.s32 4, %v6069_v32  ;;  %vm4617_vm3 = vcmp.lt.s32.totalorder %v4616_v6, 0  ;;  %v2074_v63 = vsel %vm2068_vm7, %v2071_v28, %v2073_v31 }
 0x209   : > { %v1942_v29 = vadd.s32 1, %v4618_v15  ;;  %v1720_v19 = vsel %vm1718_vm0, %v6239_v61, %v1719_v17  ;;  %v3407_v27 = vsel %vm3405_vm1, %v6239_v61, %v1719_v17  ;;  %v8163_v36 = vxor.u32 2147483648, %v6239_v61 }
 0x20a   : > { %v1800_v49 = vshrl.u32 %v1782_v60, %v1798_v5  ;;  %v1608_v44 = vsel %vm6233_vm14, %v5639_v21, %v1605_v42  ;;  %v1799_v40 = vshll.u32 %v6109_v13, %v6265_v16  ;;  %v2093_v57 = vadd.s32 1, %v6325_v33  ;;  %v6379_v60 = vpop.f32.mrb[8].mxu0 }
 0x20b   : > { %v3410_v3 = vsel %vm3408_vm2, %v8163_v36, %v6267_v12  ;;  %vm1943_vm10 = vcmp.gt.s32.totalorder %v1942_v29, 0  ;;  %v1805_v15 = vor.u32 4788187, %v1804_v47  ;;  %v6353_v28 = vsel %vm4617_vm3, 0, %v4616_v6 }
 0x20c   : > { %v2090_v17 = vmul.u32 %v2083_v24, %v2074_v63  ;;  %vm2092_vm0 = vc.u32 %v6331_v30, %v6324_v14  ;;  %v3298_v61 = vadd.s32 3, %v6296_v22  ;;  %v1813_v54 = vsel %vm1728_vm6, %v1812_v45, %v6069_v32 }
 0x20d   : > { %v2094_v12 = vsel %vm2092_vm0, %v2093_v57, %v6325_v33  ;;  %v1944_v5 = vsel %vm1943_vm10, %v1942_v29, 0  ;;  %v3203_v13 = vsel %vm3196_vm8, %v6257_v37, %v6252_v23  ;;  %4854 = vcosq.f32 %v1608_v44 }
 0x20e   : > { %v1801_v16 = vor.u32 %v1800_v49, %v1799_v40  ;;  %v2095_v24 = vadd.s32 %v2094_v12, %v2090_v17  ;;  %v1724_v6 = vsel %vm1717_vm9, %v1720_v19, %v6292_v1  ;;  %v3411_v31 = vsel %vm3404_vm11, %v3407_v27, %v3410_v3 }
 0x20f   : > { %v1905_v32 = vsub.s32 4294967266, %v6353_v28  ;;  %v1946_v52 = vand.u32 31, %v1944_v5  ;;  %v6375_v8 = vsel %vm1509_vm12, nan, %v6284_v4  ;;  %v1806_v56 = vand.u32 2147483647, %v1805_v15 }
 0x210   : > { %8164 = vst [vmem:[#allocation6_spill] sm:$0xff] %v6375_v8  ;;  %v1815_v23 = vsel %vm6317_vm13, 0, %v1813_v54  ;;  %v2096_v37 = vadd.s32 536870912, %v2095_v24  ;;  %v6383_v26 = vsel %vm1509_vm12, nan, %v3203_v13  ;;  %v6386_v10 = vand.u32 3, %v6296_v22 }
 0x211   : > { %8165 = vst [vmem:[#allocation26_spill] sm:$0xff] %v6383_v26  ;;  %v6388_v1 = vand.u32 3, %v3298_v61  ;;  %v6390_v9 = vsub.s32 32, %v1946_v52  ;;  %v6394_v4 = vsel %vm1715_vm15, nan, %v1724_v6  ;;  %v6398_v33 = vsel %vm1715_vm15, nan, %v3411_v31 }
 0x212   : > { %8166 = vst [vmem:[#allocation27_spill] sm:$0xff] %v6394_v4  ;;  %8167 = vst [vmem:[#allocation28_spill] sm:$0xff] %v6398_v33  ;;  %v1808_v42 = vcvt.s32.f32 %v1801_v16  ;;  %v6400_v47 = vshrl.u32 %v2096_v37, 30  ;;  %4856 = vsinq.f32 %v1608_v44  ;;  %v6402_v35 = vand.u32 3, %v1815_v23 }
 0x213   : > { %v1906_v22 = vadd.s32 127, %v1905_v32  ;;  %v8087_v41 = vand.u32 2147483647, %v6246_v62  ;;  %v1901_v63 = vsub.s32 32, %v6353_v28  ;;  %v1959_v19 = vshrl.u32 %v8122_v51, %v6390_v9 }
 0x214   : > { %v1809_v45 = vmul.f32 %v1808_v42, %v1806_v56  ;;  %v2098_v29 = vshll.u32 %v6400_v47, 30  ;;  %v1953_v53 = vshrl.u32 %v8139_v38, %v6390_v9  ;;  %v1956_v27 = vshrl.u32 %v8121_v18, %v6390_v9 }
 0x215   : > { %v1958_v36 = vshll.u32 %v8121_v18, %v1946_v52  ;;  %v1962_v3 = vshrl.u32 %v8123_v46, %v6390_v9  ;;  %v6418_v44 = vshrl.u32 %v1944_v5, 5  ;;  %v1950_v40 = vshrl.u32 %v8138_v2, %v6390_v9 }
 0x216   : > { %v6416_v49 = vsub.s32 %v2095_v24, %v2098_v29  ;;  %v1961_v57 = vshll.u32 %v8122_v51, %v1946_v52  ;;  %v1907_v15 = vshll.u32 %v1906_v22, 23  ;;  %v1952_v17 = vshll.u32 %v8138_v2, %v1946_v52 }
 0x217   : > { %v1955_v61 = vshll.u32 %v8139_v38, %v1946_v52  ;;  %v1960_v54 = vor.u32 %v1959_v19, %v1958_v36  ;;  %v6425_v12 = vpop.eup %4854  ;;  %v1885_v13 = vadd.s32 %v6113_v34, %v6132_v25  ;;  %v1949_v5 = vshll.u32 %v8128_v48, %v1946_v52 }
 0x218   : > { %v2101_v16 = vsub.s32 0, %v6416_v49  ;;  %v1963_v24 = vor.u32 %v1962_v3, %v1961_v57  ;;  %v1810_v6 = vxor.u32 2147483648, %v1809_v45  ;;  %v1939_v31 = vand.u32 8388607, %v8087_v41 }
 0x219   : > { %v1954_v32 = vor.u32 %v1953_v53, %v1952_v17  ;;  %v1957_v56 = vor.u32 %v1956_v27, %v1955_v61  ;;  %v1903_v37 = vshrl.u32 %v1885_v13, %v1901_v63  ;;  %v1951_v22 = vor.u32 %v1950_v40, %v1949_v5  ;;  %v6444_v27 = vpop.f32.mrb[8].mxu1  ;;  %v8168_v61 = vld [vmem:[#allocation7_spill] sm:$0xff] }
 0x21a   : > { %v4623_v42 = vmin.u32 %v2101_v16, %v6416_v49  ;;  %vm1967_vm14 = vcmp.lt.s32.totalorder %v6418_v44, 4  ;;  %v1619_v29 = vxor.u32 2147483648, %v6425_v12  ;;  %v3506_v34 = vadd.s32 3, %v1815_v23 }
 0x21b   : > { %v1908_v25 = vor.u32 4788187, %v1907_v15  ;;  %v1973_v52 = vsel %vm1967_vm14, %v1960_v54, 920167782  ;;  %vm1618_vm1 = vcmp.eq.s32.totalorder %v6386_v10, 2  ;;  %v1902_v19 = vshll.u32 %v6227_v39, %v6353_v28 }
 0x21c   : > { %v2103_v53 = vclz %v4623_v42  ;;  %vm1964_vm2 = vcmp.lt.s32.totalorder %v6418_v44, 1  ;;  %v1977_v63 = vsel %vm1967_vm14, %v1963_v24, 1326507024  ;;  %v4857_v36 = vpop.eup %4856  ;;  %v1811_v23 = vsel %vm1728_vm6, %v1810_v6, %v1809_v45 }
 0x21d   : > { %vm1831_vm4 = vcmp.lt.s32.totalorder %v5905_v7, 0  ;;  %v1940_v3 = vor.u32 8388608, %v1939_v31  ;;  %vm1966_vm5 = vcmp.lt.s32.totalorder %v6418_v44, 3  ;;  %v1976_v39 = vsel %vm1964_vm2, %v1954_v32, %v1957_v56 }
 0x21e   : > { %vm1615_vm7 = vcmp.eq.s32.totalorder %v6386_v10, 0  ;;  %v1904_v28 = vor.u32 %v1903_v37, %v1902_v19  ;;  %v4624_v40 = vadd.s32 4294967294, %v2103_v53  ;;  %v1972_v57 = vsel %vm1964_vm2, %v1951_v22, %v1954_v32 }
 0x21f   : > { %v1974_v15 = vsel %vm1966_vm5, %v1957_v56, %v1973_v52  ;;  %v1909_v17 = vand.u32 2147483647, %v1908_v25  ;;  %vm1965_vm6 = vcmp.lt.s32.totalorder %v6418_v44, 2  ;;  %v1978_v45 = vsel %vm1966_vm5, %v1960_v54, %v1977_v63 }
 0x220   : > { %v6461_v13 = vmul.f32 30.0, %v8168_v61  ;;  %vm3301_vm8 = vcmp.eq.s32.totalorder %v6388_v1, 0  ;;  %vm3304_vm9 = vcmp.eq.s32.totalorder %v6388_v1, 2  ;;  %v8169_v16 = vand.u32 2147483647, %v5905_v7 }
 0x221   : > { %vm4625_vm12 = vcmp.lt.s32.totalorder %v4624_v40, 0  ;;  %v1948_v24 = vshrl.u32 %v8128_v48, %v6390_v9  ;;  %v1969_v54 = vsel %vm1967_vm14, %v1957_v56, 2102212464  ;;  %v1979_v6 = vsel %vm1965_vm6, %v1976_v39, %v1978_v45 }
 0x222   : > { %vm6467_vm11 = vcmp.le.f32.partialorder %v8169_v16, 0.7853982  ;;  %v1616_v31 = vxor.u32 2147483648, %v4857_v36  ;;  %v2106_v37 = vsel %vm4625_vm12, 0, %v4624_v40  ;;  %v1975_v42 = vsel %vm1965_vm6, %v1972_v57, %v1974_v15  ;;  %v6493_v57 = vpop.f32.mrb[9].mxu1 }
 0x223   : > { %v1980_v25 = vshll.u32 %v1940_v3, 8  ;;  %vm1614_vm15 = vcmp.lt.s32.totalorder %v6386_v10, 2  ;;  %v1814_v52 = vsel %vm6317_vm13, %v5813_v11, %v1811_v23  ;;  %v1911_v19 = vcvt.s32.f32 %v1904_v28  ;;  %v6491_v3 = vpop.f32.mrb[9].mxu0 }
 0x224   : > { %v1915_v9 = vsub.s32 4, %v6208_v55  ;;  %v1968_v56 = vsel %vm1964_vm2, %v1948_v24, %v1951_v22  ;;  %v2111_v53 = vsub.s32 4294967266, %v2106_v37  ;;  %v1970_v63 = vsel %vm1966_vm5, %v1954_v32, %v1969_v54  ;;  %v6543_v10 = vpop.f32.mrb[10].mxu0 }
 0x225   : > { %v6488_v39 = vmul.u32.u64.low %v1980_v25, %v1979_v6  ;;  %v6489_v40 = vmul.u32.u64.high %v1980_v25, %v1979_v6, %v6488_v39  ;;  %vm3300_vm3 = vcmp.lt.s32.totalorder %v6388_v1, 2  ;;  %v1912_v58 = vmul.f32 %v1911_v19, %v1909_v17 }
 0x226   : > { %v6496_v23 = vmul.u32.u64.low %v1980_v25, %v1975_v42  ;;  %v6497_v28 = vmul.u32.u64.high %v1980_v25, %v1975_v42, %v6496_v23  ;;  %v2141_v22 = vand.u32 2139095040, %v6461_v13  ;;  %vm1612_vm13 = vweird.f32 %v5639_v21 }
 0x227   : > { %v1620_v32 = vsel %vm1618_vm1, %v1619_v29, %v4857_v36  ;;  %4858 = vcosq.f32 %v1814_v52  ;;  %v6506_v15 = vand.u32 3, %v3506_v34  ;;  %v2112_v45 = vadd.s32 127, %v2111_v53  ;;  %v8172_v34 = vld [vmem:[#allocation13_spill] sm:$0xff] }
 0x228   : > { %v1916_v17 = vsel %vm1831_vm4, %v1915_v9, %v6208_v55  ;;  %v2107_v16 = vsub.s32 32, %v2106_v37  ;;  %v1971_v24 = vsel %vm1965_vm6, %v1968_v56, %v1970_v63  ;;  %v2142_v54 = vshrl.u32 %v2141_v22, 23 }
 0x229   : > { %v1617_v6 = vsel %vm1615_vm7, %v6425_v12, %v1616_v31  ;;  %v2091_v42 = vadd.s32 %v6324_v14, %v6331_v30  ;;  %vm1989_vm10 = vc.u32 %v6489_v40, %v6496_v23  ;;  %v6521_v19 = vmul.f32 30.0, %v8172_v34 }
 0x22a   : > { %v1913_v53 = vxor.u32 2147483648, %v1912_v58  ;;  %v2113_v55 = vshll.u32 %v2112_v45, 23  ;;  %v1990_v9 = vadd.s32 1, %v6497_v28  ;;  %v4626_v44 = vadd.s32 4294967169, %v2142_v54 }
 0x22b   : > { %v3303_v56 = vsel %vm3301_vm8, %v6425_v12, %v1616_v31  ;;  %v3306_v14 = vsel %vm3304_vm9, %v1619_v29, %v4857_v36  ;;  %v1918_v30 = vsel %vm6467_vm11, 0, %v1916_v17  ;;  %v1987_v63 = vmul.u32 %v1980_v25, %v1971_v24 }
 0x22c   : > { %4860 = vsinq.f32 %v1814_v52  ;;  %v2109_v39 = vshrl.u32 %v2091_v42, %v2107_v16  ;;  %v1991_v22 = vsel %vm1989_vm10, %v1990_v9, %v6497_v28  ;;  %v2148_v45 = vadd.s32 1, %v4626_v44  ;;  %v6564_v9 = vpop.f32.mrb[11].mxu0 }
 0x22d   : > { %v1621_v54 = vsel %vm1614_vm15, %v1617_v6, %v1620_v32  ;;  %v1992_v41 = vadd.s32 %v1991_v22, %v1987_v63  ;;  %v8088_v31 = vand.u32 2147483647, %v6461_v13  ;;  %v2244_v12 = vand.u32 2139095040, %v6521_v19  ;;  %v6545_v32 = vpop.f32.mrb[10].mxu1  ;;  %8175 = vst [vmem:[#allocation29_spill] sm:$0xff] %v6564_v9 }
 0x22e   : > { %v1914_v29 = vsel %vm1831_vm4, %v1913_v53, %v1912_v58  ;;  %v2108_v36 = vshll.u32 %v6416_v49, %v2106_v37  ;;  %v2114_v17 = vor.u32 4788187, %v2113_v55  ;;  %vm2149_vm0 = vcmp.gt.s32.totalorder %v2148_v45, 0  ;;  %v6566_v44 = vpop.f32.mrb[11].mxu1 }
 0x22f   : > { %v3307_v25 = vsel %vm3300_vm3, %v3303_v56, %v3306_v14  ;;  %v3610_v52 = vadd.s32 3, %v1918_v30  ;;  %v1993_v28 = vadd.s32 536870912, %v1992_v41  ;;  %v2150_v16 = vsel %vm2149_vm0, %v2148_v45, 0  ;;  %8176 = vst [vmem:[#allocation30_spill] sm:$0xff] %v6566_v44 }
 0x230   : > { %v6549_v24 = vsel %vm1612_vm13, nan, %v1621_v54  ;;  %v2110_v6 = vor.u32 %v2109_v39, %v2108_v36  ;;  %v6553_v49 = vmul.f32 %v8158_v50, %v8158_v50  ;;  %v2152_v37 = vand.u32 31, %v2150_v16  ;;  %v8180_v54 = vld [vmem:[#allocation14_spill] sm:$0xff] }
 0x231   : > { %8173 = vst [vmem:[#allocation7_spill] sm:$0xff] %v6549_v24  ;;  %v6555_v58 = vpop.eup %4858  ;;  %v1917_v1 = vsel %vm6467_vm11, %v5905_v7, %v1914_v29  ;;  %v6560_v42 = vshrl.u32 %v1993_v28, 30  ;;  %v2145_v53 = vand.u32 8388607, %v8088_v31  ;;  %v2245_v55 = vshrl.u32 %v2244_v12, 23 }
 0x232   : > { %8174 = vst [vmem:[#allocation13_spill] sm:$0xff] %v6553_v49  ;;  %v6570_v50 = vsel %vm1612_vm13, nan, %v3307_v25  ;;  %v6572_v56 = vand.u32 3, %v1918_v30  ;;  %v2115_v14 = vand.u32 2147483647, %v2114_v17  ;;  %v6574_v63 = vsub.s32 32, %v2152_v37 }
 0x233   : > { %8177 = vst [vmem:[#allocation31_spill] sm:$0xff] %v6570_v50  ;;  %v6576_v5 = vand.u32 3, %v3610_v52  ;;  %v1995_v39 = vshll.u32 %v6560_v42, 30  ;;  %v6581_v22 = vmul.f32 %v8168_v61, %v8168_v61  ;;  %v6585_v45 = vmul.f32 %v8172_v34, %v8172_v34  ;;  %v6597_v25 = vpop.f32.mrb[12].mxu0  ;;  %v6599_v34 = vpop.f32.mrb[12].mxu1 }
 0x234   : > { %vm1824_vm14 = vcmp.eq.s32.totalorder %v6402_v35, 2  ;;  %4862 = vcosq.f32 %v1917_v1  ;;  %v2117_v30 = vcvt.s32.f32 %v2110_v6  ;;  %v6591_v12 = vmul.f32 %v8180_v54, %v8180_v54  ;;  %8182 = vst [vmem:[#allocation34_spill] sm:$0xff] %v6597_v25  ;;  %8183 = vst [vmem:[#allocation35_spill] sm:$0xff] %v6599_v34  ;;  %v6623_v24 = vpop.f32.mrb[13].mxu0  ;;  %v6625_v33 = vpop.f32.mrb[13].mxu1 }
 0x235   : > { %8178 = vst [vmem:[#allocation32_spill] sm:$0xff] %v6581_v22  ;;  %8179 = vst [vmem:[#allocation33_spill] sm:$0xff] %v6585_v45  ;;  %v6593_v29 = vsub.s32 %v1992_v41, %v1995_v39  ;;  %v2146_v36 = vor.u32 8388608, %v2145_v53  ;;  %v2156_v61 = vshrl.u32 %v8138_v2, %v6574_v63  ;;  %v4630_v17 = vadd.s32 4294967169, %v2245_v55 }
 0x236   : > { %8181 = vst [vmem:[#allocation14_spill] sm:$0xff] %v6591_v12  ;;  %v6601_v52 = vpop.eup %4860  ;;  %v6603_v28 = vmul.f32 %v2117_v30, %v2115_v14  ;;  %v6605_v6 = vshrl.u32 %v2150_v16, 5  ;;  %v2159_v31 = vshrl.u32 %v8139_v38, %v6574_v63  ;;  %v2162_v41 = vshrl.u32 %v8121_v18, %v6574_v63  ;;  %8184 = vst [vmem:[#allocation36_spill] sm:$0xff] %v6623_v24 }
 0x237   : > { %v1998_v53 = vsub.s32 0, %v6593_v29  ;;  %v2155_v55 = vshll.u32 %v8128_v48, %v2152_v37  ;;  %v2158_v39 = vshll.u32 %v8138_v2, %v2152_v37  ;;  %v2161_v21 = vshll.u32 %v8139_v38, %v2152_v37  ;;  %8185 = vst [vmem:[#allocation37_spill] sm:$0xff] %v6625_v33 }
 0x238   : > { %vm1821_vm1 = vcmp.eq.s32.totalorder %v6402_v35, 0  ;;  %vm2037_vm2 = vcmp.lt.s32.totalorder %v6126_v0, 0  ;;  %v2164_v16 = vshll.u32 %v8121_v18, %v2152_v37  ;;  %v2165_v14 = vshrl.u32 %v8122_v51, %v6574_v63 }
 0x239   : > { %v2167_v30 = vshll.u32 %v8122_v51, %v2152_v37  ;;  %v2168_v50 = vshrl.u32 %v8123_v46, %v6574_v63  ;;  %v1822_v4 = vxor.u32 2147483648, %v6601_v52  ;;  %4864 = vsinq.f32 %v1917_v1 }
 0x23a   : > { %v4619_v26 = vmin.u32 %v1998_v53, %v6593_v29  ;;  %v2157_v8 = vor.u32 %v2156_v61, %v2155_v55  ;;  %vm3512_vm4 = vcmp.eq.s32.totalorder %v6506_v15, 2  ;;  %v2160_v12 = vor.u32 %v2159_v31, %v2158_v39  ;;  %v6653_v53 = vpop.f32.mrb[14].mxu0  ;;  %v6655_v55 = vpop.f32.mrb[14].mxu1 }
 0x23b   : > { %v2163_v45 = vor.u32 %v2162_v41, %v2161_v21  ;;  %v2166_v22 = vor.u32 %v2165_v14, %v2164_v16  ;;  %v2169_v49 = vor.u32 %v2168_v50, %v2167_v30  ;;  %vm3509_vm5 = vcmp.eq.s32.totalorder %v6506_v15, 0  ;;  %8190 = vst [vmem:[#allocation38_spill] sm:$0xff] %v6653_v53  ;;  %8191 = vst [vmem:[#allocation39_spill] sm:$0xff] %v6655_v55  ;;  %v6667_v30 = vpop.f32.mrb[15].mxu0 }
 0x23c   : > { %v2121_v37 = vsub.s32 4, %v6400_v47  ;;  %v2000_v34 = vclz %v4619_v26  ;;  %v6632_v24 = vshll.u32 %v2146_v36, 8  ;;  %vm1820_vm7 = vcmp.lt.s32.totalorder %v6402_v35, 2  ;;  %8192 = vst [vmem:[#allocation40_spill] sm:$0xff] %v6667_v30 }
 0x23d   : > { %v8186_v1 = vand.u32 2147483647, %v6126_v0  ;;  %v2119_v31 = vxor.u32 2147483648, %v6603_v28  ;;  %vm2170_vm8 = vcmp.lt.s32.totalorder %v6605_v6, 1  ;;  %vm2173_vm9 = vcmp.lt.s32.totalorder %v6605_v6, 4 }
 0x23e   : > { %v2251_v50 = vadd.s32 1, %v4630_v17  ;;  %v8189_v26 = vxor.u32 2147483648, %v6555_v58  ;;  %v4620_v36 = vadd.s32 4294967294, %v2000_v34  ;;  %vm2172_vm11 = vcmp.lt.s32.totalorder %v6605_v6, 3  ;;  %v6657_v39 = vpop.eup %4862 }
 0x23f   : > { %vm6638_vm6 = vcmp.le.f32.partialorder %v8186_v1, 0.7853982  ;;  %v2179_v41 = vsel %vm2173_vm9, %v2166_v22, 920167782  ;;  %v2178_v17 = vsel %vm2170_vm8, %v2157_v8, %v2160_v12  ;;  %v2182_v34 = vsel %vm2170_vm8, %v2160_v12, %v2163_v45  ;;  %v6669_v1 = vpop.f32.mrb[15].mxu1 }
 0x240   : > { %v1826_v21 = vsel %vm1824_vm14, %v8189_v26, %v6601_v52  ;;  %v2180_v16 = vsel %vm2172_vm11, %v2163_v45, %v2179_v41  ;;  %v2183_v14 = vsel %vm2173_vm9, %v2169_v49, 1326507024  ;;  %8193 = vst [vmem:[#allocation41_spill] sm:$0xff] %v6669_v1  ;;  %vm4621_vm12 = vcmp.lt.s32.totalorder %v4620_v36, 0  ;;  %v6701_v53 = vpop.f32.mrb[16].mxu1 }
 0x241   : > { %vm2171_vm15 = vcmp.lt.s32.totalorder %v6605_v6, 2  ;;  %v2175_v26 = vsel %vm2173_vm9, %v2163_v45, 2102212464  ;;  %v2184_v33 = vsel %vm2172_vm11, %v2166_v22, %v2183_v14  ;;  %v6676_v41 = vsel %vm4621_vm12, 0, %v4620_v36  ;;  %v6699_v14 = vpop.f32.mrb[16].mxu0  ;;  %8195 = vst [vmem:[#allocation43_spill] sm:$0xff] %v6701_v53 }
 0x242   : > { %v2154_v55 = vshrl.u32 %v8128_v48, %v6574_v63  ;;  %v2185_v49 = vsel %vm2171_vm15, %v2182_v34, %v2184_v33  ;;  %vm2252_vm3 = vcmp.gt.s32.totalorder %v2251_v50, 0  ;;  %v1823_v1 = vsel %vm1821_vm1, %v6555_v58, %v1822_v4  ;;  %8194 = vst [vmem:[#allocation42_spill] sm:$0xff] %v6699_v14 }
 0x243   : > { %v2122_v45 = vsel %vm2037_vm2, %v2121_v37, %v6400_v47  ;;  %v2008_v30 = vsub.s32 4294967266, %v6676_v41  ;;  %v2181_v22 = vsel %vm2171_vm15, %v2178_v17, %v2180_v16  ;;  %v2176_v33 = vsel %vm2172_vm11, %v2160_v12, %v2175_v26  ;;  %v6703_v47 = vpop.eup %4864  ;;  %v6717_v26 = vpop.f32.mrb[17].mxu0 }
 0x244   : > { %v2174_v63 = vsel %vm2170_vm8, %v2154_v55, %v2157_v8  ;;  %v6696_v36 = vmul.u32.u64.low %v6632_v24, %v2185_v49  ;;  %v6697_v34 = vmul.u32.u64.high %v6632_v24, %v2185_v49, %v6696_v36  ;;  %v8196_v37 = vxor.u32 2147483648, %v6555_v58  ;;  %8199 = vst [vmem:[#allocation45_spill] sm:$0xff] %v6717_v26  ;;  %v6719_v49 = vpop.f32.mrb[17].mxu1  ;;  %v6748_v26 = vpop.f32.mrb[18].mxu0 }
 0x245   : > { %v8197_v8 = vand.u32 2147483647, %v6521_v19  ;;  %v2253_v55 = vsel %vm2252_vm3, %v2251_v50, 0  ;;  %v6715_v16 = vmul.f32 30.0, %v8180_v54  ;;  %8200 = vst [vmem:[#allocation46_spill] sm:$0xff] %v6719_v49  ;;  %v6724_v36 = vsel %vm3509_vm5, %v6555_v58, %v1822_v4  ;;  %8201 = vst [vmem:[#allocation47_spill] sm:$0xff] %v6748_v26 }
 0x246   : > { %v6710_v17 = vsel %vm3512_vm4, %v8196_v37, %v6601_v52  ;;  %v2120_v52 = vsel %vm2037_vm2, %v2119_v31, %v6603_v28  ;;  %v6736_v54 = vsel %vm1820_vm7, %v1823_v1, %v1826_v21  ;;  %v6740_v50 = vsel %vm6638_vm6, 0, %v2122_v45  ;;  %v6750_v35 = vpop.f32.mrb[18].mxu1  ;;  %v6760_v1 = vpop.f32.mrb[19].mxu0 }
 0x247   : > { %v2248_v12 = vand.u32 8388607, %v8197_v8  ;;  %8198 = vst [vmem:[#allocation44_spill] sm:$0xff] %v6715_v16  ;;  %v6730_v37 = vmul.u32.u64.low %v6632_v24, %v2181_v22  ;;  %v6731_v8 = vmul.u32.u64.high %v6632_v24, %v2181_v22, %v6730_v37  ;;  %v2009_v49 = vadd.s32 127, %v2008_v30  ;;  %8202 = vst [vmem:[#allocation48_spill] sm:$0xff] %v6750_v35 }
 0x248   : > { %v2177_v4 = vsel %vm2171_vm15, %v2174_v63, %v2176_v33  ;;  %v1988_v31 = vadd.s32 %v6496_v23, %v6489_v40  ;;  %v2255_v22 = vand.u32 31, %v2253_v55  ;;  %v6755_v21 = vsel %vm6638_vm6, %v6126_v0, %v2120_v52  ;;  %8203 = vst [vmem:[#allocation49_spill] sm:$0xff] %v6760_v1  ;;  %v6765_v33 = vpop.f32.mrb[19].mxu1 }
 0x249   : > { %vm2195_vm13 = vc.u32 %v6697_v34, %v6730_v37  ;;  %v2249_v6 = vor.u32 8388608, %v2248_v12  ;;  %v2450_v30 = vand.u32 2139095040, %v6715_v16  ;;  %v2004_v40 = vsub.s32 32, %v6676_v41  ;;  %8204 = vst [vmem:[#allocation50_spill] sm:$0xff] %v6765_v33  ;;  %v6777_v26 = vpop.f32.mrb[20].mxu1 }
 0x24a   : > { %v2193_v23 = vmul.u32 %v6632_v24, %v2177_v4  ;;  %v2196_v45 = vadd.s32 1, %v6731_v8  ;;  %v2256_v63 = vsub.s32 32, %v2255_v22  ;;  %v2010_v61 = vshll.u32 %v2009_v49, 23  ;;  %v6775_v4 = vpop.f32.mrb[20].mxu0  ;;  %8206 = vst [vmem:[#allocation52_spill] sm:$0xff] %v6777_v26 }
 0x24b   : > { %v6767_v52 = vshrl.u32 %v2253_v55, 5  ;;  %v2258_v58 = vshll.u32 %v8128_v48, %v2255_v22  ;;  %v2261_v12 = vshll.u32 %v8138_v2, %v2255_v22  ;;  %v2264_v24 = vshll.u32 %v8139_v38, %v2255_v22  ;;  %8205 = vst [vmem:[#allocation51_spill] sm:$0xff] %v6775_v4  ;;  %v6782_v14 = vpop.f32.mrb[21].mxu0 }
 0x24c   : > { %v2197_v28 = vsel %vm2195_vm13, %v2196_v45, %v6731_v8  ;;  %v2259_v1 = vshrl.u32 %v8138_v2, %v2256_v63  ;;  %v2262_v35 = vshrl.u32 %v8139_v38, %v2256_v63  ;;  %v2265_v55 = vshrl.u32 %v8121_v18, %v2256_v63  ;;  %v6784_v8 = vpop.f32.mrb[21].mxu1 }
 0x24d   : > { %v2198_v33 = vadd.s32 %v2197_v28, %v2193_v23  ;;  %v2267_v49 = vshll.u32 %v8121_v18, %v2255_v22  ;;  %v2268_v53 = vshrl.u32 %v8122_v51, %v2256_v63  ;;  %8207 = vst [vmem:[#allocation53_spill] sm:$0xff] %v6784_v8  ;;  %v2270_v43 = vshll.u32 %v8122_v51, %v2255_v22  ;;  %v6796_v22 = vpop.f32.mrb[22].mxu1 }
 0x24e   : > { %v2260_v45 = vor.u32 %v2259_v1, %v2258_v58  ;;  %v2263_v25 = vor.u32 %v2262_v35, %v2261_v12  ;;  %v2271_v44 = vshrl.u32 %v8123_v46, %v2256_v63  ;;  %v6788_v26 = vshll.u32 %v2249_v6, 8  ;;  %v6794_v35 = vpop.f32.mrb[22].mxu0  ;;  %v6806_v1 = vpop.f32.mrb[23].mxu1 }
 0x24f   : > { %v2199_v4 = vadd.s32 536870912, %v2198_v33  ;;  %v2269_v9 = vor.u32 %v2268_v53, %v2267_v49  ;;  %v2451_v28 = vshrl.u32 %v2450_v30, 23  ;;  %vm1818_vm10 = vweird.f32 %v5813_v11  ;;  %v6804_v30 = vpop.f32.mrb[23].mxu0  ;;  %8209 = vst [vmem:[#allocation55_spill] sm:$0xff] %v6806_v1  ;;  %v6830_v49 = vpop.f32.mrb[24].mxu1 }
 0x250   : > { %vm3508_vm0 = vcmp.lt.s32.totalorder %v6506_v15, 2  ;;  %4866 = vcosq.f32 %v6755_v21  ;;  %v2266_v8 = vor.u32 %v2265_v55, %v2264_v24  ;;  %v2272_v58 = vor.u32 %v2271_v44, %v2270_v43  ;;  %8208 = vst [vmem:[#allocation54_spill] sm:$0xff] %v6804_v30  ;;  %v6828_v55 = vpop.f32.mrb[24].mxu0  ;;  %8211 = vst [vmem:[#allocation57_spill] sm:$0xff] %v6830_v49 }
 0x251   : > { %v2005_v53 = vshll.u32 %v6593_v29, %v6676_v41  ;;  %v6800_v6 = vshrl.u32 %v2199_v4, 30  ;;  %vm2273_vm14 = vcmp.lt.s32.totalorder %v6767_v52, 1  ;;  %vm2276_vm1 = vcmp.lt.s32.totalorder %v6767_v52, 4  ;;  %8210 = vst [vmem:[#allocation56_spill] sm:$0xff] %v6828_v55  ;;  %v6845_v30 = vpop.f32.mrb[25].mxu0  ;;  %v6847_v55 = vpop.f32.mrb[25].mxu1 }
 0x252   : > { %vm1927_vm2 = vcmp.eq.s32.totalorder %v6572_v56, 2  ;;  %vm1934_vm4 = vcmp.lt.s32.totalorder %v6246_v62, 0  ;;  %v2006_v43 = vshrl.u32 %v1988_v31, %v2004_v40  ;;  %v2011_v44 = vor.u32 4788187, %v2010_v61  ;;  %8215 = vst [vmem:[#allocation58_spill] sm:$0xff] %v6847_v55 }
 0x253   : > { %v2281_v12 = vsel %vm2273_vm14, %v2260_v45, %v2263_v25  ;;  %v2282_v29 = vsel %vm2276_vm1, %v2269_v9, 920167782  ;;  %vm1924_vm5 = vcmp.eq.s32.totalorder %v6572_v56, 0  ;;  %vm3616_vm7 = vcmp.eq.s32.totalorder %v6576_v5, 2 }
 0x254   : > { %v2201_v41 = vshll.u32 %v6800_v6, 30  ;;  %vm2274_vm6 = vcmp.lt.s32.totalorder %v6767_v52, 2  ;;  %vm2275_vm8 = vcmp.lt.s32.totalorder %v6767_v52, 3  ;;  %v4638_v24 = vadd.s32 4294967169, %v2451_v28 }
 0x255   : > { %vm3613_vm9 = vcmp.eq.s32.totalorder %v6576_v5, 0  ;;  %v2278_v31 = vsel %vm2276_vm1, %v2266_v8, 2102212464  ;;  %v2283_v40 = vsel %vm2275_vm8, %v2266_v8, %v2282_v29  ;;  %v2285_v61 = vsel %vm2273_vm14, %v2263_v25, %v2266_v8 }
 0x256   : > { %v2286_v4 = vsel %vm2276_vm1, %v2272_v58, 1326507024  ;;  %v8212_v28 = vand.u32 2147483647, %v6246_v62  ;;  %v6838_v1 = vsub.s32 %v2198_v33, %v2201_v41  ;;  %v2257_v29 = vshrl.u32 %v8128_v48, %v2256_v63 }
 0x257   : > { %v2284_v8 = vsel %vm2274_vm6, %v2281_v12, %v2283_v40  ;;  %v2287_v58 = vsel %vm2275_vm8, %v2269_v9, %v2286_v4  ;;  %vm1923_vm12 = vcmp.lt.s32.totalorder %v6572_v56, 2  ;;  %vm3612_vm15 = vcmp.lt.s32.totalorder %v6576_v5, 2  ;;  %v6868_v4 = vpop.f32.mrb[26].mxu0 }
 0x258   : > { %vm6834_vm11 = vcmp.le.f32.partialorder %v8212_v28, 0.7853982  ;;  %v2007_v28 = vor.u32 %v2006_v43, %v2005_v53  ;;  %v2288_v49 = vsel %vm2274_vm6, %v2285_v61, %v2287_v58  ;;  %4868 = vsinq.f32 %v6755_v21  ;;  %8216 = vst [vmem:[#allocation59_spill] sm:$0xff] %v6868_v4 }
 0x259   : > { %v6853_v33 = vmul.u32.u64.low %v6788_v26, %v2284_v8  ;;  %v6854_v41 = vmul.u32.u64.high %v6788_v26, %v2284_v8, %v6853_v33  ;;  %v2204_v9 = vsub.s32 0, %v6838_v1  ;;  %v2277_v63 = vsel %vm2273_vm14, %v2257_v29, %v2260_v45  ;;  %v6870_v8 = vpop.f32.mrb[26].mxu1 }
 0x25a   : > { %v2279_v53 = vsel %vm2275_vm8, %v2263_v25, %v2278_v31  ;;  %v2012_v43 = vand.u32 2147483647, %v2011_v44  ;;  %v6865_v12 = vmul.u32.u64.low %v6788_v26, %v2288_v49  ;;  %v6866_v40 = vmul.u32.u64.high %v6788_v26, %v2288_v49, %v6865_v12  ;;  %8217 = vst [vmem:[#allocation60_spill] sm:$0xff] %v6870_v8  ;;  %v6886_v31 = vpop.f32.mrb[27].mxu1  ;;  %v6888_v49 = vpop.eup %4866 }
 0x25b   : > { %v2457_v61 = vadd.s32 1, %v4638_v24  ;;  %v6875_v21 = vsel %vm1818_vm10, nan, %v6736_v54  ;;  %v3515_v25 = vsel %vm3508_vm0, %v6724_v36, %v6710_v17  ;;  %vm1921_vm3 = vweird.f32 %v5905_v7  ;;  %v6884_v24 = vpop.f32.mrb[27].mxu0  ;;  %8220 = vst [vmem:[#allocation63_spill] sm:$0xff] %v6886_v31 }
 0x25c   : > { %8218 = vst [vmem:[#allocation61_spill] sm:$0xff] %v6875_v21  ;;  %v3818_v45 = vadd.s32 3, %v6740_v50  ;;  %v4627_v44 = vmin.u32 %v2204_v9, %v6838_v1  ;;  %8219 = vst [vmem:[#allocation62_spill] sm:$0xff] %v6884_v24  ;;  %v2014_v29 = vcvt.s32.f32 %v2007_v28  ;;  %v2280_v54 = vsel %vm2274_vm6, %v2277_v63, %v2279_v53  ;;  %v6918_v31 = vpop.f32.mrb[28].mxu0  ;;  %v6920_v24 = vpop.f32.mrb[28].mxu1 }
 0x25d   : > { %v2299_v58 = vadd.s32 1, %v6854_v41  ;;  %vm2458_vm13 = vcmp.gt.s32.totalorder %v2457_v61, 0  ;;  %v8221_v15 = vxor.u32 2147483648, %v6657_v39  ;;  %v6899_v36 = vand.u32 3, %v6740_v50  ;;  %8225 = vst [vmem:[#allocation64_spill] sm:$0xff] %v6918_v31  ;;  %8226 = vst [vmem:[#allocation65_spill] sm:$0xff] %v6920_v24 }
 0x25e   : > { %v8222_v9 = vsub.s32 4, %v6560_v42  ;;  %v2206_v52 = vclz %v4627_v44  ;;  %v8223_v63 = vxor.u32 2147483648, %v6703_v47  ;;  %v6916_v21 = vsel %vm2458_vm13, %v2457_v61, 0 }
 0x25f   : > { %v1929_v17 = vsel %vm1927_vm2, %v8221_v15, %v6703_v47  ;;  %v8224_v12 = vmov %v8221_v15  ;;  %v2015_v15 = vmul.f32 %v2014_v29, %v2012_v43  ;;  %vm2298_vm0 = vc.u32 %v6866_v40, %v6853_v33  ;;  %v6932_v43 = vpop.f32.mrb[29].mxu1 }
 0x260   : > { %v2019_v28 = vsel %vm1934_vm4, %v8222_v9, %v6560_v42  ;;  %v1926_v53 = vsel %vm1924_vm5, %v6657_v39, %v8223_v63  ;;  %v3618_v50 = vsel %vm3616_vm7, %v8224_v12, %v6703_v47  ;;  %v8227_v42 = vmov %v8223_v63  ;;  %v6930_v12 = vpop.f32.mrb[29].mxu0  ;;  %8229 = vst [vmem:[#allocation67_spill] sm:$0xff] %v6932_v43 }
 0x261   : > { %v3615_v44 = vsel %vm3613_vm9, %v6657_v39, %v8227_v42  ;;  %v4628_v9 = vadd.s32 4294967294, %v2206_v52  ;;  %v2296_v63 = vmul.u32 %v6788_v26, %v2280_v54  ;;  %8228 = vst [vmem:[#allocation66_spill] sm:$0xff] %v6930_v12  ;;  %v6936_v61 = vsel %vm1818_vm10, nan, %v3515_v25  ;;  %v6951_v42 = vpop.f32.mrb[30].mxu0 }
 0x262   : > { %8230 = vst [vmem:[#allocation68_spill] sm:$0xff] %v6936_v61  ;;  %v6938_v29 = vand.u32 3, %v3818_v45  ;;  %v2021_v47 = vsel %vm6834_vm11, 0, %v2019_v28  ;;  %v2300_v39 = vsel %vm2298_vm0, %v2299_v58, %v6854_v41  ;;  %v1930_v26 = vsel %vm1923_vm12, %v1926_v53, %v1929_v17  ;;  %8231 = vst [vmem:[#allocation69_spill] sm:$0xff] %v6951_v42  ;;  %v6953_v28 = vpop.f32.mrb[30].mxu1  ;;  %v6955_v41 = vpop.eup %4868 }
 0x263   : > { %vm4629_vm14 = vcmp.lt.s32.totalorder %v4628_v9, 0  ;;  %v2301_v54 = vadd.s32 %v2300_v39, %v2296_v63  ;;  %v6946_v52 = vand.u32 31, %v6916_v21  ;;  %v3619_v11 = vsel %vm3612_vm15, %v3615_v44, %v3618_v50  ;;  %8232 = vst [vmem:[#allocation70_spill] sm:$0xff] %v6953_v28  ;;  %v6960_v63 = vpop.f32.mrb[31].mxu0  ;;  %v6962_v5 = vpop.f32.mrb[31].mxu1 }
 0x264   : > { %vm2133_vm10 = vcmp.eq.s32.totalorder %v6899_v36, 2  ;;  %v2016_v25 = vxor.u32 2147483648, %v2015_v15  ;;  %v2209_v45 = vsel %vm4629_vm14, 0, %v4628_v9  ;;  %v2134_v56 = vxor.u32 2147483648, %v6888_v49  ;;  %8233 = vst [vmem:[#allocation71_spill] sm:$0xff] %v6960_v63  ;;  %8234 = vst [vmem:[#allocation72_spill] sm:$0xff] %v6962_v5 }
 0x265   : > { %v3714_v58 = vadd.s32 3, %v2021_v47  ;;  %v2194_v17 = vadd.s32 %v6730_v37, %v6697_v34  ;;  %v2210_v53 = vsub.s32 32, %v2209_v45  ;;  %v6966_v50 = vsel %vm1921_vm3, nan, %v1930_v26  ;;  %v6978_v5 = vpop.f32.mrb[32].mxu0  ;;  %v6980_v26 = vpop.f32.mrb[32].mxu1 }
 0x266   : > { %8235 = vst [vmem:[#allocation73_spill] sm:$0xff] %v6966_v50  ;;  %vm3824_vm1 = vcmp.eq.s32.totalorder %v6938_v29, 2  ;;  %v2214_v44 = vsub.s32 4294967266, %v2209_v45  ;;  %v2302_v9 = vadd.s32 536870912, %v2301_v54  ;;  %v6971_v39 = vsel %vm1921_vm3, nan, %v3619_v11  ;;  %8237 = vst [vmem:[#allocation75_spill] sm:$0xff] %v6978_v5 }
 0x267   : > { %8236 = vst [vmem:[#allocation74_spill] sm:$0xff] %v6971_v39  ;;  %vm2130_vm2 = vcmp.eq.s32.totalorder %v6899_v36, 0  ;;  %v2212_v34 = vshrl.u32 %v2194_v17, %v2210_v53  ;;  %v6976_v61 = vsub.s32 32, %v6946_v52  ;;  %8238 = vst [vmem:[#allocation76_spill] sm:$0xff] %v6980_v26  ;;  %vm3821_vm5 = vcmp.eq.s32.totalorder %v6938_v29, 0  ;;  %v6988_v17 = vpop.f32.mrb[33].mxu0 }
 0x268   : > { %v2017_v50 = vsel %vm1934_vm4, %v2016_v25, %v2015_v15  ;;  %v2211_v7 = vshll.u32 %v6838_v1, %v2209_v45  ;;  %v2215_v11 = vadd.s32 127, %v2214_v44  ;;  %v6986_v39 = vshrl.u32 %v2302_v9, 30  ;;  %8239 = vst [vmem:[#allocation77_spill] sm:$0xff] %v6988_v17  ;;  %v6990_v53 = vpop.f32.mrb[33].mxu1  ;;  %v7002_v15 = vpop.f32.mrb[34].mxu0 }
 0x269   : > { %8240 = vst [vmem:[#allocation78_spill] sm:$0xff] %v6990_v53  ;;  %v2131_v37 = vxor.u32 2147483648, %v6955_v41  ;;  %v6996_v26 = vsel %vm2133_vm10, %v2134_v56, %v6955_v41  ;;  %v6998_v5 = vand.u32 3, %v2021_v47  ;;  %v7000_v63 = vand.u32 3, %v3714_v58  ;;  %8241 = vst [vmem:[#allocation79_spill] sm:$0xff] %v7002_v15  ;;  %v7004_v1 = vpop.f32.mrb[34].mxu1 }
 0x26a   : > { %8242 = vst [vmem:[#allocation80_spill] sm:$0xff] %v7004_v1  ;;  %v7009_v25 = vsel %vm3824_vm1, %v2134_v56, %v6955_v41  ;;  %v2213_v45 = vor.u32 %v2212_v34, %v2211_v7  ;;  %v2216_v44 = vshll.u32 %v2215_v11, 23  ;;  %v2304_v9 = vshll.u32 %v6986_v39, 30  ;;  %v7012_v53 = vpop.f32.mrb[35].mxu0  ;;  %v7014_v17 = vpop.f32.mrb[35].mxu1 }
 0x26b   : > { %8243 = vst [vmem:[#allocation81_spill] sm:$0xff] %v7012_v53  ;;  %8244 = vst [vmem:[#allocation82_spill] sm:$0xff] %v7014_v17  ;;  %v2020_v47 = vsel %vm6834_vm11, %v6246_v62, %v2017_v50  ;;  %v8245_v58 = vand.u32 2147483647, %v6715_v16  ;;  %v2465_v41 = vshrl.u32 %v8138_v2, %v6976_v61  ;;  %v2468_v56 = vshrl.u32 %v8139_v38, %v6976_v61  ;;  %v7027_v34 = vpop.f32.mrb[36].mxu0  ;;  %v7029_v7 = vpop.f32.mrb[36].mxu1 }
 0x26c   : > { %8246 = vst [vmem:[#allocation83_spill] sm:$0xff] %v7027_v34  ;;  %8247 = vst [vmem:[#allocation84_spill] sm:$0xff] %v7029_v7  ;;  %v2217_v11 = vor.u32 4788187, %v2216_v44  ;;  %v7031_v17 = vsub.s32 %v2301_v54, %v2304_v9  ;;  %v7034_v23 = vshrl.u32 %v6916_v21, 5  ;;  %v2474_v50 = vshrl.u32 %v8122_v51, %v6976_v61  ;;  %v7040_v53 = vpop.f32.mrb[37].mxu1 }
 0x26d   : > { %v7021_v1 = vand.u32 8388607, %v8245_v58  ;;  %v7038_v58 = vpop.f32.mrb[37].mxu0  ;;  %8249 = vst [vmem:[#allocation86_spill] sm:$0xff] %v7040_v53  ;;  %v2464_v15 = vshll.u32 %v8128_v48, %v6946_v52  ;;  %v2467_v34 = vshll.u32 %v8138_v2, %v6946_v52  ;;  %v2471_v54 = vshrl.u32 %v8121_v18, %v6976_v61  ;;  %v7052_v9 = vpop.f32.mrb[38].mxu1 }
 0x26e   : > { %8248 = vst [vmem:[#allocation85_spill] sm:$0xff] %v7038_v58  ;;  %v2477_v21 = vshrl.u32 %v8123_v46, %v6976_v61  ;;  %v7050_v44 = vpop.f32.mrb[38].mxu0  ;;  %8251 = vst [vmem:[#allocation88_spill] sm:$0xff] %v7052_v9  ;;  %v2218_v7 = vand.u32 2147483647, %v2217_v11  ;;  %v2220_v58 = vcvt.s32.f32 %v2213_v45  ;;  %v2307_v53 = vsub.s32 0, %v7031_v17 }
 0x26f   : > { %8250 = vst [vmem:[#allocation87_spill] sm:$0xff] %v7050_v44  ;;  %v2473_v28 = vshll.u32 %v8121_v18, %v6946_v52  ;;  %v7057_v42 = vpop.f32.mrb[39].mxu0  ;;  %vm2140_vm4 = vcmp.lt.s32.totalorder %v6461_v13, 0  ;;  %v2466_v43 = vor.u32 %v2465_v41, %v2464_v15  ;;  %v2469_v12 = vor.u32 %v2468_v56, %v2467_v34  ;;  %v7064_v9 = vpop.f32.mrb[39].mxu1 }
 0x270   : > { %8252 = vst [vmem:[#allocation89_spill] sm:$0xff] %v7057_v42  ;;  %v2470_v24 = vshll.u32 %v8139_v38, %v6946_v52  ;;  %v2476_v44 = vshll.u32 %v8122_v51, %v6946_v52  ;;  %8253 = vst [vmem:[#allocation90_spill] sm:$0xff] %v7064_v9  ;;  %v7066_v45 = vpop.f32.mrb[40].mxu0  ;;  %v2132_v11 = vsel %vm2130_vm2, %v6888_v49, %v2131_v37  ;;  %4870 = vcosq.f32 %v2020_v47 }
 0x271   : > { %8254 = vst [vmem:[#allocation91_spill] sm:$0xff] %v7066_v45  ;;  %v2221_v31 = vmul.f32 %v2220_v58, %v2218_v7  ;;  %v4631_v42 = vmin.u32 %v2307_v53, %v7031_v17  ;;  %v2475_v8 = vor.u32 %v2474_v50, %v2473_v28  ;;  %v3823_v15 = vsel %vm3821_vm5, %v6888_v49, %v2131_v37 }
 0x272   : > { %v2472_v41 = vor.u32 %v2471_v54, %v2470_v24  ;;  %v2478_v56 = vor.u32 %v2477_v21, %v2476_v44  ;;  %4872 = vsinq.f32 %v2020_v47  ;;  %v8255_v52 = vand.u32 2147483647, %v6461_v13 }
 0x273   : > { %v2224_v45 = vsub.s32 4, %v6800_v6  ;;  %v2309_v7 = vclz %v4631_v42  ;;  %vm2479_vm6 = vcmp.lt.s32.totalorder %v7034_v23, 1  ;;  %vm2129_vm8 = vcmp.lt.s32.totalorder %v6899_v36, 2 }
 0x274   : > { %vm7077_vm7 = vcmp.le.f32.partialorder %v8255_v52, 0.7853982  ;;  %vm3820_vm9 = vcmp.lt.s32.totalorder %v6938_v29, 2  ;;  %v2455_v49 = vor.u32 8388608, %v7021_v1  ;;  %vm2480_vm11 = vcmp.lt.s32.totalorder %v7034_v23, 2 }
 0x275   : > { %vm2482_vm12 = vcmp.lt.s32.totalorder %v7034_v23, 4  ;;  %v2487_v24 = vsel %vm2479_vm6, %v2466_v43, %v2469_v12  ;;  %v2222_v28 = vxor.u32 2147483648, %v2221_v31  ;;  %v4632_v37 = vadd.s32 4294967294, %v2309_v7 }
 0x276   : > { %vm2481_vm15 = vcmp.lt.s32.totalorder %v7034_v23, 3  ;;  %v2488_v42 = vsel %vm2482_vm12, %v2475_v8, 920167782  ;;  %v2484_v53 = vsel %vm2482_vm12, %v2472_v41, 2102212464  ;;  %v2491_v50 = vsel %vm2479_vm6, %v2469_v12, %v2472_v41 }
 0x277   : > { %v2489_v47 = vsel %vm2481_vm15, %v2472_v41, %v2488_v42  ;;  %v2492_v1 = vsel %vm2482_vm12, %v2478_v56, 1326507024  ;;  %vm4633_vm3 = vcmp.lt.s32.totalorder %v4632_v37, 0  ;;  %v2463_v58 = vshrl.u32 %v8128_v48, %v6976_v61 }
 0x278   : > { %v2490_v54 = vsel %vm2480_vm11, %v2487_v24, %v2489_v47  ;;  %v2493_v21 = vsel %vm2481_vm15, %v2475_v8, %v2492_v1  ;;  %v7101_v44 = vsel %vm4633_vm3, 0, %v4632_v37  ;;  %v2495_v7 = vshll.u32 %v2455_v49, 8  ;;  %v7117_v24 = vpop.f32.mrb[40].mxu1 }
 0x279   : > { %v2494_v52 = vsel %vm2480_vm11, %v2491_v50, %v2493_v21  ;;  %v7106_v42 = vmul.f32 30.0, %v6052_v20  ;;  %v2223_v41 = vsel %vm2140_vm4, %v2222_v28, %v2221_v31  ;;  %v2225_v61 = vsel %vm2140_vm4, %v2224_v45, %v6800_v6  ;;  %8258 = vst [vmem:[#allocation92_spill] sm:$0xff] %v7117_v24  ;;  %v7126_v31 = vpop.f32.mrb[41].mxu0  ;;  %v7128_v28 = vpop.f32.mrb[41].mxu1 }
 0x27a   : > { %v2483_v56 = vsel %vm2479_vm6, %v2463_v58, %v2466_v43  ;;  %v2485_v8 = vsel %vm2481_vm15, %v2469_v12, %v2484_v53  ;;  %v7119_v37 = vmul.u32.u64.low %v2495_v7, %v2494_v52  ;;  %v7120_v49 = vmul.u32.u64.high %v2495_v7, %v2494_v52, %v7119_v37  ;;  %8259 = vst [vmem:[#allocation93_spill] sm:$0xff] %v7126_v31  ;;  %8260 = vst [vmem:[#allocation94_spill] sm:$0xff] %v7128_v28  ;;  %v4871_v12 = vpop.eup %4870 }
 0x27b   : > { %v7122_v47 = vmul.u32.u64.low %v2495_v7, %v2490_v54  ;;  %v7123_v50 = vmul.u32.u64.high %v2495_v7, %v2490_v54, %v7122_v47  ;;  %vm2027_vm13 = vcmp.eq.s32.totalorder %v6998_v5, 0  ;;  %vm2030_vm0 = vcmp.eq.s32.totalorder %v6998_v5, 2 }
 0x27c   : > { %vm2243_vm14 = vcmp.lt.s32.totalorder %v6521_v19, 0  ;;  %v2317_v6 = vsub.s32 4294967266, %v7101_v44  ;;  %vm3717_vm10 = vcmp.eq.s32.totalorder %v7000_v63, 0  ;;  %v2227_v43 = vsel %vm7077_vm7, 0, %v2225_v61  ;;  %v4873_v54 = vpop.eup %4872  ;;  %v7157_v61 = vpop.f32.mrb[42].mxu0 }
 0x27d   : > { %v8261_v45 = vand.u32 2147483647, %v6521_v19  ;;  %v2486_v1 = vsel %vm2480_vm11, %v2483_v56, %v2485_v8  ;;  %v2347_v58 = vand.u32 2139095040, %v7106_v42  ;;  %vm2127_vm2 = vweird.f32 %v6126_v0  ;;  %8264 = vst [vmem:[#allocation95_spill] sm:$0xff] %v7157_v61  ;;  %v7159_v56 = vpop.f32.mrb[42].mxu1 }
 0x27e   : > { %v2136_v21 = vsel %vm2129_vm8, %v2132_v11, %v6996_v26  ;;  %v3827_v52 = vsel %vm3820_vm9, %v3823_v15, %v7009_v25  ;;  %vm3720_vm5 = vcmp.eq.s32.totalorder %v7000_v63, 2  ;;  %v2226_v23 = vsel %vm7077_vm7, %v6461_v13, %v2223_v41  ;;  %8265 = vst [vmem:[#allocation96_spill] sm:$0xff] %v7159_v56  ;;  %v7166_v26 = vpop.f32.mrb[43].mxu0  ;;  %v7168_v25 = vpop.f32.mrb[43].mxu1 }
 0x27f   : > { %vm7139_vm1 = vcmp.le.f32.partialorder %v8261_v45, 0.7853982  ;;  %vm2026_vm4 = vcmp.lt.s32.totalorder %v6998_v5, 2  ;;  %v2327_v8 = vsub.s32 4, %v6986_v39  ;;  %vm2504_vm6 = vc.u32 %v7120_v49, %v7122_v47  ;;  %8266 = vst [vmem:[#allocation97_spill] sm:$0xff] %v7166_v26  ;;  %8267 = vst [vmem:[#allocation98_spill] sm:$0xff] %v7168_v25 }
 0x280   : > { %v2505_v36 = vadd.s32 1, %v7123_v50  ;;  %v2348_v29 = vshrl.u32 %v2347_v58, 23  ;;  %v2031_v11 = vxor.u32 2147483648, %v4871_v12  ;;  %v7170_v15 = vand.u32 3, %v2227_v43  ;;  %v7175_v31 = vpop.f32.mrb[44].mxu0 }
 0x281   : > { %v2318_v34 = vadd.s32 127, %v2317_v6  ;;  %v2502_v41 = vmul.u32 %v2495_v7, %v2486_v1  ;;  %v2028_v37 = vxor.u32 2147483648, %v4873_v54  ;;  %4874 = vcosq.f32 %v2226_v23  ;;  %8268 = vst [vmem:[#allocation99_spill] sm:$0xff] %v7175_v31  ;;  %v7183_v1 = vpop.f32.mrb[44].mxu1 }
 0x282   : > { %v2506_v45 = vsel %vm2504_vm6, %v2505_v36, %v7123_v50  ;;  %v4634_v56 = vadd.s32 4294967169, %v2348_v29  ;;  %4876 = vsinq.f32 %v2226_v23  ;;  %v2313_v61 = vsub.s32 32, %v7101_v44  ;;  %8269 = vst [vmem:[#allocation100_spill] sm:$0xff] %v7183_v1 }
 0x283   : > { %v2507_v28 = vadd.s32 %v2506_v45, %v2502_v41  ;;  %v8099_v58 = vand.u32 2147483647, %v7106_v42  ;;  %vm2024_vm7 = vweird.f32 %v6246_v62  ;;  %v3922_v25 = vadd.s32 3, %v2227_v43  ;;  %v7189_v45 = vpop.f32.mrb[45].mxu0  ;;  %v7191_v43 = vpop.f32.mrb[45].mxu1 }
 0x284   : > { %v2297_v6 = vadd.s32 %v6853_v33, %v6866_v40  ;;  %v2328_v7 = vsel %vm2243_vm14, %v2327_v8, %v6986_v39  ;;  %v2354_v50 = vadd.s32 1, %v4634_v56  ;;  %v2032_v23 = vsel %vm2030_vm0, %v2031_v11, %v4873_v54  ;;  %8270 = vst [vmem:[#allocation101_spill] sm:$0xff] %v7189_v45  ;;  %8271 = vst [vmem:[#allocation102_spill] sm:$0xff] %v7191_v43  ;;  %v7208_v43 = vpop.f32.mrb[46].mxu1 }
 0x285   : > { %v3722_v36 = vsel %vm3720_vm5, %v2031_v11, %v4873_v54  ;;  %v2319_v29 = vshll.u32 %v2318_v34, 23  ;;  %v2508_v41 = vadd.s32 536870912, %v2507_v28  ;;  %v2029_v33 = vsel %vm2027_vm13, %v4871_v12, %v2028_v37  ;;  %v7206_v34 = vpop.f32.mrb[46].mxu0  ;;  %8273 = vst [vmem:[#allocation104_spill] sm:$0xff] %v7208_v43 }
 0x286   : > { %v3719_v40 = vsel %vm3717_vm10, %v4871_v12, %v2028_v37  ;;  %vm2355_vm8 = vcmp.gt.s32.totalorder %v2354_v50, 0  ;;  %v7198_v39 = vmul.f32 30.0, %v6277_v59  ;;  %v2315_v56 = vshrl.u32 %v2297_v6, %v2313_v61  ;;  %8272 = vst [vmem:[#allocation103_spill] sm:$0xff] %v7206_v34  ;;  %v7219_v6 = vpop.f32.mrb[47].mxu0 }
 0x287   : > { %v2330_v54 = vsel %vm7139_vm1, 0, %v2328_v7  ;;  %v7202_v8 = vshrl.u32 %v2508_v41, 30  ;;  %v2351_v11 = vand.u32 8388607, %v8099_v58  ;;  %v7212_v12 = vsel %vm2127_vm2, nan, %v2136_v21  ;;  %8276 = vst [vmem:[#allocation107_spill] sm:$0xff] %v7219_v6 }
 0x288   : > { %8274 = vst [vmem:[#allocation105_spill] sm:$0xff] %v7212_v12  ;;  %v7216_v37 = vsel %vm2127_vm2, nan, %v3827_v52  ;;  %vm3716_vm9 = vcmp.lt.s32.totalorder %v7000_v63, 2  ;;  %v2356_v61 = vsel %vm2355_vm8, %v2354_v50, 0  ;;  %v7221_v7 = vpop.f32.mrb[47].mxu1  ;;  %v2033_v41 = vsel %vm2026_vm4, %v2029_v33, %v2032_v23 }
 0x289   : > { %8275 = vst [vmem:[#allocation106_spill] sm:$0xff] %v7216_v37  ;;  %8277 = vst [vmem:[#allocation108_spill] sm:$0xff] %v7221_v7  ;;  %v2314_v58 = vshll.u32 %v7031_v17, %v7101_v44  ;;  %v2320_v43 = vor.u32 4788187, %v2319_v29  ;;  %v2510_v21 = vshll.u32 %v7202_v8, 30  ;;  %v3723_v12 = vsel %vm3716_vm9, %v3719_v40, %v3722_v36 }
 0x28a   : > { %v4026_v0 = vadd.s32 3, %v2330_v54  ;;  %v2358_v52 = vand.u32 31, %v2356_v61  ;;  %v2553_v37 = vand.u32 2139095040, %v7198_v39  ;;  %vm2236_vm11 = vcmp.eq.s32.totalorder %v7170_v15, 2 }
 0x28b   : > { %v7230_v63 = vand.u32 3, %v3922_v25  ;;  %v2316_v50 = vor.u32 %v2315_v56, %v2314_v58  ;;  %v7232_v7 = vsub.s32 %v2507_v28, %v2510_v21  ;;  %v2352_v5 = vor.u32 8388608, %v2351_v11  ;;  %v7234_v23 = vpop.eup %4874 }
 0x28c   : > { %v7238_v17 = vmul.f32 %v6052_v20, %v6052_v20  ;;  %v2359_v44 = vsub.s32 32, %v2358_v52  ;;  %v7242_v36 = vmul.f32 %v6277_v59, %v6277_v59  ;;  %v8100_v29 = vand.u32 2147483647, %v7198_v39  ;;  %v7245_v33 = vpop.eup %4876 }
 0x28d   : > { %v7249_v28 = vsel %vm2024_vm7, nan, %v2033_v41  ;;  %v7253_v25 = vsel %vm2024_vm7, nan, %v3723_v12  ;;  %v2321_v58 = vand.u32 2147483647, %v2320_v43  ;;  %v2513_v20 = vsub.s32 0, %v7232_v7 }
 0x28e   : > { %8278 = vst [vmem:[#allocation109_spill] sm:$0xff] %v7249_v28  ;;  %8279 = vst [vmem:[#allocation110_spill] sm:$0xff] %v7253_v25  ;;  %v7256_v40 = vand.u32 3, %v2330_v54  ;;  %v7258_v56 = vand.u32 3, %v4026_v0  ;;  %v2554_v59 = vshrl.u32 %v2553_v37, 23  ;;  %v7262_v11 = vmul.f32 %v6379_v60, %v6379_v60 }
 0x28f   : > { %v2323_v21 = vcvt.s32.f32 %v2316_v50  ;;  %v2503_v41 = vadd.s32 %v7122_v47, %v7120_v49  ;;  %v4639_v62 = vmin.u32 %v2513_v20, %v7232_v7  ;;  %v7267_v12 = vshll.u32 %v2352_v5, 8 }
 0x290   : > { %v2368_v0 = vshrl.u32 %v8121_v18, %v2359_v44  ;;  %v7274_v37 = vand.u32 8388607, %v8100_v29  ;;  %v2362_v50 = vshrl.u32 %v8138_v2, %v2359_v44  ;;  %v2365_v49 = vshrl.u32 %v8139_v38, %v2359_v44 }
 0x291   : > { %v2324_v25 = vmul.f32 %v2323_v21, %v2321_v58  ;;  %v2515_v28 = vclz %v4639_v62  ;;  %v2367_v47 = vshll.u32 %v8139_v38, %v2358_v52  ;;  %v2370_v5 = vshll.u32 %v8121_v18, %v2358_v52 }
 0x292   : > { %v2371_v20 = vshrl.u32 %v8122_v51, %v2359_v44  ;;  %v4642_v43 = vadd.s32 4294967169, %v2554_v59  ;;  %v2357_v6 = vshrl.u32 %v2356_v61, 5  ;;  %v2361_v34 = vshll.u32 %v8128_v48, %v2358_v52 }
 0x293   : > { %v4640_v54 = vadd.s32 4294967294, %v2515_v28  ;;  %v2364_v29 = vshll.u32 %v8138_v2, %v2358_v52  ;;  %v8280_v58 = vxor.u32 2147483648, %v7234_v23  ;;  %v2369_v62 = vor.u32 %v2368_v0, %v2367_v47 }
 0x294   : > { %v2372_v45 = vor.u32 %v2371_v20, %v2370_v5  ;;  %v2374_v1 = vshrl.u32 %v8123_v46, %v2359_v44  ;;  %v2325_v31 = vxor.u32 2147483648, %v2324_v25  ;;  %v2363_v59 = vor.u32 %v2362_v50, %v2361_v34 }
 0x295   : > { %v7288_v21 = vsel %vm2236_vm11, %v8280_v58, %v7245_v33  ;;  %vm4641_vm12 = vcmp.lt.s32.totalorder %v4640_v54, 0  ;;  %v2366_v28 = vor.u32 %v2365_v49, %v2364_v29  ;;  %v2373_v26 = vshll.u32 %v8122_v51, %v2358_v52 }
 0x296   : > { %v2518_v61 = vsel %vm4641_vm12, 0, %v4640_v54  ;;  %v2558_v24 = vor.u32 8388608, %v7274_v37  ;;  %v2560_v9 = vadd.s32 1, %v4642_v43  ;;  %vm3928_vm15 = vcmp.eq.s32.totalorder %v7230_v63, 2 }
 0x297   : > { %v2519_v4 = vsub.s32 32, %v2518_v61  ;;  %v2523_v55 = vsub.s32 4294967266, %v2518_v61  ;;  %v2360_v58 = vshrl.u32 %v8128_v48, %v2359_v44  ;;  %vm2379_vm3 = vcmp.lt.s32.totalorder %v2357_v6, 4 }
 0x298   : > { %v2375_v0 = vor.u32 %v2374_v1, %v2373_v26  ;;  %vm2376_vm13 = vcmp.lt.s32.totalorder %v2357_v6, 1  ;;  %v2381_v47 = vsel %vm2379_vm3, %v2369_v62, 2102212464  ;;  %v2385_v34 = vsel %vm2379_vm3, %v2372_v45, 920167782 }
 0x299   : > { %v2521_v29 = vshrl.u32 %v2503_v41, %v2519_v4  ;;  %v2524_v54 = vadd.s32 127, %v2523_v55  ;;  %vm2378_vm0 = vcmp.lt.s32.totalorder %v2357_v6, 3  ;;  %v2384_v52 = vsel %vm2376_vm13, %v2363_v59, %v2366_v28 }
 0x29a   : > { %v2326_v43 = vsel %vm2243_vm14, %v2325_v31, %v2324_v25  ;;  %v2520_v37 = vshll.u32 %v7232_v7, %v2518_v61  ;;  %vm2377_vm10 = vcmp.lt.s32.totalorder %v2357_v6, 2  ;;  %v2386_v50 = vsel %vm2378_vm0, %v2369_v62, %v2385_v34 }
 0x29b   : > { %v2525_v44 = vshll.u32 %v2524_v54, 23  ;;  %v2380_v49 = vsel %vm2376_vm13, %v2360_v58, %v2363_v59  ;;  %v2382_v26 = vsel %vm2378_vm0, %v2366_v28, %v2381_v47  ;;  %v2388_v1 = vsel %vm2376_vm13, %v2366_v28, %v2369_v62 }
 0x29c   : > { %v2522_v5 = vor.u32 %v2521_v29, %v2520_v37  ;;  %v2387_v20 = vsel %vm2377_vm10, %v2384_v52, %v2386_v50  ;;  %v2389_v55 = vsel %vm2379_vm3, %v2375_v0, 1326507024  ;;  %vm2561_vm2 = vcmp.gt.s32.totalorder %v2560_v9, 0 }
 0x29d   : > { %v2329_v4 = vsel %vm7139_vm1, %v6521_v19, %v2326_v43  ;;  %vm2449_vm14 = vcmp.lt.s32.totalorder %v6715_v16, 0  ;;  %v2526_v31 = vor.u32 4788187, %v2525_v44  ;;  %v2390_v7 = vsel %vm2378_vm0, %v2372_v45, %v2389_v55 }
 0x29e   : > { %v2562_v25 = vsel %vm2561_vm2, %v2560_v9, 0  ;;  %v2383_v41 = vsel %vm2377_vm10, %v2380_v49, %v2382_v26  ;;  %v2391_v62 = vsel %vm2377_vm10, %v2388_v1, %v2390_v7  ;;  %v8281_v47 = vxor.u32 2147483648, %v7234_v23 }
 0x29f   : > { %v7312_v59 = vmul.u32.u64.low %v7267_v12, %v2387_v20  ;;  %v7313_v28 = vmul.u32.u64.high %v7267_v12, %v2387_v20, %v7312_v59  ;;  %v2527_v61 = vand.u32 2147483647, %v2526_v31  ;;  %v2564_v0 = vand.u32 31, %v2562_v25 }
 0x2a0   : > { %v7317_v58 = vmul.u32.u64.low %v7267_v12, %v2391_v62  ;;  %v7318_v53 = vmul.u32.u64.high %v7267_v12, %v2391_v62, %v7317_v58  ;;  %v7325_v9 = vsel %vm3928_vm15, %v8281_v47, %v7245_v33  ;;  %4878 = vcosq.f32 %v2329_v4 }
 0x2a1   : > { %v2529_v45 = vcvt.s32.f32 %v2522_v5  ;;  %v2533_v6 = vsub.s32 4, %v7202_v8  ;;  %4880 = vsinq.f32 %v2329_v4  ;;  %v2399_v34 = vmul.u32 %v7267_v12, %v2383_v41 }
 0x2a2   : > { %v2565_v29 = vsub.s32 32, %v2564_v0  ;;  %v7329_v54 = vshll.u32 %v2558_v24, 8  ;;  %v2402_v43 = vadd.s32 1, %v7313_v28  ;;  %v7332_v37 = vshrl.u32 %v2562_v25, 5 }
 0x2a3   : > { %v2530_v52 = vmul.f32 %v2529_v45, %v2527_v61  ;;  %v2567_v50 = vshll.u32 %v8128_v48, %v2564_v0  ;;  %vm2401_vm1 = vc.u32 %v7318_v53, %v7312_v59  ;;  %v2570_v44 = vshll.u32 %v8138_v2, %v2564_v0 }
 0x2a4   : > { %v2573_v49 = vshll.u32 %v8139_v38, %v2564_v0  ;;  %v2576_v26 = vshll.u32 %v8121_v18, %v2564_v0  ;;  %vm2233_vm5 = vcmp.eq.s32.totalorder %v7170_v15, 0  ;;  %v2403_v24 = vsel %vm2401_vm1, %v2402_v43, %v7313_v28  ;;  %v8285_v43 = vld [vmem:[#allocation8_spill] sm:$0xff] }
 0x2a5   : > { %v2568_v12 = vshrl.u32 %v8138_v2, %v2565_v29  ;;  %v2571_v1 = vshrl.u32 %v8139_v38, %v2565_v29  ;;  %v2574_v5 = vshrl.u32 %v8121_v18, %v2565_v29  ;;  %v2404_v20 = vadd.s32 %v2403_v24, %v2399_v34 }
 0x2a6   : > { %v2577_v55 = vshrl.u32 %v8122_v51, %v2565_v29  ;;  %v2579_v4 = vshll.u32 %v8122_v51, %v2564_v0  ;;  %v2580_v31 = vshrl.u32 %v8123_v46, %v2565_v29  ;;  %vm3925_vm4 = vcmp.eq.s32.totalorder %v7230_v63, 0 }
 0x2a7   : > { %v8282_v7 = vand.u32 2147483647, %v6715_v16  ;;  %v2534_v2 = vsel %vm2449_vm14, %v2533_v6, %v7202_v8  ;;  %v2569_v18 = vor.u32 %v2568_v12, %v2567_v50  ;;  %v2572_v38 = vor.u32 %v2571_v1, %v2570_v44 }
 0x2a8   : > { %v2575_v41 = vor.u32 %v2574_v5, %v2573_v49  ;;  %v2405_v62 = vadd.s32 536870912, %v2404_v20  ;;  %v2578_v28 = vor.u32 %v2577_v55, %v2576_v26  ;;  %v2581_v51 = vor.u32 %v2580_v31, %v2579_v4 }
 0x2a9   : > { %vm7351_vm6 = vcmp.le.f32.partialorder %v8282_v7, 0.7853982  ;;  %vm2582_vm7 = vcmp.lt.s32.totalorder %v7332_v37, 1  ;;  %vm2232_vm8 = vcmp.lt.s32.totalorder %v7170_v15, 2  ;;  %v2531_v46 = vxor.u32 2147483648, %v2530_v52 }
 0x2aa   : > { %vm2583_vm9 = vcmp.lt.s32.totalorder %v7332_v37, 2  ;;  %vm2585_vm11 = vcmp.lt.s32.totalorder %v7332_v37, 4  ;;  %v2590_v61 = vsel %vm2582_vm7, %v2569_v18, %v2572_v38  ;;  %vm3924_vm12 = vcmp.lt.s32.totalorder %v7230_v63, 2  ;;  %v7370_v47 = vpop.eup %4878 }
 0x2ab   : > { %v7365_v8 = vshrl.u32 %v2405_v62, 30  ;;  %vm2584_vm15 = vcmp.lt.s32.totalorder %v7332_v37, 3  ;;  %v2591_v58 = vsel %vm2585_vm11, %v2578_v28, 920167782  ;;  %v2594_v0 = vsel %vm2582_vm7, %v2572_v38, %v2575_v41  ;;  %v7379_v44 = vpop.eup %4880 }
 0x2ac   : > { %v2566_v45 = vshrl.u32 %v8128_v48, %v2565_v29  ;;  %v2592_v6 = vsel %vm2584_vm15, %v2575_v41, %v2591_v58  ;;  %v2595_v34 = vsel %vm2585_vm11, %v2581_v51, 1326507024  ;;  %v7377_v50 = vadd.f32 %v7262_v11, %v8285_v43  ;;  %v8288_v58 = vld [vmem:[#allocation9_spill] sm:$0xff] }
 0x2ad   : > { %v2407_v49 = vshll.u32 %v7365_v8, 30  ;;  %v2587_v26 = vsel %vm2585_vm11, %v2575_v41, 2102212464  ;;  %v2593_v24 = vsel %vm2583_vm9, %v2590_v61, %v2592_v6  ;;  %v2596_v12 = vsel %vm2584_vm15, %v2578_v28, %v2595_v34 }
 0x2ae   : > { %vm2230_vm3 = vweird.f32 %v6461_v13  ;;  %v2532_v48 = vsel %vm2449_vm14, %v2531_v46, %v2530_v52  ;;  %v2597_v11 = vsel %vm2583_vm9, %v2594_v0, %v2596_v12  ;;  %v8286_v5 = vxor.u32 2147483648, %v7245_v33 }
 0x2af   : > { %v7392_v29 = vmul.u32.u64.low %v7329_v54, %v2593_v24  ;;  %v7393_v1 = vmul.u32.u64.high %v7329_v54, %v2593_v24, %v7392_v29  ;;  %v7401_v4 = vsub.s32 %v2404_v20, %v2407_v49  ;;  %v2586_v52 = vsel %vm2582_vm7, %v2566_v45, %v2569_v18  ;;  %v8289_v45 = vld [vmem:[#allocation10_spill] sm:$0xff] }
 0x2b0   : > { %v2235_v55 = vsel %vm2233_vm5, %v7234_v23, %v8286_v5  ;;  %v7404_v31 = vmul.u32.u64.low %v7329_v54, %v2597_v11  ;;  %v7405_v7 = vmul.u32.u64.high %v7329_v54, %v2597_v11, %v7404_v31  ;;  %v2588_v41 = vsel %vm2584_vm15, %v2572_v38, %v2587_v26  ;;  %v8290_v26 = vld [vmem:[#allocation11_spill] sm:$0xff] }
 0x2b1   : > { %v751_v62 = vmul.f32 %v6444_v27, %v6444_v27  ;;  %v750_v28 = vmul.f32 %v6491_v3, %v6491_v3  ;;  %v8287_v51 = vmov %v8286_v5  ;;  %v2535_v46 = vsel %vm7351_vm6, %v6715_v16, %v2532_v48  ;;  %v8346_v31 = vld [vmem:[#allocation64_spill] sm:$0xff] }
 0x2b2   : > { %v3927_v20 = vsel %vm3925_vm4, %v7234_v23, %v8287_v51  ;;  %v2536_v18 = vsel %vm7351_vm6, 0, %v2534_v2  ;;  %v2410_v38 = vsub.s32 0, %v7401_v4  ;;  %v2608_v61 = vadd.s32 1, %v7393_v1 }
 0x2b3   : > { %v7428_v0 = vadd.f32 %v751_v62, %v8288_v58  ;;  %v7431_v33 = vadd.f32 %v750_v28, %v8289_v45  ;;  %v752_v23 = vmul.f32 %v6493_v57, %v6493_v57  ;;  %v2239_v6 = vsel %vm2232_vm8, %v2235_v55, %v7288_v21  ;;  %v8297_v45 = vld [vmem:[#allocation17_spill] sm:$0xff] }
 0x2b4   : > { %vm2339_vm13 = vcmp.eq.s32.totalorder %v7256_v40, 2  ;;  %v4635_v25 = vmin.u32 %v2410_v38, %v7401_v4  ;;  %v2589_v2 = vsel %vm2583_vm9, %v2586_v52, %v2588_v41  ;;  %v3931_v34 = vsel %vm3924_vm12, %v3927_v20, %v7325_v9 }
 0x2b5   : > { %vm2336_vm0 = vcmp.eq.s32.totalorder %v7256_v40, 0  ;;  %v2340_v43 = vxor.u32 2147483648, %v7370_v47  ;;  %v4234_v49 = vadd.s32 3, %v2536_v18  ;;  %vm2607_vm10 = vc.u32 %v7405_v7, %v7392_v29 }
 0x2b6   : > { %4882 = vcosq.f32 %v2535_v46  ;;  %v2412_v15 = vclz %v4635_v25  ;;  %v2609_v21 = vsel %vm2607_vm10, %v2608_v61, %v7393_v1  ;;  %v7451_v24 = vadd.f32 %v752_v23, %v8290_v26 }
 0x2b7   : > { %vm4029_vm2 = vcmp.eq.s32.totalorder %v7258_v56, 0  ;;  %vm4032_vm14 = vcmp.eq.s32.totalorder %v7258_v56, 2  ;;  %4884 = vsinq.f32 %v2535_v46  ;;  %v2605_v63 = vmul.u32 %v7329_v54, %v2589_v2 }
 0x2b8   : > { %v7458_v9 = vsel %vm2230_vm3, nan, %v2239_v6  ;;  %vm2335_vm1 = vcmp.lt.s32.totalorder %v7256_v40, 2  ;;  %vm2346_vm5 = vcmp.lt.s32.totalorder %v7106_v42, 0  ;;  %v4636_v37 = vadd.s32 4294967294, %v2412_v15  ;;  %v8298_v6 = vld [vmem:[#allocation29_spill] sm:$0xff] }
 0x2b9   : > { %8291 = vst [vmem:[#allocation8_spill] sm:$0xff] %v7458_v9  ;;  %v7463_v12 = vmul.f32 30.0, %v6379_v60  ;;  %v7467_v48 = vsel %vm2230_vm3, nan, %v3931_v34  ;;  %vm4028_vm4 = vcmp.lt.s32.totalorder %v7258_v56, 2  ;;  %v7470_v11 = vand.u32 3, %v2536_v18  ;;  %v8296_v18 = vld [vmem:[#allocation12_spill] sm:$0xff] }
 0x2ba   : > { %8292 = vst [vmem:[#allocation9_spill] sm:$0xff] %v7467_v48  ;;  %v7472_v54 = vand.u32 3, %v4234_v49  ;;  %v2610_v1 = vadd.s32 %v2609_v21, %v2605_v63  ;;  %v2337_v5 = vxor.u32 2147483648, %v7379_v44  ;;  %v2341_v55 = vsel %vm2339_vm13, %v2340_v43, %v7379_v44  ;;  %v8299_v34 = vld [vmem:[#allocation30_spill] sm:$0xff]  ;;  %v8305_v56 = vld [vmem:[#allocation23_spill] sm:$0xff] }
 0x2bb   : > { %v8293_v60 = vand.u32 2147483647, %v7106_v42  ;;  %vm4637_vm7 = vcmp.lt.s32.totalorder %v4636_v37, 0  ;;  %v753_v13 = vmul.f32 %v6543_v10, %v6543_v10  ;;  %v2430_v41 = vsub.s32 4, %v7365_v8  ;;  %v8300_v21 = vld [vmem:[#allocation18_spill] sm:$0xff] }
 0x2bc   : > { %v2415_v52 = vsel %vm4637_vm7, 0, %v4636_v37  ;;  %v2611_v62 = vadd.s32 536870912, %v2610_v1  ;;  %v755_v28 = vmul.f32 %v6545_v32, %v6545_v32  ;;  %vm2333_vm8 = vweird.f32 %v6521_v19  ;;  %v8314_v19 = vld [vmem:[#allocation38_spill] sm:$0xff] }
 0x2bd   : > { %vm7480_vm6 = vcmp.le.f32.partialorder %v8293_v60, 0.7853982  ;;  %v2400_v51 = vadd.s32 %v7312_v59, %v7318_v53  ;;  %v2416_v20 = vsub.s32 32, %v2415_v52  ;;  %v2420_v46 = vsub.s32 4294967266, %v2415_v52 }
 0x2be   : > { %v7493_v38 = vadd.f32 %v753_v13, %v8296_v18  ;;  %v4034_v61 = vsel %vm4032_vm14, %v2340_v43, %v7379_v44  ;;  %v7498_v58 = vshrl.u32 %v2611_v62, 30  ;;  %v7501_v23 = vadd.f32 %v755_v28, %v8297_v45  ;;  %v8301_v13 = vld [vmem:[#allocation21_spill] sm:$0xff]  ;;  %v8302_v28 = vld [vmem:[#allocation34_spill] sm:$0xff] }
 0x2bf   : > { %v754_v25 = vmul.f32 %v8298_v6, %v8298_v6  ;;  %v2338_v59 = vsel %vm2336_vm0, %v7370_v47, %v2337_v5  ;;  %v2418_v53 = vshrl.u32 %v2400_v51, %v2416_v20  ;;  %v2421_v2 = vadd.s32 127, %v2420_v46  ;;  %v8304_v18 = vld [vmem:[#allocation22_spill] sm:$0xff] }
 0x2c0   : > { %v756_v49 = vmul.f32 %v8299_v34, %v8299_v34  ;;  %v4031_v44 = vsel %vm4029_vm2, %v7370_v47, %v2337_v5  ;;  %vm2542_vm9 = vcmp.eq.s32.totalorder %v7470_v11, 0  ;;  %v2431_v43 = vsel %vm2346_vm5, %v2430_v41, %v7365_v8  ;;  %v4883_v63 = vpop.eup %4882  ;;  %v8303_v41 = vld [vmem:[#allocation35_spill] sm:$0xff] }
 0x2c1   : > { %v2613_v15 = vshll.u32 %v7498_v58, 30  ;;  %v7519_v26 = vadd.f32 %v754_v25, %v8300_v21  ;;  %v2417_v37 = vshll.u32 %v7401_v4, %v2415_v52  ;;  %v2422_v60 = vshll.u32 %v2421_v2, 23  ;;  %v4885_v5 = vpop.eup %4884 }
 0x2c2   : > { %v7523_v62 = vadd.f32 %v756_v49, %v8301_v13  ;;  %v757_v47 = vmul.f32 %v8302_v28, %v8302_v28  ;;  %v2342_v51 = vsel %vm2335_vm1, %v2338_v59, %v2341_v55  ;;  %vm2545_vm11 = vcmp.eq.s32.totalorder %v7470_v11, 2 }
 0x2c3   : > { %v7530_v8 = vsub.s32 %v2610_v1, %v2613_v15  ;;  %v759_v20 = vmul.f32 %v8303_v41, %v8303_v41  ;;  %v4035_v4 = vsel %vm4028_vm4, %v4031_v44, %v4034_v61  ;;  %vm4237_vm12 = vcmp.eq.s32.totalorder %v7472_v54, 0 }
 0x2c4   : > { %v2419_v52 = vor.u32 %v2418_v53, %v2417_v37  ;;  %v2423_v46 = vor.u32 4788187, %v2422_v60  ;;  %v7538_v45 = vadd.f32 %v757_v47, %v8304_v18  ;;  %vm2541_vm15 = vcmp.lt.s32.totalorder %v7470_v11, 2  ;;  %v8306_v53 = vld [vmem:[#allocation36_spill] sm:$0xff]  ;;  %v8310_v60 = vld [vmem:[#allocation13_spill] sm:$0xff]  ;;  %v8323_v11 = vld [vmem:[#allocation42_spill] sm:$0xff] }
 0x2c5   : > { %vm4240_vm3 = vcmp.eq.s32.totalorder %v7472_v54, 2  ;;  %v2433_v40 = vsel %vm7480_vm6, 0, %v2431_v43  ;;  %vm2552_vm13 = vcmp.lt.s32.totalorder %v7198_v39, 0  ;;  %v2616_v1 = vsub.s32 0, %v7530_v8  ;;  %v8311_v47 = vld [vmem:[#allocation37_spill] sm:$0xff] }
 0x2c6   : > { %v7547_v55 = vadd.f32 %v759_v20, %v8305_v56  ;;  %v2543_v61 = vxor.u32 2147483648, %v4885_v5  ;;  %v2546_v25 = vxor.u32 2147483648, %v4883_v63  ;;  %v2424_v59 = vand.u32 2147483647, %v2423_v46 }
 0x2c7   : > { %v758_v2 = vmul.f32 %v8306_v53, %v8306_v53  ;;  %v7553_v49 = vsel %vm2333_vm8, nan, %v2342_v51  ;;  %v7557_v44 = vsel %vm2333_vm8, nan, %v4035_v4  ;;  %v4643_v43 = vmin.u32 %v2616_v1, %v7530_v8 }
 0x2c8   : > { %8307 = vst [vmem:[#allocation10_spill] sm:$0xff] %v7553_v49  ;;  %8308 = vst [vmem:[#allocation11_spill] sm:$0xff] %v7557_v44  ;;  %v7561_v15 = vmul.f32 30.0, %v6444_v27  ;;  %v2426_v21 = vcvt.s32.f32 %v2419_v52  ;;  %v4130_v37 = vadd.s32 3, %v2433_v40  ;;  %v760_v20 = vmul.f32 %v8311_v47, %v8311_v47 }
 0x2c9   : > { %v774_v13 = vadd.f32 %v758_v2, %v8310_v60  ;;  %v7566_v46 = vand.u32 3, %v2433_v40  ;;  %v2618_v51 = vclz %v4643_v43  ;;  %v7569_v18 = vmul.f32 30.0, %v6491_v3  ;;  %v8315_v40 = vld [vmem:[#allocation32_spill] sm:$0xff]  ;;  %v8316_v43 = vld [vmem:[#allocation33_spill] sm:$0xff]  ;;  %v8317_v3 = vld [vmem:[#allocation39_spill] sm:$0xff] }
 0x2ca   : > { %8309 = vst [vmem:[#allocation12_spill] sm:$0xff] %v7561_v15  ;;  %v761_v4 = vmul.f32 %v8314_v19, %v8314_v19  ;;  %v2544_v27 = vsel %vm2542_vm9, %v4883_v63, %v2543_v61  ;;  %v2547_v52 = vsel %vm2545_vm11, %v2546_v25, %v4885_v5  ;;  %v7577_v1 = vmul.f32 %v2426_v21, %v2424_v59  ;;  %v8319_v59 = vld [vmem:[#allocation40_spill] sm:$0xff]  ;;  %v8333_v15 = vld [vmem:[#allocation50_spill] sm:$0xff] }
 0x2cb   : > { %8312 = vst [vmem:[#allocation17_spill] sm:$0xff] %v7566_v46  ;;  %8313 = vst [vmem:[#allocation29_spill] sm:$0xff] %v7569_v18  ;;  %v2636_v56 = vsub.s32 4, %v7498_v58  ;;  %v4644_v2 = vadd.s32 4294967294, %v2618_v51  ;;  %v776_v60 = vadd.f32 %v760_v20, %v8315_v40  ;;  %v763_v49 = vmul.f32 %v8317_v3, %v8317_v3  ;;  %v8320_v20 = vld [vmem:[#allocation14_spill] sm:$0xff]  ;;  %v8321_v40 = vld [vmem:[#allocation41_spill] sm:$0xff] }
 0x2cc   : > { %v777_v44 = vadd.f32 %v761_v4, %v8316_v43  ;;  %v4242_v48 = vsel %vm4240_vm3, %v2546_v25, %v4885_v5  ;;  %v7586_v9 = vand.u32 3, %v4130_v37  ;;  %v2606_v16 = vadd.s32 %v7392_v29, %v7405_v7 }
 0x2cd   : > { %v762_v21 = vmul.f32 %v8319_v59, %v8319_v59  ;;  %v4239_v51 = vsel %vm4237_vm12, %v4883_v63, %v2543_v61  ;;  %vm4645_vm0 = vcmp.lt.s32.totalorder %v4644_v2, 0  ;;  %v779_v4 = vadd.f32 %v763_v49, %v8320_v20 }
 0x2ce   : > { %8318 = vst [vmem:[#allocation30_spill] sm:$0xff] %v7586_v9  ;;  %v764_v43 = vmul.f32 %v8321_v40, %v8321_v40  ;;  %v7599_v5 = vsel %vm2541_vm15, %v2544_v27, %v2547_v52  ;;  %v2621_v25 = vsel %vm4645_vm0, 0, %v4644_v2  ;;  %v2637_v29 = vsel %vm2552_vm13, %v2636_v56, %v7498_v58  ;;  %v8324_v52 = vld [vmem:[#allocation43_spill] sm:$0xff]  ;;  %v8332_v40 = vld [vmem:[#allocation49_spill] sm:$0xff] }
 0x2cf   : > { %8322 = vst [vmem:[#allocation18_spill] sm:$0xff] %v7599_v5  ;;  %v778_v7 = vadd.f32 %v762_v21, %v7238_v17  ;;  %v2428_v37 = vxor.u32 2147483648, %v7577_v1  ;;  %v2622_v63 = vsub.s32 32, %v2621_v25  ;;  %v2623_v61 = vshll.u32 %v7530_v8, %v2621_v25  ;;  %v8325_v5 = vld [vmem:[#allocation45_spill] sm:$0xff]  ;;  %v8326_v21 = vld [vmem:[#allocation46_spill] sm:$0xff]  ;;  %v8327_v8 = vld [vmem:[#allocation47_spill] sm:$0xff] }
 0x2d0   : > { %v2626_v49 = vsub.s32 4294967266, %v2621_v25  ;;  %vm4236_vm10 = vcmp.lt.s32.totalorder %v7472_v54, 2  ;;  %v780_v20 = vadd.f32 %v764_v43, %v7242_v36  ;;  %v781_v27 = vmul.f32 %v8323_v11, %v8323_v11 }
 0x2d1   : > { %v783_v2 = vmul.f32 %v8324_v52, %v8324_v52  ;;  %v782_v58 = vmul.f32 %v8325_v5, %v8325_v5  ;;  %v2624_v17 = vshrl.u32 %v2606_v16, %v2622_v63  ;;  %v784_v9 = vmul.f32 %v8326_v21, %v8326_v21  ;;  %v8331_v16 = vld [vmem:[#allocation48_spill] sm:$0xff] }
 0x2d2   : > { %v2627_v56 = vadd.s32 127, %v2626_v49  ;;  %v785_v25 = vmul.f32 %v8327_v8, %v8327_v8  ;;  %v8328_v46 = vand.u32 2147483647, %v7198_v39  ;;  %v797_v43 = vadd.f32 %v781_v27, %v7377_v50 }
 0x2d3   : > { %v799_v11 = vadd.f32 %v783_v2, %v7428_v0  ;;  %v798_v5 = vadd.f32 %v782_v58, %v7431_v33  ;;  %v787_v63 = vmul.f32 %v8331_v16, %v8331_v16  ;;  %v2625_v49 = vor.u32 %v2624_v17, %v2623_v61  ;;  %v8334_v0 = vld [vmem:[#allocation51_spill] sm:$0xff]  ;;  %v8335_v58 = vld [vmem:[#allocation52_spill] sm:$0xff] }
 0x2d4   : > { %vm7621_vm2 = vcmp.le.f32.partialorder %v8328_v46, 0.7853982  ;;  %v2628_v52 = vshll.u32 %v2627_v56, 23  ;;  %v800_v21 = vadd.f32 %v784_v9, %v7451_v24  ;;  %v801_v8 = vadd.f32 %v785_v25, %v7493_v38 }
 0x2d5   : > { %v803_v46 = vadd.f32 %v787_v63, %v7501_v23  ;;  %v786_v18 = vmul.f32 %v8332_v40, %v8332_v40  ;;  %v788_v50 = vmul.f32 %v8333_v15, %v8333_v15  ;;  %v789_v33 = vmul.f32 %v8334_v0, %v8334_v0  ;;  %v8336_v40 = vld [vmem:[#allocation53_spill] sm:$0xff] }
 0x2d6   : > { %v2629_v27 = vor.u32 4788187, %v2628_v52  ;;  %v2632_v2 = vcvt.s32.f32 %v2625_v49  ;;  %v791_v61 = vmul.f32 %v8335_v58, %v8335_v58  ;;  %v790_v24 = vmul.f32 %v6782_v14, %v6782_v14  ;;  %v8337_v49 = vld [vmem:[#allocation54_spill] sm:$0xff] }
 0x2d7   : > { %v802_v9 = vadd.f32 %v786_v18, %v7519_v26  ;;  %v804_v38 = vadd.f32 %v788_v50, %v7523_v62  ;;  %v805_v23 = vadd.f32 %v789_v33, %v7538_v45  ;;  %v792_v15 = vmul.f32 %v8336_v40, %v8336_v40  ;;  %v8338_v62 = vld [vmem:[#allocation55_spill] sm:$0xff]  ;;  %v8343_v40 = vld [vmem:[#allocation60_spill] sm:$0xff] }
 0x2d8   : > { %v2630_v17 = vand.u32 2147483647, %v2629_v27  ;;  %v807_v56 = vadd.f32 %v791_v61, %v7547_v55  ;;  %v806_v25 = vadd.f32 %v790_v24, %v774_v13  ;;  %v793_v16 = vmul.f32 %v6794_v35, %v6794_v35  ;;  %v8339_v13 = vld [vmem:[#allocation56_spill] sm:$0xff]  ;;  %v8342_v61 = vld [vmem:[#allocation59_spill] sm:$0xff] }
 0x2d9   : > { %v808_v63 = vadd.f32 %v792_v15, %v776_v60  ;;  %v795_v14 = vmul.f32 %v6796_v22, %v6796_v22  ;;  %v794_v26 = vmul.f32 %v8337_v49, %v8337_v49  ;;  %v796_v45 = vmul.f32 %v8338_v62, %v8338_v62 }
 0x2da   : > { %v7659_v18 = vsel %vm4236_vm10, %v4239_v51, %v4242_v48  ;;  %v2633_v52 = vmul.f32 %v2632_v2, %v2630_v17  ;;  %v809_v55 = vadd.f32 %v793_v16, %v777_v44  ;;  %v813_v50 = vmul.f32 %v8339_v13, %v8339_v13  ;;  %v8344_v17 = vld [vmem:[#allocation62_spill] sm:$0xff]  ;;  %v8345_v16 = vld [vmem:[#allocation63_spill] sm:$0xff] }
 0x2db   : > { %v7664_v35 = vmul.f32 30.0, %v6493_v57  ;;  %v811_v60 = vadd.f32 %v795_v14, %v779_v4  ;;  %v810_v22 = vadd.f32 %v794_v26, %v778_v7  ;;  %v812_v0 = vadd.f32 %v796_v45, %v780_v20  ;;  %v8340_v57 = vld [vmem:[#allocation57_spill] sm:$0xff]  ;;  %v8341_v20 = vld [vmem:[#allocation58_spill] sm:$0xff] }
 0x2dc   : > { %v2639_v33 = vsel %vm7621_vm2, 0, %v2637_v29  ;;  %v7669_v27 = vmul.f32 30.0, %v6543_v10  ;;  %v7672_v48 = vmul.f32 30.0, %v6545_v32  ;;  %v829_v54 = vadd.f32 %v813_v50, %v797_v43  ;;  %v8348_v26 = vld [vmem:[#allocation66_spill] sm:$0xff]  ;;  %v8349_v50 = vld [vmem:[#allocation67_spill] sm:$0xff] }
 0x2dd   : > { %v2429_v44 = vsel %vm2346_vm5, %v2428_v37, %v7577_v1  ;;  %v2634_v51 = vxor.u32 2147483648, %v2633_v52  ;;  %v815_v4 = vmul.f32 %v8340_v57, %v8340_v57  ;;  %v814_v7 = vmul.f32 %v6845_v30, %v6845_v30 }
 0x2de   : > { %v7682_v29 = vmul.f32 30.0, %v8298_v6  ;;  %v7685_v10 = vmul.f32 30.0, %v8299_v34  ;;  %v7688_v32 = vmul.f32 30.0, %v8302_v28  ;;  %v816_v43 = vmul.f32 %v8341_v20, %v8341_v20  ;;  %v8351_v20 = vld [vmem:[#allocation70_spill] sm:$0xff] }
 0x2df   : > { %v7692_v1 = vand.u32 3, %v2639_v33  ;;  %v7694_v37 = vadd.s32 3, %v2639_v33  ;;  %v7697_v2 = vmul.f32 30.0, %v8303_v41  ;;  %v831_v30 = vadd.f32 %v815_v4, %v799_v11  ;;  %v8350_v4 = vld [vmem:[#allocation69_spill] sm:$0xff] }
 0x2e0   : > { %v2432_v6 = vsel %vm7480_vm6, %v7106_v42, %v2429_v44  ;;  %v830_v34 = vadd.f32 %v814_v7, %v798_v5  ;;  %v832_v58 = vadd.f32 %v816_v43, %v800_v21  ;;  %v817_v28 = vmul.f32 %v8342_v61, %v8342_v61  ;;  %v8347_v21 = vld [vmem:[#allocation65_spill] sm:$0xff]  ;;  %v8352_v61 = vld [vmem:[#allocation71_spill] sm:$0xff] }
 0x2e1   : > { %v2635_v24 = vsel %vm2552_vm13, %v2634_v51, %v2633_v52  ;;  %v819_v15 = vmul.f32 %v8343_v40, %v8343_v40  ;;  %v818_v41 = vmul.f32 %v8344_v17, %v8344_v17  ;;  %v820_v11 = vmul.f32 %v8345_v16, %v8345_v16  ;;  %v8353_v40 = vld [vmem:[#allocation72_spill] sm:$0xff] }
 0x2e2   : > { %v833_v14 = vadd.f32 %v817_v28, %v801_v8  ;;  %v821_v5 = vmul.f32 %v8346_v31, %v8346_v31  ;;  %v823_v49 = vmul.f32 %v8347_v21, %v8347_v21  ;;  %v822_v62 = vmul.f32 %v8348_v26, %v8348_v26  ;;  %v8358_v26 = vld [vmem:[#allocation79_spill] sm:$0xff] }
 0x2e3   : > { %v835_v45 = vadd.f32 %v819_v15, %v803_v46  ;;  %v834_v52 = vadd.f32 %v818_v41, %v802_v9  ;;  %v836_v13 = vadd.f32 %v820_v11, %v804_v38  ;;  %v824_v33 = vmul.f32 %v8349_v50, %v8349_v50  ;;  %v8354_v38 = vld [vmem:[#allocation75_spill] sm:$0xff]  ;;  %v8357_v11 = vld [vmem:[#allocation78_spill] sm:$0xff]  ;;  %v8359_v50 = vld [vmem:[#allocation80_spill] sm:$0xff] }
 0x2e4   : > { %v837_v44 = vadd.f32 %v821_v5, %v805_v23  ;;  %v839_v51 = vadd.f32 %v823_v49, %v807_v56  ;;  %v838_v57 = vadd.f32 %v822_v62, %v806_v25  ;;  %v825_v8 = vmul.f32 %v8350_v4, %v8350_v4  ;;  %v8355_v23 = vld [vmem:[#allocation76_spill] sm:$0xff]  ;;  %v8356_v25 = vld [vmem:[#allocation77_spill] sm:$0xff] }
 0x2e5   : > { %v840_v7 = vadd.f32 %v824_v33, %v808_v63  ;;  %v827_v43 = vmul.f32 %v8351_v20, %v8351_v20  ;;  %v826_v28 = vmul.f32 %v8352_v61, %v8352_v61  ;;  %v828_v46 = vmul.f32 %v8353_v40, %v8353_v40  ;;  %v8360_v4 = vld [vmem:[#allocation81_spill] sm:$0xff]  ;;  %v8361_v20 = vld [vmem:[#allocation82_spill] sm:$0xff] }
 0x2e6   : > { %v841_v9 = vadd.f32 %v825_v8, %v809_v55  ;;  %v845_v15 = vmul.f32 %v8354_v38, %v8354_v38  ;;  %v847_v56 = vmul.f32 %v8355_v23, %v8355_v23  ;;  %v846_v17 = vmul.f32 %v8356_v25, %v8356_v25  ;;  %v8365_v25 = vld [vmem:[#allocation86_spill] sm:$0xff] }
 0x2e7   : > { %v843_v63 = vadd.f32 %v827_v43, %v811_v60  ;;  %v842_v41 = vadd.f32 %v826_v28, %v810_v22  ;;  %v844_v16 = vadd.f32 %v828_v46, %v812_v0  ;;  %v848_v31 = vmul.f32 %v8357_v11, %v8357_v11  ;;  %v8362_v0 = vld [vmem:[#allocation83_spill] sm:$0xff] }
 0x2e8   : > { %v861_v5 = vadd.f32 %v845_v15, %v829_v54  ;;  %v863_v21 = vadd.f32 %v847_v56, %v831_v30  ;;  %v862_v49 = vadd.f32 %v846_v17, %v830_v34  ;;  %v849_v55 = vmul.f32 %v8358_v26, %v8358_v26  ;;  %v8363_v54 = vld [vmem:[#allocation84_spill] sm:$0xff]  ;;  %v8364_v34 = vld [vmem:[#allocation85_spill] sm:$0xff] }
 0x2e9   : > { %v864_v62 = vadd.f32 %v848_v31, %v832_v58  ;;  %v851_v33 = vmul.f32 %v8359_v50, %v8359_v50  ;;  %v850_v8 = vmul.f32 %v8360_v4, %v8360_v4  ;;  %v852_v60 = vmul.f32 %v8361_v20, %v8361_v20  ;;  %v8369_v31 = vld [vmem:[#allocation90_spill] sm:$0xff] }
 0x2ea   : > { %v865_v22 = vadd.f32 %v849_v55, %v833_v14  ;;  %v853_v43 = vmul.f32 %v8362_v0, %v8362_v0  ;;  %v855_v30 = vmul.f32 %v8363_v54, %v8363_v54  ;;  %v854_v61 = vmul.f32 %v8364_v34, %v8364_v34  ;;  %v8370_v55 = vld [vmem:[#allocation91_spill] sm:$0xff]  ;;  %v8373_v4 = vld [vmem:[#allocation94_spill] sm:$0xff] }
 0x2eb   : > { %v7751_v58 = vmul.f32 30.0, %v8306_v53  ;;  %v867_v28 = vadd.f32 %v851_v33, %v835_v45  ;;  %v866_v40 = vadd.f32 %v850_v8, %v834_v52  ;;  %v868_v46 = vadd.f32 %v852_v60, %v836_v13  ;;  %v8366_v45 = vld [vmem:[#allocation87_spill] sm:$0xff]  ;;  %v8372_v33 = vld [vmem:[#allocation93_spill] sm:$0xff] }
 0x2ec   : > { %v2638_v38 = vsel %vm7621_vm2, %v7198_v39, %v2635_v24  ;;  %v7756_v14 = vadd.f32 %v853_v43, %v837_v44  ;;  %v7758_v15 = vadd.f32 %v855_v30, %v839_v51  ;;  %v7760_v23 = vadd.f32 %v854_v61, %v838_v57  ;;  %v8367_v24 = vld [vmem:[#allocation88_spill] sm:$0xff]  ;;  %v8368_v44 = vld [vmem:[#allocation89_spill] sm:$0xff]  ;;  %v8374_v8 = vld [vmem:[#allocation95_spill] sm:$0xff] }
 0x2ed   : > { %4886 = vcosq.f32 %v2432_v6  ;;  %v7763_v56 = vmul.f32 30.0, %v8311_v47  ;;  %v856_v53 = vmul.f32 %v8365_v25, %v8365_v25  ;;  %v857_v52 = vmul.f32 %v8366_v45, %v8366_v45  ;;  %v8376_v60 = vld [vmem:[#allocation97_spill] sm:$0xff] }
 0x2ee   : > { %4888 = vsinq.f32 %v2432_v6  ;;  %v7770_v36 = vmul.f32 30.0, %v8314_v19  ;;  %v859_v13 = vmul.f32 %v8367_v24, %v8367_v24  ;;  %v858_v51 = vmul.f32 %v8368_v44, %v8368_v44 }
 0x2ef   : > { %4890 = vcosq.f32 %v2638_v38  ;;  %v7777_v47 = vmul.f32 30.0, %v8317_v3  ;;  %v7779_v57 = vadd.f32 %v856_v53, %v840_v7  ;;  %v7781_v17 = vadd.f32 %v857_v52, %v841_v9  ;;  %v8371_v3 = vld [vmem:[#allocation92_spill] sm:$0xff] }
 0x2f0   : > { %4892 = vsinq.f32 %v2638_v38  ;;  %v7784_v6 = vmul.f32 30.0, %v8319_v59  ;;  %v7786_v19 = vadd.f32 %v859_v13, %v843_v63  ;;  %v7788_v11 = vadd.f32 %v858_v51, %v842_v41  ;;  %v8375_v41 = vld [vmem:[#allocation96_spill] sm:$0xff]  ;;  %v8377_v13 = vld [vmem:[#allocation98_spill] sm:$0xff] }
 0x2f1   : > { %v860_v26 = vmul.f32 %v8369_v31, %v8369_v31  ;;  %v877_v50 = vmul.f32 %v8370_v55, %v8370_v55  ;;  %v879_v7 = vmul.f32 %v8371_v3, %v8371_v3  ;;  %v878_v9 = vmul.f32 %v8372_v33, %v8372_v33 }
 0x2f2   : > { %v880_v59 = vmul.f32 %v8373_v4, %v8373_v4  ;;  %v881_v63 = vmul.f32 %v8374_v8, %v8374_v8  ;;  %v883_v20 = vmul.f32 %v8375_v41, %v8375_v41  ;;  %v882_v0 = vmul.f32 %v8376_v60, %v8376_v60  ;;  %v8380_v8 = vld [vmem:[#allocation99_spill] sm:$0xff] }
 0x2f3   : > { %v7806_v43 = vadd.f32 %v860_v26, %v844_v16  ;;  %v893_v54 = vadd.f32 %v877_v50, %v861_v5  ;;  %v895_v30 = vadd.f32 %v879_v7, %v863_v21  ;;  %v894_v34 = vadd.f32 %v878_v9, %v862_v49  ;;  %v8378_v5 = vld [vmem:[#allocation12_spill] sm:$0xff]  ;;  %v8379_v49 = vld [vmem:[#allocation29_spill] sm:$0xff] }
 0x2f4   : > { %v896_v61 = vadd.f32 %v880_v59, %v864_v62  ;;  %v897_v38 = vadd.f32 %v881_v63, %v865_v22  ;;  %v899_v25 = vadd.f32 %v883_v20, %v867_v28  ;;  %v898_v53 = vadd.f32 %v882_v0, %v866_v40 }
 0x2f5   : > { %v909_v45 = vmul.f32 -1000.0, %v893_v54  ;;  %v911_v52 = vmul.f32 -1000.0, %v895_v30  ;;  %v910_v24 = vmul.f32 -1000.0, %v894_v34  ;;  %v884_v44 = vmul.f32 %v8377_v13, %v8377_v13  ;;  %v8382_v30 = vld [vmem:[#allocation101_spill] sm:$0xff] }
 0x2f6   : > { %v912_v51 = vmul.f32 -1000.0, %v896_v61  ;;  %v913_v31 = vmul.f32 -1000.0, %v897_v38  ;;  %v915_v55 = vmul.f32 -1000.0, %v899_v25  ;;  %v914_v3 = vmul.f32 -1000.0, %v898_v53  ;;  %v8383_v61 = vld [vmem:[#allocation102_spill] sm:$0xff] }
 0x2f7   : > { %v7810_v33 = vpop.eup %4886  ;;  %v941_v16 = vsub.f32 %v909_v45, %v7463_v12  ;;  %v943_v21 = vsub.f32 %v911_v52, %v8378_v5  ;;  %v942_v62 = vsub.f32 %v910_v24, %v8379_v49  ;;  %v900_v22 = vadd.f32 %v884_v44, %v868_v46  ;;  %v8384_v45 = vld [vmem:[#allocation103_spill] sm:$0xff]  ;;  %v8385_v5 = vld [vmem:[#allocation104_spill] sm:$0xff] }
 0x2f8   : > { %v7815_v28 = vpop.eup %4888  ;;  %v944_v40 = vsub.f32 %v912_v51, %v7664_v35  ;;  %v945_v26 = vsub.f32 %v913_v31, %v7669_v27  ;;  %v947_v50 = vsub.f32 %v915_v55, %v7672_v48  ;;  %v946_v7 = vsub.f32 %v914_v3, %v7682_v29  ;;  %v8381_v35 = vld [vmem:[#allocation100_spill] sm:$0xff]  ;;  %v8386_v49 = vld [vmem:[#allocation107_spill] sm:$0xff] }
 0x2f9   : > { %v7821_v9 = vpop.eup %4890  ;;  %v957_v4 = vmul.f32 1.442695, %v941_v16  ;;  %v961_v59 = vmul.f32 1.442695, %v943_v21  ;;  %v959_v12 = vmul.f32 1.442695, %v942_v62  ;;  %v885_v63 = vmul.f32 %v8380_v8, %v8380_v8 }
 0x2fa   : > { %v7825_v41 = vpop.eup %4892  ;;  %v963_v46 = vmul.f32 1.442695, %v944_v40  ;;  %v965_v20 = vmul.f32 1.442695, %v945_v26  ;;  %v969_v60 = vmul.f32 1.442695, %v947_v50  ;;  %v887_v27 = vmul.f32 %v8381_v35, %v8381_v35 }
 0x2fb   : > { %4894 = vpow2.f32 %v957_v4  ;;  %v967_v48 = vmul.f32 1.442695, %v946_v7  ;;  %v916_v0 = vmul.f32 -1000.0, %v900_v22  ;;  %v901_v29 = vadd.f32 %v885_v63, %v7756_v14  ;;  %v8387_v26 = vld [vmem:[#allocation108_spill] sm:$0xff]  ;;  %v8388_v4 = vld [vmem:[#allocation41_spill] sm:$0xff] }
 0x2fc   : > { %4896 = vpow2.f32 %v961_v59  ;;  %v903_v54 = vadd.f32 %v887_v27, %v7758_v15  ;;  %v886_v34 = vmul.f32 %v8382_v30, %v8382_v30  ;;  %v888_v38 = vmul.f32 %v8383_v61, %v8383_v61  ;;  %v8390_v63 = vld [vmem:[#allocation5_spill] sm:$0xff]  ;;  %v8392_v27 = vld [vmem:[#allocation30_spill] sm:$0xff]  ;;  %v8396_v61 = vld [vmem:[#allocation20_spill] sm:$0xff] }
 0x2fd   : > { %4898 = vpow2.f32 %v959_v12  ;;  %v948_v25 = vsub.f32 %v916_v0, %v7685_v10  ;;  %v917_v53 = vmul.f32 -1000.0, %v901_v29  ;;  %v889_v52 = vmul.f32 %v8384_v45, %v8384_v45  ;;  %v8391_v35 = vld [vmem:[#allocation17_spill] sm:$0xff]  ;;  %v8394_v29 = vld [vmem:[#allocation16_spill] sm:$0xff] }
 0x2fe   : > { %4900 = vpow2.f32 %v963_v46  ;;  %v919_v24 = vmul.f32 -1000.0, %v903_v54  ;;  %v902_v14 = vadd.f32 %v886_v34, %v7760_v23  ;;  %v904_v15 = vadd.f32 %v888_v38, %v7779_v57 }
 0x2ff   : > { %4902 = vpow2.f32 %v965_v20  ;;  %v971_v13 = vmul.f32 1.442695, %v948_v25  ;;  %v949_v44 = vsub.f32 %v917_v53, %v7688_v32  ;;  %v905_v51 = vadd.f32 %v889_v52, %v7781_v17  ;;  %v8397_v53 = vld [vmem:[#allocation24_spill] sm:$0xff]  ;;  %v8398_v52 = vld [vmem:[#allocation25_spill] sm:$0xff] }
 0x300   : > { %4904 = vpow2.f32 %v969_v60  ;;  %v951_v10 = vsub.f32 %v919_v24, %v7697_v2  ;;  %v918_v31 = vmul.f32 -1000.0, %v902_v14  ;;  %v920_v55 = vmul.f32 -1000.0, %v904_v15 }
 0x301   : > { %4906 = vpow2.f32 %v967_v48  ;;  %v973_v3 = vmul.f32 1.442695, %v949_v44  ;;  %v921_v16 = vmul.f32 -1000.0, %v905_v51  ;;  %v891_v21 = vmul.f32 %v8385_v5, %v8385_v5  ;;  %v8393_v48 = vld [vmem:[#allocation15_spill] sm:$0xff]  ;;  %v8399_v51 = vld [vmem:[#allocation6_spill] sm:$0xff]  ;;  %v8401_v5 = vld [vmem:[#allocation44_spill] sm:$0xff] }
 0x302   : > { %4908 = vpow2.f32 %v971_v13  ;;  %v977_v23 = vmul.f32 1.442695, %v951_v10  ;;  %v950_v32 = vsub.f32 %v918_v31, %v7751_v58  ;;  %v952_v57 = vsub.f32 %v920_v55, %v7763_v56  ;;  %v8400_v31 = vld [vmem:[#allocation26_spill] sm:$0xff] }
 0x303   : > { %4910 = vpow2.f32 %v973_v3  ;;  %v953_v2 = vsub.f32 %v921_v16, %v7770_v36  ;;  %v907_v17 = vadd.f32 %v891_v21, %v7786_v19  ;;  %v890_v62 = vmul.f32 %v8386_v49, %v8386_v49  ;;  %v8389_v19 = vld [vmem:[#allocation4_spill] sm:$0xff]  ;;  %v8402_v21 = vld [vmem:[#allocation27_spill] sm:$0xff] }
 0x304   : > { %4912 = vpow2.f32 %v977_v23  ;;  %v975_v22 = vmul.f32 1.442695, %v950_v32  ;;  %v979_v40 = vmul.f32 1.442695, %v952_v57  ;;  %v892_v50 = vmul.f32 %v8387_v26, %v8387_v26  ;;  %v8403_v23 = vld [vmem:[#allocation28_spill] sm:$0xff] }
 0x305   : > { %v4895_v7 = vpop.eup %4894  ;;  %v7858_v59 = vmul.f32 30.0, %v8388_v4  ;;  %v981_v58 = vmul.f32 1.442695, %v953_v2  ;;  %v923_v56 = vmul.f32 -1000.0, %v907_v17  ;;  %v906_v12 = vadd.f32 %v890_v62, %v7788_v11  ;;  %v8405_v62 = vld [vmem:[#allocation31_spill] sm:$0xff] }
 0x306   : > { %v4897_v36 = vpop.eup %4896  ;;  %v2653_v8 = vmul.f32 %v4895_v7, %v8389_v19  ;;  %v4349_v46 = vmul.f32 %v4895_v7, %v8390_v63  ;;  %4914 = vpow2.f32 %v975_v22  ;;  %v908_v20 = vadd.f32 %v892_v50, %v7806_v43  ;;  %v8395_v43 = vld [vmem:[#allocation19_spill] sm:$0xff]  ;;  %v8406_v7 = vld [vmem:[#allocation61_spill] sm:$0xff]  ;;  %v8409_v63 = vld [vmem:[#allocation74_spill] sm:$0xff] }
 0x307   : > { %v4899_v60 = vpop.eup %4898  ;;  %vm2442_vm14 = vcmp.eq.s32.totalorder %v8391_v35, 2  ;;  %vm4136_vm1 = vcmp.eq.s32.totalorder %v8392_v27, 2  ;;  %v2655_v0 = vmul.f32 %v4897_v36, %v8393_v48  ;;  %v4351_v54 = vmul.f32 %v4897_v36, %v8394_v29  ;;  %v8408_v19 = vld [vmem:[#allocation73_spill] sm:$0xff] }
 0x308   : > { %4916 = vpow2.f32 %v979_v40  ;;  %v955_v11 = vsub.f32 %v923_v56, %v7777_v47  ;;  %v4901_v30 = vpop.eup %4900  ;;  %vm2439_vm5 = vcmp.eq.s32.totalorder %v8391_v35, 0  ;;  %vm4133_vm4 = vcmp.eq.s32.totalorder %v8392_v27, 0  ;;  %2669 = vst [vmem:[%s7872_s9] sm:$0xff] %v2653_v8  ;;  %4365 = vst [vmem:[%s7872_s9 + $0x80] sm:$0xff] %v4349_v46 }
 0x309   : > { %v2654_v34 = vmul.f32 %v4899_v60, %v8395_v43  ;;  %v4350_v38 = vmul.f32 %v4899_v60, %v8396_v61  ;;  %4918 = vpow2.f32 %v981_v58  ;;  %v922_v47 = vmul.f32 -1000.0, %v906_v12  ;;  %v4903_v25 = vpop.eup %4902  ;;  %2671 = vst [vmem:[%s7872_s9 + $0x10] sm:$0xff] %v2655_v0  ;;  %4367 = vst [vmem:[%s7872_s9 + $0x90] sm:$0xff] %v4351_v54  ;;  %v8410_v60 = vld [vmem:[#allocation105_spill] sm:$0xff]  ;;  %v8411_v0 = vld [vmem:[#allocation106_spill] sm:$0xff] }
 0x30a   : > { %vm2648_vm6 = vcmp.eq.s32.totalorder %v7692_v1, 2  ;;  %v2656_v45 = vmul.f32 %v4901_v30, %v8397_v53  ;;  %v4352_v24 = vmul.f32 %v4901_v30, %v8398_v52  ;;  %v985_v14 = vmul.f32 1.442695, %v955_v11  ;;  %v4905_v13 = vpop.eup %4904 }
 0x30b   : > { %v924_v15 = vmul.f32 -1000.0, %v908_v20  ;;  %vm2645_vm7 = vcmp.eq.s32.totalorder %v7692_v1, 0  ;;  %v7885_v44 = vand.u32 3, %v7694_v37  ;;  %2670 = vst [vmem:[%s7872_s9 + $0x8] sm:$0xff] %v2654_v34  ;;  %4366 = vst [vmem:[%s7872_s9 + $0x88] sm:$0xff] %v4350_v38  ;;  %v2657_v10 = vmul.f32 %v4903_v25, %v8399_v51  ;;  %v4907_v16 = vpop.eup %4906 }
 0x30c   : > { %v4353_v55 = vmul.f32 %v4903_v25, %v8400_v31  ;;  %v954_v3 = vsub.f32 %v922_v47, %v7784_v6  ;;  %vm2539_vm8 = vweird.f32 %v8401_v5  ;;  %2672 = vst [vmem:[%s7872_s9 + $0x18] sm:$0xff] %v2656_v45  ;;  %4368 = vst [vmem:[%s7872_s9 + $0x98] sm:$0xff] %v4352_v24  ;;  %v2659_v37 = vmul.f32 %v4905_v13, %v8402_v21  ;;  %v4909_v2 = vpop.eup %4908  ;;  %v8404_v6 = vld [vmem:[#allocation7_spill] sm:$0xff]  ;;  %v8413_v47 = vld [vmem:[#allocation110_spill] sm:$0xff] }
 0x30d   : > { %v4355_v32 = vmul.f32 %v4905_v13, %v8403_v23  ;;  %4920 = vpow2.f32 %v985_v14  ;;  %v956_v57 = vsub.f32 %v924_v15, %v7858_v59  ;;  %v2443_v17 = vxor.u32 2147483648, %v7810_v33  ;;  %2673 = vst [vmem:[%s7872_s9 + $0x20] sm:$0xff] %v2657_v10  ;;  %v4911_v26 = vpop.eup %4910  ;;  %v8407_v59 = vld [vmem:[#allocation68_spill] sm:$0xff]  ;;  %v8415_v15 = vld [vmem:[#allocation9_spill] sm:$0xff]  ;;  %v8416_v10 = vld [vmem:[#allocation10_spill] sm:$0xff] }
 0x30e   : > { %4369 = vst [vmem:[%s7872_s9 + $0xa0] sm:$0xff] %v4353_v55  ;;  %v2658_v49 = vmul.f32 %v4907_v16, %v8404_v6  ;;  %v4354_v22 = vmul.f32 %v4907_v16, %v8405_v62  ;;  %v983_v40 = vmul.f32 1.442695, %v954_v3  ;;  %v2440_v50 = vxor.u32 2147483648, %v7815_v28  ;;  %2675 = vst [vmem:[%s7872_s9 + $0x30] sm:$0xff] %v2659_v37  ;;  %v4913_v12 = vpop.eup %4912  ;;  %v8414_v24 = vld [vmem:[#allocation8_spill] sm:$0xff] }
 0x30f   : > { %4371 = vst [vmem:[%s7872_s9 + $0xb0] sm:$0xff] %v4355_v32  ;;  %v2660_v4 = vmul.f32 %v4909_v2, %v8406_v7  ;;  %v4356_v58 = vmul.f32 %v4909_v2, %v8407_v59  ;;  %v987_v56 = vmul.f32 1.442695, %v956_v57  ;;  %v2649_v36 = vxor.u32 2147483648, %v7821_v9  ;;  %v8417_v55 = vld [vmem:[#allocation11_spill] sm:$0xff]  ;;  %v8418_v3 = vld [vmem:[#allocation18_spill] sm:$0xff] }
 0x310   : > { %2674 = vst [vmem:[%s7872_s9 + $0x28] sm:$0xff] %v2658_v49  ;;  %4370 = vst [vmem:[%s7872_s9 + $0xa8] sm:$0xff] %v4354_v22  ;;  %v2661_v8 = vmul.f32 %v4911_v26, %v8408_v19  ;;  %v4357_v46 = vmul.f32 %v4911_v26, %v8409_v63  ;;  %4922 = vpow2.f32 %v983_v40  ;;  %v2646_v20 = vxor.u32 2147483648, %v7825_v41  ;;  %v4915_v54 = vpop.eup %4914  ;;  %v4407_v40 = vld [vmem:[%s7872_s9 + $0x10] sm:$0xff] (%p5002_p5) }
 0x311   : > { %2676 = vst [vmem:[%s7872_s9 + $0x38] sm:$0xff] %v2660_v4  ;;  %4372 = vst [vmem:[%s7872_s9 + $0xb8] sm:$0xff] %v4356_v58  ;;  %v2663_v48 = vmul.f32 %v4913_v12, %v8410_v60  ;;  %v4359_v29 = vmul.f32 %v4913_v12, %v8411_v0  ;;  %4924 = vpow2.f32 %v987_v56  ;;  %v2444_v11 = vsel %vm2442_vm14, %v2443_v17, %v7815_v28 }
 0x312   : > { %v4138_v30 = vsel %vm4136_vm1, %v2443_v17, %v7815_v28  ;;  %vm4341_vm9 = vcmp.eq.s32.totalorder %v7885_v44, 0  ;;  %vm4344_vm11 = vcmp.eq.s32.totalorder %v7885_v44, 2  ;;  %2677 = vst [vmem:[%s7872_s9 + $0x40] sm:$0xff] %v2661_v8  ;;  %4373 = vst [vmem:[%s7872_s9 + $0xc0] sm:$0xff] %v4357_v46  ;;  %v4917_v43 = vpop.eup %4916  ;;  %v2441_v34 = vsel %vm2439_vm5, %v7810_v33, %v2440_v50  ;;  %v8412_v28 = vld [vmem:[#allocation109_spill] sm:$0xff] }
 0x313   : > { %v4135_v61 = vsel %vm4133_vm4, %v7810_v33, %v2440_v50  ;;  %2679 = vst [vmem:[%s7872_s9 + $0x50] sm:$0xff] %v2663_v48  ;;  %4375 = vst [vmem:[%s7872_s9 + $0xd0] sm:$0xff] %v4359_v29  ;;  %v2662_v38 = vmul.f32 %v4915_v54, %v8412_v28  ;;  %v4358_v25 = vmul.f32 %v4915_v54, %v8413_v47  ;;  %v4919_v53 = vpop.eup %4918  ;;  %v2549_v16 = vsel %vm2539_vm8, nan, %v8418_v3  ;;  %v4409_v26 = vld [vmem:[%s7872_s9 + $0x18] sm:$0xff] (%p5002_p5)  ;;  %v4437_v60 = vld [vmem:[%s7872_s9 + $0x88] sm:$0xff] (%p5002_p5) }
 0x314   : > { %v2650_v45 = vsel %vm2648_vm6, %v2649_v36, %v7825_v41  ;;  %v4346_v52 = vsel %vm4344_vm11, %v2649_v36, %v7825_v41  ;;  %v2664_v14 = vmul.f32 %v4917_v43, %v8414_v24  ;;  %v4360_v13 = vmul.f32 %v4917_v43, %v8415_v15  ;;  %v4411_v50 = vld [vmem:[%s7872_s9 + $0x20] sm:$0xff] (%p5002_p5)  ;;  %4408 = vst [vmem:[%s7986_s17 + $0x10] sm:$0xff] (%p5002_p5), %v4407_v40  ;;  %v4439_v48 = vld [vmem:[%s7872_s9 + $0x90] sm:$0xff] (%p5002_p5)  ;;  %v4441_v0 = vld [vmem:[%s7872_s9 + $0x98] sm:$0xff] (%p5002_p5) }
 0x315   : > { %v2647_v33 = vsel %vm2645_vm7, %v7821_v9, %v2646_v20  ;;  %v4343_v51 = vsel %vm4341_vm9, %v7821_v9, %v2646_v20  ;;  %2678 = vst [vmem:[%s7872_s9 + $0x48] sm:$0xff] %v2662_v38  ;;  %4374 = vst [vmem:[%s7872_s9 + $0xc8] sm:$0xff] %v4358_v25  ;;  %v2665_v31 = vmul.f32 %v4919_v53, %v8416_v10  ;;  %v4244_v21 = vsel %vm2539_vm8, nan, %v7659_v18  ;;  %v4415_v4 = vld [vmem:[%s7872_s9 + $0x30] sm:$0xff] (%p5002_p5)  ;;  %v4435_v20 = vld [vmem:[%s7872_s9 + $0x80] sm:$0xff] (%p5002_p5) }
 0x316   : > { %v4361_v41 = vmul.f32 %v4919_v53, %v8417_v55  ;;  %vm2438_vm12 = vcmp.lt.s32.totalorder %v8391_v35, 2  ;;  %vm4132_vm15 = vcmp.lt.s32.totalorder %v8392_v27, 2  ;;  %2680 = vst [vmem:[%s7872_s9 + $0x58] sm:$0xff] %v2664_v14  ;;  %4376 = vst [vmem:[%s7872_s9 + $0xd8] sm:$0xff] %v4360_v13  ;;  %vm2644_vm3 = vcmp.lt.s32.totalorder %v7692_v1, 2  ;;  %v4443_v29 = vld [vmem:[%s7872_s9 + $0xa0] sm:$0xff] (%p5002_p5) }
 0x317   : > { %v4921_v9 = vpop.eup %4920  ;;  %v2445_v37 = vsel %vm2438_vm12, %v2441_v34, %v2444_v11  ;;  %v4139_v23 = vsel %vm4132_vm15, %v4135_v61, %v4138_v30  ;;  %vm4340_vm13 = vcmp.lt.s32.totalorder %v7885_v44, 2  ;;  %2681 = vst [vmem:[%s7872_s9 + $0x60] sm:$0xff] %v2665_v31  ;;  %v2651_v32 = vsel %vm2644_vm3, %v2647_v33, %v2650_v45  ;;  %v4413_v7 = vld [vmem:[%s7872_s9 + $0x28] sm:$0xff] (%p5002_p5)  ;;  %4410 = vst [vmem:[%s7986_s17 + $0x18] sm:$0xff] (%p5002_p5), %v4409_v26  ;;  %v4447_v11 = vld [vmem:[%s7872_s9 + $0xb0] sm:$0xff] (%p5002_p5) }
 0x318   : > { %4377 = vst [vmem:[%s7872_s9 + $0xe0] sm:$0xff] %v4361_v41  ;;  %v4347_v5 = vsel %vm4340_vm13, %v4343_v51, %v4346_v52  ;;  %v2667_v18 = vmul.f32 %v4921_v9, %v2549_v16  ;;  %v4363_v35 = vmul.f32 %v4921_v9, %v4244_v21  ;;  %vm2436_vm0 = vweird.f32 %v7106_v42  ;;  %4387 = sbr.rel (!%p5002_p5) target bundleno = 811 (0x32b), region = 55  ;;  %v4403_v42 = vld [vmem:[%s7872_s9] sm:$0xff] (%p5002_p5)  ;;  %4412 = vst [vmem:[%s7986_s17 + $0x80] sm:$0xff] (%p5002_p5), %v4411_v50  ;;  %v4417_v59 = vld [vmem:[%s7872_s9 + $0x38] sm:$0xff] (%p5002_p5) }
 0x319   : > { %v2446_v57 = vsel %vm2436_vm0, nan, %v2445_v37  ;;  %v4140_v2 = vsel %vm2436_vm0, nan, %v4139_v23  ;;  %vm2642_vm10 = vweird.f32 %v7198_v39  ;;  %v4405_v39 = vld [vmem:[%s7872_s9 + $0x8] sm:$0xff] (%p5002_p5)  ;;  %4404 = vst [vmem:[%s7986_s17] sm:$0xff] (%p5002_p5), %v4403_v42  ;;  %4414 = vst [vmem:[%s7986_s17 + $0x88] sm:$0xff] (%p5002_p5), %v4413_v7  ;;  %v4419_v58 = vld [vmem:[%s7872_s9 + $0x40] sm:$0xff] (%p5002_p5) }
 0x31a   : > { %v4923_v27 = vpop.eup %4922  ;;  %2683 = vst [vmem:[%s7872_s9 + $0x70] sm:$0xff] %v2667_v18  ;;  %4379 = vst [vmem:[%s7872_s9 + $0xf0] sm:$0xff] %v4363_v35  ;;  %v2652_v44 = vsel %vm2642_vm10, nan, %v2651_v32  ;;  %v4348_v17 = vsel %vm2642_vm10, nan, %v4347_v5  ;;  %v4423_v12 = vld [vmem:[%s7872_s9 + $0x50] sm:$0xff] (%p5002_p5)  ;;  %v4445_v54 = vld [vmem:[%s7872_s9 + $0xa8] sm:$0xff] (%p5002_p5) }
 0x31b   : > { %v4925_v1 = vpop.eup %4924  ;;  %v2666_v6 = vmul.f32 %v4923_v27, %v2446_v57  ;;  %v4362_v49 = vmul.f32 %v4923_v27, %v4140_v2  ;;  %4406 = vst [vmem:[%s7986_s17 + $0x8] sm:$0xff] (%p5002_p5), %v4405_v39  ;;  %4416 = vst [vmem:[%s7986_s17 + $0x90] sm:$0xff] (%p5002_p5), %v4415_v4  ;;  %v4449_v30 = vld [vmem:[%s7872_s9 + $0xb8] sm:$0xff] (%p5002_p5)  ;;  %v4451_v43 = vld [vmem:[%s7872_s9 + $0xc0] sm:$0xff] (%p5002_p5) }
 0x31c   : > { %v2668_v62 = vmul.f32 %v4925_v1, %v2652_v44  ;;  %v4364_v22 = vmul.f32 %v4925_v1, %v4348_v17  ;;  %4418 = vst [vmem:[%s7986_s17 + $0x98] sm:$0xff] (%p5002_p5), %v4417_v59  ;;  %4420 = vst [vmem:[%s7986_s17 + $0x100] sm:$0xff] (%p5002_p5), %v4419_v58  ;;  %v4421_v56 = vld [vmem:[%s7872_s9 + $0x48] sm:$0xff] (%p5002_p5)  ;;  %v4455_v61 = vld [vmem:[%s7872_s9 + $0xd0] sm:$0xff] (%p5002_p5) }
 0x31d   : > { %2682 = vst [vmem:[%s7872_s9 + $0x68] sm:$0xff] %v2666_v6  ;;  %4378 = vst [vmem:[%s7872_s9 + $0xe8] sm:$0xff] %v4362_v49  ;;  %v4425_v36 = vld [vmem:[%s7872_s9 + $0x58] sm:$0xff] (%p5002_p5)  ;;  %v4453_v34 = vld [vmem:[%s7872_s9 + $0xc8] sm:$0xff] (%p5002_p5) }
 0x31e   : > { %2684 = vst [vmem:[%s7872_s9 + $0x78] sm:$0xff] %v2668_v62  ;;  %4380 = vst [vmem:[%s7872_s9 + $0xf8] sm:$0xff] %v4364_v22  ;;  %v4427_v19 = vld [vmem:[%s7872_s9 + $0x60] sm:$0xff] (%p5002_p5)  ;;  %v4457_v28 = vld [vmem:[%s7872_s9 + $0xd8] sm:$0xff] (%p5002_p5) }
 0x31f   : > { %4422 = vst [vmem:[%s7986_s17 + $0x108] sm:$0xff] %v4421_v56  ;;  %4424 = vst [vmem:[%s7986_s17 + $0x110] sm:$0xff] %v4423_v12  ;;  %v4459_v38 = vld [vmem:[%s7872_s9 + $0xe0] sm:$0xff] }
 0x320   : > { %4426 = vst [vmem:[%s7986_s17 + $0x118] sm:$0xff] %v4425_v36  ;;  %4428 = vst [vmem:[%s7986_s17 + $0x180] sm:$0xff] %v4427_v19 }
 0x321   : > { %v4431_v63 = vld [vmem:[%s7872_s9 + $0x70] sm:$0xff]  ;;  %4436 = vst [vmem:[%s7986_s17 + $0x200] sm:$0xff] %v4435_v20  ;;  %4438 = vst [vmem:[%s7986_s17 + $0x208] sm:$0xff] %v4437_v60 }
 0x322   : > { %4432 = vst [vmem:[%s7986_s17 + $0x190] sm:$0xff] %v4431_v63  ;;  %4440 = vst [vmem:[%s7986_s17 + $0x210] sm:$0xff] %v4439_v48  ;;  %v4463_v25 = vld [vmem:[%s7872_s9 + $0xf0] sm:$0xff] }
 0x323   : > { %4442 = vst [vmem:[%s7986_s17 + $0x218] sm:$0xff] %v4441_v0  ;;  %4444 = vst [vmem:[%s7986_s17 + $0x280] sm:$0xff] %v4443_v29 }
 0x324   : > { %v4429_v8 = vld [vmem:[%s7872_s9 + $0x68] sm:$0xff]  ;;  %4446 = vst [vmem:[%s7986_s17 + $0x288] sm:$0xff] %v4445_v54  ;;  %4448 = vst [vmem:[%s7986_s17 + $0x290] sm:$0xff] %v4447_v11 }
 0x325   : > { %4430 = vst [vmem:[%s7986_s17 + $0x188] sm:$0xff] %v4429_v8  ;;  %v4433_v46 = vld [vmem:[%s7872_s9 + $0x78] sm:$0xff]  ;;  %4450 = vst [vmem:[%s7986_s17 + $0x298] sm:$0xff] %v4449_v30  ;;  %v4461_v47 = vld [vmem:[%s7872_s9 + $0xe8] sm:$0xff] }
 0x326   : > { %4434 = vst [vmem:[%s7986_s17 + $0x198] sm:$0xff] %v4433_v46  ;;  %4452 = vst [vmem:[%s7986_s17 + $0x300] sm:$0xff] %v4451_v43  ;;  %v4465_v53 = vld [vmem:[%s7872_s9 + $0xf8] sm:$0xff] }
 0x327   : > { %4454 = vst [vmem:[%s7986_s17 + $0x308] sm:$0xff] %v4453_v34  ;;  %4456 = vst [vmem:[%s7986_s17 + $0x310] sm:$0xff] %v4455_v61 }
 0x328   : > { %4458 = vst [vmem:[%s7986_s17 + $0x318] sm:$0xff] %v4457_v28  ;;  %4460 = vst [vmem:[%s7986_s17 + $0x380] sm:$0xff] %v4459_v38 }
 0x329   : > { %4462 = vst [vmem:[%s7986_s17 + $0x388] sm:$0xff] %v4461_v47  ;;  %4464 = vst [vmem:[%s7986_s17 + $0x390] sm:$0xff] %v4463_v25 }
 0x32a   : > { %4466 = vst [vmem:[%s7986_s17 + $0x398] sm:$0xff] %v4465_v53 }
 0x32b PF: > { %p9_p10 = scmp.ge.s32.totalorder %s4989_s13, 6   ;;  %s8419_s9 = smov %s4944_s10 }
 0x32c   : > { %s8420_s10 = smov %s5000_s16  ;;  %s8421_s11 = smov %s4989_s13 }
 0x32d   :  { %11 = sbr.rel (!%p9_p10) target bundleno = 2 (0x2), region = 109 }

</bundles_post_ra>
